<compile_context>
chip_gen: v7x
topology: tpu7x:2x2x1
jax: 0.10.0
libtpu: 0.0.40
codegen_flags: <defaults>
</compile_context>

<pallas_src>
import numpy as np
import jax
import jax.numpy as jnp
from jax import lax
from jax.experimental import pallas as pl
from jax.experimental.pallas import tpu as pltpu

# ----------------------------- module constants ------------------------------
HEAD_CHANNELS = (256, 128, 64, 64)     # out_channel_list in the PyTorch module
HEAD_SCALES = (2, 4, 8, 16)            # upsampe_scale
# (kernel, padding, dilation) per conv stage of the 4 GCmodule branches
BRANCH_CONVS = (
    ((1, 0, 1), (3, 1, 1)),
    ((3, 1, 1), (3, 3, 3)),
    ((5, 1, 1), (3, 5, 5)),
    ((1, 0, 1),),
)
BN_EPS = 1e-5


# ----------------------- parameter / resampling helpers ----------------------
def bilinear_matrix(out_size, in_size, align_corners):
    """1-D bilinear interpolation matrix matching PyTorch semantics."""
    A = np.zeros((out_size, in_size), np.float32)
    for o in range(out_size):
        if align_corners:
            src = 0.0 if out_size == 1 else o * (in_size - 1) / (out_size - 1)
        else:
            src = (o + 0.5) * in_size / out_size - 0.5
            src = max(src, 0.0)
        i0 = min(max(int(np.floor(src)), 0), in_size - 1)
        i1 = min(i0 + 1, in_size - 1)
        frac = src - i0
        A[o, i0] += 1.0 - frac
        A[o, i1] += frac
    return jnp.asarray(A)


def fold_bn(w, b, gamma, beta, mean, var):
    """Fold an eval-mode BatchNorm2d into the preceding conv's weight/bias."""
    scale = gamma / jnp.sqrt(var + BN_EPS)
    return w * scale[:, None, None, None], (b - mean) * scale + beta


def conv2d_nchw(x, w, b, pad, dil, precision=None):
    """NCHW conv + bias (used by the pure-JAX reference only)."""
    y = lax.conv_general_dilated(
        x, w, window_strides=(1, 1), padding=[(pad, pad), (pad, pad)],
        rhs_dilation=(dil, dil),
        dimension_numbers=("NCHW", "OIHW", "NCHW"), precision=precision)
    return y + b[None, :, None, None]


def conv2d_nhwc(x, w_oihw, b, pad, dil):
    """NHWC conv + bias (XLA glue for the tiny GC-branch convs, channels on lanes)."""
    w = jnp.transpose(w_oihw, (2, 3, 1, 0))        # OIHW -> HWIO
    y = lax.conv_general_dilated(
        x, w, window_strides=(1, 1), padding=[(pad, pad), (pad, pad)],
        rhs_dilation=(dil, dil),
        dimension_numbers=("NHWC", "HWIO", "NHWC"))
    return y + b[None, None, None, :]


def im2col_3x3_nhwc(x_nhwc):
    """3x3, pad=1 im2col on NHWC input -> (B*H*W, 9*C), tap-major / channel-minor."""
    B, H, W, C = x_nhwc.shape
    xp = jnp.pad(x_nhwc, ((0, 0), (1, 1), (1, 1), (0, 0)))
    taps = [xp[:, dy:dy + H, dx:dx + W, :]
            for dy in range(3) for dx in range(3)]
    return jnp.concatenate(taps, axis=-1).reshape(B * H * W, 9 * C)


# ------------------------------- Pallas kernel --------------------------------
def _heads_kernel(p_ref, w_ref, b_ref, o_ref):
    # (TM, 9*Cgc) @ (9*Cgc, 512): bf16 operands, f32 accumulation, f32 bias add,
    # ReLU, bf16 lane-dense (512-wide, unmasked) store.
    acc = jnp.dot(p_ref[...], w_ref[...], preferred_element_type=jnp.float32)
    acc = acc + b_ref[...]
    o_ref[...] = jnp.maximum(acc, 0.0).astype(o_ref.dtype)


def fused_head_conv(patches, w_mat, bias):
    """All four GCoutmodel 3x3 convs (+bias+ReLU) as one fused Pallas matmul.

    patches: (M=B*HW, 9*Cgc) bf16   w_mat: (9*Cgc, 512) bf16   bias: (1, 512) f32
    returns: (M, 512) bf16  (channels of the 4 heads concatenated on the last axis)
    """
    M, K9 = patches.shape
    Ctot = w_mat.shape[1]
    # One block for the small case; tile M at 512 rows if the problem scales up
    # (keeps the 1152x512 weight resident, bounds VMEM on v7x's 64 MiB).
    TM = M if M <= 1024 or M % 512 != 0 else 512
    assert M % 8 == 0 and M % TM == 0 and K9 % 128 == 0 and Ctot % 128 == 0
    return pl.pallas_call(
        _heads_kernel,
        out_shape=jax.ShapeDtypeStruct((M, Ctot), jnp.bfloat16),
        grid=(M // TM,),
        in_specs=[
            pl.BlockSpec((TM, K9), lambda m: (m, 0)),
            pl.BlockSpec((K9, Ctot), lambda m: (0, 0)),
            pl.BlockSpec((1, Ctot), lambda m: (0, 0)),
        ],
        out_specs=pl.BlockSpec((TM, Ctot), lambda m: (m, 0)),
        compiler_params=pltpu.CompilerParams(
            dimension_semantics=("parallel",)),
    )(patches, w_mat, bias)


# ------------------------------- forward (kernel) ------------------------------
def gcm_rfb_forward(x, params):
    B, Cin, H, W = x.shape
    x_nhwc = jnp.transpose(x, (0, 2, 3, 1))                   # single NHWC transpose

    # ---- GCmodule branches: tiny NHWC convs left to XLA (BN folded, eval mode) ----
    branches = []
    for bi, stages in enumerate(BRANCH_CONVS):
        h = x_nhwc
        for si, (k, pad, dil) in enumerate(stages):
            p = params["gc"][bi][si]
            wf, bf = fold_bn(p["w"], p["b"], p["gamma"], p["beta"], p["mean"], p["var"])
            h = jnp.maximum(conv2d_nhwc(h, wf, bf, pad, dil), 0.0)
        if h.shape[1] != H or h.shape[2] != W:
            # F.interpolate(..., size=(H, W), mode='bilinear', align_corners=True)
            Rh = bilinear_matrix(H, h.shape[1], align_corners=True)
            Rw = bilinear_matrix(W, h.shape[2], align_corners=True)
            h = jnp.einsum("bhwc,ph,qw->bpqc", h, Rh, Rw)
        branches.append(h)
    gc = jnp.concatenate(branches, axis=-1)                   # (B, H, W, 4*Cout) NHWC
    Cgc = gc.shape[-1]

    # ---- fused output-head convs: one lane-dense Pallas matmul (B folded into M) ----
    patches = im2col_3x3_nhwc(gc).astype(jnp.bfloat16)        # (B*HW, 9*Cgc)
    w_mat = jnp.concatenate(
        [jnp.transpose(p["w"], (2, 3, 1, 0)).reshape(9 * Cgc, -1)
         for p in params["head"]], axis=1).astype(jnp.bfloat16)      # (9*Cgc, 512)
    b_vec = jnp.concatenate([p["b"] for p in params["head"]]).reshape(1, -1)
    head_out = fused_head_conv(patches, w_mat, b_vec)         # (B*HW, 512) bf16
    head_out = head_out.reshape(B, H, W, -1)                  # free reshape, NHWC

    # ---- bilinear upsampling of each head: two matmuls, final write is NCHW ----
    outs = []
    off = 0
    for ch, s in zip(HEAD_CHANNELS, HEAD_SCALES):
        y = head_out[..., off:off + ch]                       # (B, H, W, ch) bf16
        off += ch
        Uh = bilinear_matrix(s * H, H, align_corners=False).astype(jnp.bfloat16)
        Uw = bilinear_matrix(s * W, W, align_corners=False).astype(jnp.bfloat16)
        # Small intermediate in (B, C, sH, W); final contraction over w writes the
        # big (B, C, sH, sW) output directly (q on the lane dim, no output transpose).
        z = jnp.einsum("bhwc,ph->bcpw", y, Uh)
        outs.append(jnp.einsum("bcpw,qw->bcpq", z, Uw,
                               preferred_element_type=jnp.float32))
    return outs


# --------------------------- pure-JAX reference (golden) -----------------------
def reference_forward(x, params):
    P = lax.Precision.HIGHEST
    B, Cin, H, W = x.shape

    def bn(t, p):
        s = p["gamma"] / jnp.sqrt(p["var"] + BN_EPS)
        return ((t - p["mean"][None, :, None, None]) * s[None, :, None, None]
                + p["beta"][None, :, None, None])

    branches = []
    for bi, stages in enumerate(BRANCH_CONVS):
        h = x
        for si, (k, pad, dil) in enumerate(stages):
            p = params["gc"][bi][si]
            h = jnp.maximum(bn(conv2d_nchw(h, p["w"], p["b"], pad, dil, precision=P), p), 0.0)
        if h.shape[2] != H or h.shape[3] != W:
            Rh = bilinear_matrix(H, h.shape[2], True)
            Rw = bilinear_matrix(W, h.shape[3], True)
            h = jnp.einsum("bchw,ph,qw->bcpq", h, Rh, Rw, precision=P)
        branches.append(h)
    gc = jnp.concatenate(branches, axis=1)

    outs = []
    for p, ch, s in zip(params["head"], HEAD_CHANNELS, HEAD_SCALES):
        y = jnp.maximum(conv2d_nchw(gc, p["w"], p["b"], 1, 1, precision=P), 0.0)
        Uh = bilinear_matrix(s * H, H, False)
        Uw = bilinear_matrix(s * W, W, False)
        outs.append(jnp.einsum("bchw,ph,qw->bcpq", y, Uh, Uw, precision=P))
    return outs


# --------------------------------- params init ---------------------------------
def init_params(key, in_channels, out_channels):
    def nxt():
        nonlocal key
        key, sub = jax.random.split(key)
        return sub

    def conv_bn(cin, cout, k):
        fan_in = cin * k * k
        return {
            "w": jax.random.normal(nxt(), (cout, cin, k, k), jnp.float32) / np.sqrt(fan_in),
            "b": 0.05 * jax.random.normal(nxt(), (cout,), jnp.float32),
            "gamma": 1.0 + 0.1 * jax.random.normal(nxt(), (cout,), jnp.float32),
            "beta": 0.1 * jax.random.normal(nxt(), (cout,), jnp.float32),
            "mean": 0.1 * jax.random.normal(nxt(), (cout,), jnp.float32),
            "var": jax.random.uniform(nxt(), (cout,), jnp.float32, 0.5, 1.5),
        }

    gc = []
    for stages in BRANCH_CONVS:
        blist, cin = [], in_channels
        for (k, pad, dil) in stages:
            blist.append(conv_bn(cin, out_channels, k))
            cin = out_channels
        gc.append(blist)

    cgc = 4 * out_channels
    heads = []
    for ch in HEAD_CHANNELS:
        fan_in = cgc * 9
        heads.append({
            "w": jax.random.normal(nxt(), (ch, cgc, 3, 3), jnp.float32) / np.sqrt(fan_in),
            "b": 0.05 * jax.random.normal(nxt(), (ch,), jnp.float32),
        })
    return {"gc": gc, "head": heads}


# ------------------------------------ main --------------------------------------
if __name__ == "__main__":
    root = jax.random.PRNGKey(0)
    kx, kp = jax.random.split(root)

    B, Cin, Cout, H, W = 2, 16, 32, 16, 16          # 4*Cout = 128 = Cgc
    x = jax.random.normal(kx, (B, Cin, H, W), jnp.float32)
    params = init_params(kp, Cin, Cout)

    fwd = jax.jit(gcm_rfb_forward)
    outs = jax.block_until_ready(fwd(x, params))

    expected = [(B, ch, s * H, s * W) for ch, s in zip(HEAD_CHANNELS, HEAD_SCALES)]
    for o, shp in zip(outs, expected):
        assert o.shape == shp, (o.shape, shp)
        assert o.dtype == jnp.float32

    refs = jax.block_until_ready(jax.jit(reference_forward)(x, params))
    for i, (o, r) in enumerate(zip(outs, refs)):
        err = float(jnp.max(jnp.abs(o - r)))
        scale = float(jnp.max(jnp.abs(r)))
        # kernel path uses bf16 matmul operands / bf16 intermediates (f32 accumulation)
        # vs a f32-HIGHEST reference; tolerance sized for that.
        assert err <= 3e-2 * scale + 1e-3, f"head {i}: max abs err {err} (ref max {scale})"

    print("KERNEL_OK")
</pallas_src>

<mosaic_0001>
module attributes {stable_mosaic.version = 11 : i64} {
  func.func @_heads_kernel(%arg0: i32, %arg1: memref<512x1152xbf16, #tpu.memory_space<vmem>>, %arg2: memref<1152x512xbf16, #tpu.memory_space<vmem>>, %arg3: memref<1x512xf32, #tpu.memory_space<vmem>>, %arg4: memref<512x512xbf16, #tpu.memory_space<vmem>>) attributes {dimension_semantics = [#tpu.dimension_semantics<parallel>], iteration_bounds = array<i64: 1>, scalar_prefetch = 0 : i64, scratch_operands = 0 : i64, tpu.core_type = #tpu.core_type<tc>, window_params = [{transform_indices = @transform_0, window_bounds = array<i64: 512, 1152>}, {pipeline_mode = #tpu.pipeline_mode<synchronous>, transform_indices = @transform_1, window_bounds = array<i64: 1152, 512>}, {pipeline_mode = #tpu.pipeline_mode<synchronous>, transform_indices = @transform_2, window_bounds = array<i64: 1, 512>}, {transform_indices = @transform_3, window_bounds = array<i64: 512, 512>}]} {
    %c0 = arith.constant 0 : index
    %c0_0 = arith.constant 0 : index
    %0 = vector.load %arg1[%c0, %c0_0] : memref<512x1152xbf16, #tpu.memory_space<vmem>>, vector<512x1152xbf16>
    %c0_1 = arith.constant 0 : index
    %c0_2 = arith.constant 0 : index
    %1 = vector.load %arg2[%c0_1, %c0_2] : memref<1152x512xbf16, #tpu.memory_space<vmem>>, vector<1152x512xbf16>
    %cst = arith.constant dense<0.000000e+00> : vector<512x512xf32>
    %2 = tpu.matmul %0, %1, %cst {dimension_numbers = #tpu.dot_dimension_numbers<[1], [0], [0], [1], [0, 0, 1, 1], [], []>} : vector<512x1152xbf16>, vector<1152x512xbf16>, vector<512x512xf32> -> vector<512x512xf32>
    %c0_3 = arith.constant 0 : index
    %c0_4 = arith.constant 0 : index
    %3 = vector.load %arg3[%c0_3, %c0_4] : memref<1x512xf32, #tpu.memory_space<vmem>>, vector<1x512xf32>
    %4 = vector.broadcast %3 : vector<1x512xf32> to vector<512x512xf32>
    %5 = arith.addf %2, %4 : vector<512x512xf32>
    %cst_5 = arith.constant 0.000000e+00 : f32
    %6 = vector.broadcast %cst_5 : f32 to vector<512x512xf32>
    %7 = arith.maximumf %5, %6 : vector<512x512xf32>
    %8 = arith.truncf %7 : vector<512x512xf32> to vector<512x512xbf16>
    %c0_6 = arith.constant 0 : index
    %c0_7 = arith.constant 0 : index
    %9 = vector.load %arg4[%c0_6, %c0_7] : memref<512x512xbf16, #tpu.memory_space<vmem>>, vector<512x512xbf16>
    tpu.vector_store %arg4[%c0_6, %c0_7], %8 {strides = array<i32>} : memref<512x512xbf16, #tpu.memory_space<vmem>>, vector<512x512xbf16>,
    return
  }
  func.func @transform_0(%arg0: i32) -> (i32, i32) {
    %c0_i32 = arith.constant 0 : i32
    %c0_i32_0 = arith.constant 0 : i32
    return %arg0, %c0_i32 : i32, i32
  }
  func.func @transform_1(%arg0: i32) -> (i32, i32) {
    %c0_i32 = arith.constant 0 : i32
    %c0_i32_0 = arith.constant 0 : i32
    %c0_i32_1 = arith.constant 0 : i32
    return %c0_i32, %c0_i32_0 : i32, i32
  }
  func.func @transform_2(%arg0: i32) -> (i32, i32) {
    %c0_i32 = arith.constant 0 : i32
    %c0_i32_0 = arith.constant 0 : i32
    %c0_i32_1 = arith.constant 0 : i32
    return %c0_i32, %c0_i32_0 : i32, i32
  }
  func.func @transform_3(%arg0: i32) -> (i32, i32) {
    %c0_i32 = arith.constant 0 : i32
    %c0_i32_0 = arith.constant 0 : i32
    return %arg0, %c0_i32 : i32, i32
  }
}

</mosaic_0001>

<bundles_post_ra>
// kernel: gcm_rfb_forward.1
= control target key start
LH: loop header
LB: loop body
LE: loop exit
PB: predicated region body
PF: predicated region fallthrough
CT: control target
= control target key end

     0   :  { %s12772_s1 = inlined_call_operand.vmem [shape: bf16[1152,512], index: 1, kind: input, shape index: {}]   ;;  %s12773_s0 = inlined_call_operand.vmem [shape: bf16[512,1152], index: 0, kind: input, shape index: {}]   ;;  %s12774_s2 = inlined_call_operand.vmem [shape: f32[1,512], index: 2, kind: input, shape index: {}]   ;;  %s12775_s3 = inlined_call_operand.vmem [shape: bf16[512,512], index: 3, kind: output, shape index: {}]  }
   0x1   :  { %v9460_v0 = vld [vmem:[%s12772_s1 + $0x4] ss:$16 sps:$4 sm:$0xff]   ;;  %v9462_v1 = vld [vmem:[%s12772_s1 + $0xc] ss:$16 sps:$4 sm:$0xff]   ;;  %v9464_v2 = vld [vmem:[%s12772_s1] ss:$16 sps:$4 sm:$0xff]  }
   0x2   :  { %3557 = vmatprep.subr.bf16.mxu0 %v9460_v0  ;;  %v9465_v3 = vld [vmem:[%s12772_s1 + $0x8] ss:$16 sps:$4 sm:$0xff]   ;;  %5322 = vmatprep.subr.bf16.mxu1 %v9462_v1  ;;  %v9466_v4 = vld [vmem:[%s12772_s1 + $0x24] ss:$16 sps:$4 sm:$0xff]   ;;  %v9468_v5 = vld [vmem:[%s12772_s1 + $0x2c] ss:$16 sps:$4 sm:$0xff]  }
   0x3   :  { %3558 = vmatpush1.bf16.msra.mxu0 %v9464_v2  ;;  %5323 = vmatpush1.bf16.msra.mxu1 %v9465_v3  ;;  %v9470_v6 = vld [vmem:[%s12772_s1 + $0x20] ss:$16 sps:$4 sm:$0xff]   ;;  %v9471_v7 = vld [vmem:[%s12772_s1 + $0x28] ss:$16 sps:$4 sm:$0xff]   ;;  %v9472_v8 = vld [vmem:[%s12772_s1 + $0x44] ss:$16 sps:$4 sm:$0xff]  }
   0x4   :  { %3559 = vmatprep.subr.bf16.mxu0 %v9466_v4  ;;  %5324 = vmatprep.subr.bf16.mxu1 %v9468_v5  ;;  %v9474_v9 = vld [vmem:[%s12772_s1 + $0x4c] ss:$16 sps:$4 sm:$0xff]   ;;  %v9476_v10 = vld [vmem:[%s12772_s1 + $0x40] ss:$16 sps:$4 sm:$0xff]   ;;  %v9477_v11 = vld [vmem:[%s12772_s1 + $0x48] ss:$16 sps:$4 sm:$0xff]  }
   0x5   :  { %v9478_v12 = vld [vmem:[%s12772_s1 + $0x64] ss:$16 sps:$4 sm:$0xff]   ;;  %v9480_v13 = vld [vmem:[%s12772_s1 + $0x6c] ss:$16 sps:$4 sm:$0xff]   ;;  %v9482_v14 = vld [vmem:[%s12772_s1 + $0x60] ss:$16 sps:$4 sm:$0xff]  }
   0x6   :  { %v9483_v15 = vld [vmem:[%s12772_s1 + $0x68] ss:$16 sps:$4 sm:$0xff]   ;;  %v9484_v16 = vld [vmem:[%s12772_s1 + $0x84] ss:$16 sps:$4 sm:$0xff]   ;;  %v9486_v17 = vld [vmem:[%s12772_s1 + $0x8c] ss:$16 sps:$4 sm:$0xff]  }
   0x7   :  { %3560 = vmatpush1.bf16.msra.mxu0 %v9470_v6  ;;  %5325 = vmatpush1.bf16.msra.mxu1 %v9471_v7  ;;  %v9488_v18 = vld [vmem:[%s12772_s1 + $0x80] ss:$16 sps:$4 sm:$0xff]   ;;  %v9489_v19 = vld [vmem:[%s12772_s1 + $0x88] ss:$16 sps:$4 sm:$0xff]   ;;  %v9490_v20 = vld [vmem:[%s12772_s1 + $0xa4] ss:$16 sps:$4 sm:$0xff]  }
   0x8   :  { %3561 = vmatprep.subr.bf16.mxu0 %v9472_v8  ;;  %5326 = vmatprep.subr.bf16.mxu1 %v9474_v9  ;;  %v9492_v21 = vld [vmem:[%s12772_s1 + $0xac] ss:$16 sps:$4 sm:$0xff]   ;;  %v9494_v22 = vld [vmem:[%s12772_s1 + $0xa0] ss:$16 sps:$4 sm:$0xff]   ;;  %v9495_v23 = vld [vmem:[%s12772_s1 + $0xa8] ss:$16 sps:$4 sm:$0xff]  }
   0x9   :  { %v9496_v24 = vld [vmem:[%s12772_s1 + $0xc4] ss:$16 sps:$4 sm:$0xff]   ;;  %v9498_v25 = vld [vmem:[%s12772_s1 + $0xcc] ss:$16 sps:$4 sm:$0xff]   ;;  %v9500_v26 = vld [vmem:[%s12772_s1 + $0xc0] ss:$16 sps:$4 sm:$0xff]  }
   0xa   :  { %v9501_v27 = vld [vmem:[%s12772_s1 + $0xc8] ss:$16 sps:$4 sm:$0xff]   ;;  %v9502_v28 = vld [vmem:[%s12772_s1 + $0xe4] ss:$16 sps:$4 sm:$0xff]   ;;  %v9504_v29 = vld [vmem:[%s12772_s1 + $0xec] ss:$16 sps:$4 sm:$0xff]  }
   0xb   :  { %3562 = vmatpush1.bf16.msra.mxu0 %v9476_v10  ;;  %5327 = vmatpush1.bf16.msra.mxu1 %v9477_v11  ;;  %v9506_v30 = vld [vmem:[%s12772_s1 + $0xe0] ss:$16 sps:$4 sm:$0xff]   ;;  %v9507_v31 = vld [vmem:[%s12772_s1 + $0xe8] ss:$16 sps:$4 sm:$0xff]   ;;  %v9508_v32 = vld [vmem:[%s12772_s1 + $0x104] ss:$16 sps:$4 sm:$0xff]  }
   0xc   :  { %3563 = vmatprep.subr.bf16.mxu0 %v9478_v12  ;;  %5328 = vmatprep.subr.bf16.mxu1 %v9480_v13  ;;  %v9510_v33 = vld [vmem:[%s12772_s1 + $0x10c] ss:$16 sps:$4 sm:$0xff]   ;;  %v9512_v34 = vld [vmem:[%s12772_s1 + $0x100] ss:$16 sps:$4 sm:$0xff]   ;;  %v9513_v35 = vld [vmem:[%s12772_s1 + $0x108] ss:$16 sps:$4 sm:$0xff]  }
   0xd   :  { %v9514_v36 = vld [vmem:[%s12772_s1 + $0x124] ss:$16 sps:$4 sm:$0xff]   ;;  %v9516_v37 = vld [vmem:[%s12772_s1 + $0x12c] ss:$16 sps:$4 sm:$0xff]   ;;  %v9518_v38 = vld [vmem:[%s12772_s1 + $0x120] ss:$16 sps:$4 sm:$0xff]  }
   0xe   :  { %v9519_v39 = vld [vmem:[%s12772_s1 + $0x128] ss:$16 sps:$4 sm:$0xff]   ;;  %v9520_v40 = vld [vmem:[%s12772_s1 + $0x144] ss:$16 sps:$4 sm:$0xff]   ;;  %v9522_v41 = vld [vmem:[%s12772_s1 + $0x14c] ss:$16 sps:$4 sm:$0xff]  }
   0xf   :  { %3564 = vmatpush1.bf16.msra.mxu0 %v9482_v14  ;;  %5329 = vmatpush1.bf16.msra.mxu1 %v9483_v15  ;;  %v9524_v42 = vld [vmem:[%s12772_s1 + $0x140] ss:$16 sps:$4 sm:$0xff]   ;;  %v9525_v43 = vld [vmem:[%s12772_s1 + $0x148] ss:$16 sps:$4 sm:$0xff]   ;;  %v9526_v44 = vld [vmem:[%s12772_s1 + $0x164] ss:$16 sps:$4 sm:$0xff]  }
  0x10   :  { %3565 = vmatprep.subr.bf16.mxu0 %v9484_v16  ;;  %5330 = vmatprep.subr.bf16.mxu1 %v9486_v17  ;;  %v9528_v45 = vld [vmem:[%s12772_s1 + $0x16c] ss:$16 sps:$4 sm:$0xff]   ;;  %v9530_v46 = vld [vmem:[%s12772_s1 + $0x160] ss:$16 sps:$4 sm:$0xff]   ;;  %v9531_v47 = vld [vmem:[%s12772_s1 + $0x168] ss:$16 sps:$4 sm:$0xff]  }
  0x11   :  { %v9558_v48 = vld [vmem:[%s12773_s0 + $0x4] ss:$36 sps:$4 sm:$0xff]   ;;  %v9534_v50 = vld [vmem:[%s12772_s1 + $0x18c] ss:$16 sps:$4 sm:$0xff]   ;;  %v9536_v51 = vld [vmem:[%s12772_s1 + $0x180] ss:$16 sps:$4 sm:$0xff]  }
  0x12   :  { %v9532_v49 = vld [vmem:[%s12772_s1 + $0x184] ss:$16 sps:$4 sm:$0xff]   ;;  %3589 = vmatprep.mubr.bf16.mxu0 %v9558_v48  ;;  %5354 = vmatprep.mubr.bf16.mxu1 %v9558_v48  ;;  %v9537_v52 = vld [vmem:[%s12772_s1 + $0x188] ss:$16 sps:$4 sm:$0xff]   ;;  %v9540_v54 = vld [vmem:[%s12772_s1 + $0x1ac] ss:$16 sps:$4 sm:$0xff]  }
  0x13   :  { %3566 = vmatpush1.bf16.msra.mxu0 %v9488_v18  ;;  %5331 = vmatpush1.bf16.msra.mxu1 %v9489_v19  ;;  %v9538_v53 = vld [vmem:[%s12772_s1 + $0x1a4] ss:$16 sps:$4 sm:$0xff]   ;;  %v9542_v55 = vld [vmem:[%s12772_s1 + $0x1a0] ss:$16 sps:$4 sm:$0xff]   ;;  %v9543_v56 = vld [vmem:[%s12772_s1 + $0x1a8] ss:$16 sps:$4 sm:$0xff]  }
  0x14   :  { %3567 = vmatprep.subr.bf16.mxu0 %v9490_v20  ;;  %5332 = vmatprep.subr.bf16.mxu1 %v9492_v21  ;;  %v9544_v57 = vld [vmem:[%s12772_s1 + $0x1c4] ss:$16 sps:$4 sm:$0xff]   ;;  %v9546_v58 = vld [vmem:[%s12772_s1 + $0x1cc] ss:$16 sps:$4 sm:$0xff]   ;;  %v9548_v59 = vld [vmem:[%s12772_s1 + $0x1c0] ss:$16 sps:$4 sm:$0xff]  }
  0x15   :  { %v9549_v60 = vld [vmem:[%s12772_s1 + $0x1c8] ss:$16 sps:$4 sm:$0xff]   ;;  %v9550_v61 = vld [vmem:[%s12772_s1 + $0x1e4] ss:$16 sps:$4 sm:$0xff]   ;;  %v9552_v62 = vld [vmem:[%s12772_s1 + $0x1ec] ss:$16 sps:$4 sm:$0xff]  }
  0x16   :  { %v9554_v63 = vld [vmem:[%s12772_s1 + $0x1e0] ss:$16 sps:$4 sm:$0xff]   ;;  %v9555_v0 = vld [vmem:[%s12772_s1 + $0x1e8] ss:$16 sps:$4 sm:$0xff]   ;;  %v9561_v1 = vld [vmem:[%s12772_s1 + $0x204] ss:$16 sps:$4 sm:$0xff]  }
  0x17   :  { %3568 = vmatpush1.bf16.msra.mxu0 %v9494_v22  ;;  %5333 = vmatpush1.bf16.msra.mxu1 %v9495_v23  ;;  %v9564_v2 = vld [vmem:[%s12772_s1 + $0x20c] ss:$16 sps:$4 sm:$0xff]   ;;  %v9556_v3 = vld [vmem:[%s12773_s0] ss:$36 sps:$4 sm:$0xff]   ;;  %v9562_v5 = vld [vmem:[%s12772_s1 + $0x208] ss:$16 sps:$4 sm:$0xff]  }
  0x18   :  { %3569 = vmatprep.subr.bf16.mxu0 %v9496_v24  ;;  %5334 = vmatprep.subr.bf16.mxu1 %v9498_v25  ;;  %v9559_v4 = vld [vmem:[%s12772_s1 + $0x200] ss:$16 sps:$4 sm:$0xff]   ;;  %v9573_v7 = vld [vmem:[%s12772_s1 + $0x224] ss:$16 sps:$4 sm:$0xff]   ;;  %v9576_v8 = vld [vmem:[%s12772_s1 + $0x22c] ss:$16 sps:$4 sm:$0xff]  }
  0x19   :  { %v9565_v6 = vld [vmem:[%s12773_s0 + $0x4c] ss:$36 sps:$4 sm:$0xff]   ;;  %v9574_v10 = vld [vmem:[%s12772_s1 + $0x228] ss:$16 sps:$4 sm:$0xff]   ;;  %v9585_v11 = vld [vmem:[%s12772_s1 + $0x244] ss:$16 sps:$4 sm:$0xff]  }
  0x1a   :  { %v9571_v9 = vld [vmem:[%s12772_s1 + $0x220] ss:$16 sps:$4 sm:$0xff]   ;;  %v9588_v12 = vld [vmem:[%s12772_s1 + $0x24c] ss:$16 sps:$4 sm:$0xff]   ;;  %v9568_v14 = vld [vmem:[%s12773_s0 + $0x94] ss:$36 sps:$4 sm:$0xff]  }
  0x1b   :  { %3570 = vmatpush1.bf16.msra.mxu0 %v9500_v26  ;;  %5335 = vmatpush1.bf16.msra.mxu1 %v9501_v27  ;;  %v9567_v13 = vld [vmem:[%s12773_s0 + $0x48] ss:$36 sps:$4 sm:$0xff]   ;;  %v9583_v15 = vld [vmem:[%s12772_s1 + $0x240] ss:$16 sps:$4 sm:$0xff]   ;;  %v9597_v17 = vld [vmem:[%s12772_s1 + $0x264] ss:$16 sps:$4 sm:$0xff]  }
  0x1c   :  { %3571 = vmatprep.subr.bf16.mxu0 %v9502_v28  ;;  %5336 = vmatprep.subr.bf16.mxu1 %v9504_v29  ;;  %v9586_v16 = vld [vmem:[%s12772_s1 + $0x248] ss:$16 sps:$4 sm:$0xff]   ;;  %v9600_v18 = vld [vmem:[%s12772_s1 + $0x26c] ss:$16 sps:$4 sm:$0xff]   ;;  %v9595_v19 = vld [vmem:[%s12772_s1 + $0x260] ss:$16 sps:$4 sm:$0xff]  }
  0x1d   :  { %v9598_v20 = vld [vmem:[%s12772_s1 + $0x268] ss:$16 sps:$4 sm:$0xff]   ;;  %v9609_v21 = vld [vmem:[%s12772_s1 + $0x284] ss:$16 sps:$4 sm:$0xff]   ;;  %v9612_v22 = vld [vmem:[%s12772_s1 + $0x28c] ss:$16 sps:$4 sm:$0xff]  }
  0x1e   :  { %v9570_v23 = vld [vmem:[%s12773_s0 + $0x90] ss:$36 sps:$4 sm:$0xff]   ;;  %v9577_v24 = vld [vmem:[%s12773_s0 + $0xdc] ss:$36 sps:$4 sm:$0xff]   ;;  %v9610_v26 = vld [vmem:[%s12772_s1 + $0x288] ss:$16 sps:$4 sm:$0xff]  }
  0x1f   :  { %3572 = vmatpush1.bf16.msra.mxu0 %v9506_v30  ;;  %5337 = vmatpush1.bf16.msra.mxu1 %v9507_v31  ;;  %v9607_v25 = vld [vmem:[%s12772_s1 + $0x280] ss:$16 sps:$4 sm:$0xff]   ;;  %v9621_v27 = vld [vmem:[%s12772_s1 + $0x2a4] ss:$16 sps:$4 sm:$0xff]   ;;  %v9624_v28 = vld [vmem:[%s12772_s1 + $0x2ac] ss:$16 sps:$4 sm:$0xff]  }
  0x20   :  { %3573 = vmatprep.subr.bf16.mxu0 %v9508_v32  ;;  %5338 = vmatprep.subr.bf16.mxu1 %v9510_v33  ;;  %v9619_v29 = vld [vmem:[%s12772_s1 + $0x2a0] ss:$16 sps:$4 sm:$0xff]   ;;  %v9622_v30 = vld [vmem:[%s12772_s1 + $0x2a8] ss:$16 sps:$4 sm:$0xff]   ;;  %v9633_v31 = vld [vmem:[%s12772_s1 + $0x2c4] ss:$16 sps:$4 sm:$0xff]  }
  0x21   :  { %v9636_v32 = vld [vmem:[%s12772_s1 + $0x2cc] ss:$16 sps:$4 sm:$0xff]  }
  0x22   :  { %v9579_v33 = vld [vmem:[%s12773_s0 + $0xd8] ss:$36 sps:$4 sm:$0xff]  }
  0x23   :  { %3574 = vmatpush1.bf16.msra.mxu0 %v9512_v34  ;;  %5339 = vmatpush1.bf16.msra.mxu1 %v9513_v35  ;;  %v9580_v34 = vld [vmem:[%s12773_s0 + $0x124] ss:$36 sps:$4 sm:$0xff]   ;;  %v9631_v35 = vld [vmem:[%s12772_s1 + $0x2c0] ss:$16 sps:$4 sm:$0xff]   ;;  %v9672_v48 = vld [vmem:[%s12772_s1 + $0x32c] ss:$16 sps:$4 sm:$0xff]  }
  0x24   :  { %3575 = vmatprep.subr.bf16.mxu0 %v9514_v36  ;;  %5340 = vmatprep.subr.bf16.mxu1 %v9516_v37  ;;  %v9634_v36 = vld [vmem:[%s12772_s1 + $0x2c8] ss:$16 sps:$4 sm:$0xff]   ;;  %v9645_v37 = vld [vmem:[%s12772_s1 + $0x2e4] ss:$16 sps:$4 sm:$0xff]  }
  0x27   :  { %3576 = vmatpush1.bf16.msra.mxu0 %v9518_v38  ;;  %5341 = vmatpush1.bf16.msra.mxu1 %v9519_v39  ;;  %v9648_v38 = vld [vmem:[%s12772_s1 + $0x2ec] ss:$16 sps:$4 sm:$0xff]   ;;  %v9643_v39 = vld [vmem:[%s12772_s1 + $0x2e0] ss:$16 sps:$4 sm:$0xff]  }
  0x28   :  { %3577 = vmatprep.subr.bf16.mxu0 %v9520_v40  ;;  %5342 = vmatprep.subr.bf16.mxu1 %v9522_v41  ;;  %v9582_v40 = vld [vmem:[%s12773_s0 + $0x120] ss:$36 sps:$4 sm:$0xff]   ;;  %v9646_v41 = vld [vmem:[%s12772_s1 + $0x2e8] ss:$16 sps:$4 sm:$0xff]  }
  0x2b   :  { %3578 = vmatpush1.bf16.msra.mxu0 %v9524_v42  ;;  %5343 = vmatpush1.bf16.msra.mxu1 %v9525_v43  ;;  %v9589_v42 = vld [vmem:[%s12773_s0 + $0x16c] ss:$36 sps:$4 sm:$0xff]   ;;  %v9657_v43 = vld [vmem:[%s12772_s1 + $0x304] ss:$16 sps:$4 sm:$0xff]  }
  0x2c   :  { %3579 = vmatprep.subr.bf16.mxu0 %v9526_v44  ;;  %5344 = vmatprep.subr.bf16.mxu1 %v9528_v45  ;;  %v9660_v44 = vld [vmem:[%s12772_s1 + $0x30c] ss:$16 sps:$4 sm:$0xff]   ;;  %v9655_v45 = vld [vmem:[%s12772_s1 + $0x300] ss:$16 sps:$4 sm:$0xff]  }
  0x2f   :  { %3580 = vmatpush1.bf16.msra.mxu0 %v9530_v46  ;;  %5345 = vmatpush1.bf16.msra.mxu1 %v9531_v47  ;;  %v9658_v46 = vld [vmem:[%s12772_s1 + $0x308] ss:$16 sps:$4 sm:$0xff]   ;;  %v9669_v47 = vld [vmem:[%s12772_s1 + $0x324] ss:$16 sps:$4 sm:$0xff]  }
  0x30   :  { %3581 = vmatprep.subr.bf16.mxu0 %v9532_v49  ;;  %5346 = vmatprep.subr.bf16.mxu1 %v9534_v50  ;;  %v9667_v49 = vld [vmem:[%s12772_s1 + $0x320] ss:$16 sps:$4 sm:$0xff]   ;;  %v9670_v50 = vld [vmem:[%s12772_s1 + $0x328] ss:$16 sps:$4 sm:$0xff]  }
  0x33   :  { %3582 = vmatpush1.bf16.msra.mxu0 %v9536_v51  ;;  %5347 = vmatpush1.bf16.msra.mxu1 %v9537_v52  ;;  %v9681_v51 = vld [vmem:[%s12772_s1 + $0x344] ss:$16 sps:$4 sm:$0xff]   ;;  %v9591_v52 = vld [vmem:[%s12773_s0 + $0x168] ss:$36 sps:$4 sm:$0xff]  }
  0x34   :  { %3583 = vmatprep.subr.bf16.mxu0 %v9538_v53  ;;  %5348 = vmatprep.subr.bf16.mxu1 %v9540_v54  ;;  %v9684_v53 = vld [vmem:[%s12772_s1 + $0x34c] ss:$16 sps:$4 sm:$0xff]   ;;  %v9592_v54 = vld [vmem:[%s12773_s0 + $0x1b4] ss:$36 sps:$4 sm:$0xff]  }
  0x37   :  { %3584 = vmatpush1.bf16.msra.mxu0 %v9542_v55  ;;  %5349 = vmatpush1.bf16.msra.mxu1 %v9543_v56  ;;  %v9679_v55 = vld [vmem:[%s12772_s1 + $0x340] ss:$16 sps:$4 sm:$0xff]   ;;  %v9682_v56 = vld [vmem:[%s12772_s1 + $0x348] ss:$16 sps:$4 sm:$0xff]  }
  0x38   :  { %3585 = vmatprep.subr.bf16.mxu0 %v9544_v57  ;;  %5350 = vmatprep.subr.bf16.mxu1 %v9546_v58  ;;  %v9594_v57 = vld [vmem:[%s12773_s0 + $0x1b0] ss:$36 sps:$4 sm:$0xff]   ;;  %v9601_v58 = vld [vmem:[%s12773_s0 + $0x1fc] ss:$36 sps:$4 sm:$0xff]  }
  0x3b   :  { %3586 = vmatpush1.bf16.msra.mxu0 %v9548_v59  ;;  %5351 = vmatpush1.bf16.msra.mxu1 %v9549_v60  ;;  %v9691_v59 = vld [vmem:[%s12772_s1 + $0x360] ss:$16 sps:$4 sm:$0xff]   ;;  %v9693_v60 = vld [vmem:[%s12772_s1 + $0x364] ss:$16 sps:$4 sm:$0xff]  }
  0x3c   :  { %3587 = vmatprep.subr.bf16.mxu0 %v9550_v61  ;;  %5352 = vmatprep.subr.bf16.mxu1 %v9552_v62  ;;  %v9694_v61 = vld [vmem:[%s12772_s1 + $0x368] ss:$16 sps:$4 sm:$0xff]   ;;  %v9696_v62 = vld [vmem:[%s12772_s1 + $0x36c] ss:$16 sps:$4 sm:$0xff]  }
  0x3f   :  { %3588 = vmatpush1.bf16.msra.mxu0 %v9554_v63  ;;  %5353 = vmatpush1.bf16.msra.mxu1 %v9555_v0  ;;  %v9603_v63 = vld [vmem:[%s12773_s0 + $0x1f8] ss:$36 sps:$4 sm:$0xff]   ;;  %v9604_v0 = vld [vmem:[%s12773_s0 + $0x244] ss:$36 sps:$4 sm:$0xff]  }
  0x40   :  { %3910 = vmatprep.subr.bf16.mxu0 %v9561_v1  ;;  %5675 = vmatprep.subr.bf16.mxu1 %v9564_v2  ;;  %v9606_v1 = vld [vmem:[%s12773_s0 + $0x240] ss:$36 sps:$4 sm:$0xff]   ;;  %v9613_v2 = vld [vmem:[%s12773_s0 + $0x28c] ss:$36 sps:$4 sm:$0xff]  }
  0x42   :  { %3590 = vmatmul.mubr.bf16.vlgmr.msra.gmra.mrb[0].mxu0 %v9556_v3  ;;  %5355 = vmatmul.mubr.bf16.vlgmr.msra.gmra.mrb[0].mxu1 %v9556_v3  ;;  %v9703_v3 = vld [vmem:[%s12772_s1 + $0x380] ss:$16 sps:$4 sm:$0xff]  }
  0x43   :  { %3911 = vmatpush1.bf16.msra.mxu0 %v9559_v4  ;;  %5676 = vmatpush1.bf16.msra.mxu1 %v9562_v5  ;;  %v9705_v4 = vld [vmem:[%s12772_s1 + $0x384] ss:$16 sps:$4 sm:$0xff]   ;;  %v9706_v5 = vld [vmem:[%s12772_s1 + $0x388] ss:$16 sps:$4 sm:$0xff]  }
  0x44   :  { %3599 = vmatprep.mubr.bf16.mxu0 %v9565_v6  ;;  %5364 = vmatprep.mubr.bf16.mxu1 %v9565_v6  ;;  %v9708_v6 = vld [vmem:[%s12772_s1 + $0x38c] ss:$16 sps:$4 sm:$0xff]  }
  0x45   :  { %3912 = vmatprep.subr.bf16.mxu0 %v9573_v7  ;;  %5677 = vmatprep.subr.bf16.mxu1 %v9576_v8  ;;  %v9615_v7 = vld [vmem:[%s12773_s0 + $0x288] ss:$36 sps:$4 sm:$0xff]   ;;  %v9616_v8 = vld [vmem:[%s12773_s0 + $0x2d4] ss:$36 sps:$4 sm:$0xff]  }
  0x47   :  { %3913 = vmatpush1.bf16.msra.mxu0 %v9571_v9  ;;  %5678 = vmatpush1.bf16.msra.mxu1 %v9574_v10  ;;  %v9618_v9 = vld [vmem:[%s12773_s0 + $0x2d0] ss:$36 sps:$4 sm:$0xff]   ;;  %v9625_v10 = vld [vmem:[%s12773_s0 + $0x31c] ss:$36 sps:$4 sm:$0xff]  }
  0x48   :  { %3914 = vmatprep.subr.bf16.mxu0 %v9585_v11  ;;  %5679 = vmatprep.subr.bf16.mxu1 %v9588_v12  ;;  %v9715_v11 = vld [vmem:[%s12772_s1 + $0x3a0] ss:$16 sps:$4 sm:$0xff]   ;;  %v9717_v12 = vld [vmem:[%s12772_s1 + $0x3a4] ss:$16 sps:$4 sm:$0xff]  }
  0x4a   :  { %3600 = vmatmul.mubr.bf16.gmra.mrb[4].mxu0 %v9567_v13  ;;  %5365 = vmatmul.mubr.bf16.gmra.mrb[4].mxu1 %v9567_v13  ;;  %v9718_v13 = vld [vmem:[%s12772_s1 + $0x3a8] ss:$16 sps:$4 sm:$0xff]  }
  0x4b   :  { %3609 = vmatprep.mubr.bf16.mxu0 %v9568_v14  ;;  %5374 = vmatprep.mubr.bf16.mxu1 %v9568_v14  ;;  %v9720_v14 = vld [vmem:[%s12772_s1 + $0x3ac] ss:$16 sps:$4 sm:$0xff]  }
  0x4c   :  { %3915 = vmatpush1.bf16.msra.mxu0 %v9583_v15  ;;  %5680 = vmatpush1.bf16.msra.mxu1 %v9586_v16  ;;  %v9627_v15 = vld [vmem:[%s12773_s0 + $0x318] ss:$36 sps:$4 sm:$0xff]   ;;  %v9628_v16 = vld [vmem:[%s12773_s0 + $0x364] ss:$36 sps:$4 sm:$0xff]  }
  0x4d   :  { %3916 = vmatprep.subr.bf16.mxu0 %v9597_v17  ;;  %5681 = vmatprep.subr.bf16.mxu1 %v9600_v18  ;;  %v9630_v17 = vld [vmem:[%s12773_s0 + $0x360] ss:$36 sps:$4 sm:$0xff]   ;;  %v9637_v18 = vld [vmem:[%s12773_s0 + $0x3ac] ss:$36 sps:$4 sm:$0xff]  }
  0x50   :  { %3917 = vmatpush1.bf16.msra.mxu0 %v9595_v19  ;;  %5682 = vmatpush1.bf16.msra.mxu1 %v9598_v20  ;;  %v9727_v19 = vld [vmem:[%s12772_s1 + $0x3c0] ss:$16 sps:$4 sm:$0xff]   ;;  %v9729_v20 = vld [vmem:[%s12772_s1 + $0x3c4] ss:$16 sps:$4 sm:$0xff]  }
  0x51   :  { %3918 = vmatprep.subr.bf16.mxu0 %v9609_v21  ;;  %5683 = vmatprep.subr.bf16.mxu1 %v9612_v22  ;;  %v9730_v21 = vld [vmem:[%s12772_s1 + $0x3c8] ss:$16 sps:$4 sm:$0xff]   ;;  %v9732_v22 = vld [vmem:[%s12772_s1 + $0x3cc] ss:$16 sps:$4 sm:$0xff]  }
  0x52   :  { %3610 = vmatmul.mubr.bf16.gmra.mrb[8].mxu0 %v9570_v23  ;;  %5375 = vmatmul.mubr.bf16.gmra.mrb[8].mxu1 %v9570_v23  ;;  %v9639_v23 = vld [vmem:[%s12773_s0 + $0x3a8] ss:$36 sps:$4 sm:$0xff]  }
  0x53   :  { %3619 = vmatprep.mubr.bf16.mxu0 %v9577_v24  ;;  %5384 = vmatprep.mubr.bf16.mxu1 %v9577_v24  ;;  %v9640_v24 = vld [vmem:[%s12773_s0 + $0x3f4] ss:$36 sps:$4 sm:$0xff]  }
  0x54   :  { %3919 = vmatpush1.bf16.msra.mxu0 %v9607_v25  ;;  %5684 = vmatpush1.bf16.msra.mxu1 %v9610_v26  ;;  %v9642_v25 = vld [vmem:[%s12773_s0 + $0x3f0] ss:$36 sps:$4 sm:$0xff]   ;;  %v9649_v26 = vld [vmem:[%s12773_s0 + $0x43c] ss:$36 sps:$4 sm:$0xff]  }
  0x55   :  { %3920 = vmatprep.subr.bf16.mxu0 %v9621_v27  ;;  %5685 = vmatprep.subr.bf16.mxu1 %v9624_v28  ;;  %v9739_v27 = vld [vmem:[%s12772_s1 + $0x3e0] ss:$16 sps:$4 sm:$0xff]   ;;  %v9741_v28 = vld [vmem:[%s12772_s1 + $0x3e4] ss:$16 sps:$4 sm:$0xff]  }
  0x58   :  { %3921 = vmatpush1.bf16.msra.mxu0 %v9619_v29  ;;  %5686 = vmatpush1.bf16.msra.mxu1 %v9622_v30  ;;  %v9742_v29 = vld [vmem:[%s12772_s1 + $0x3e8] ss:$16 sps:$4 sm:$0xff]   ;;  %v9744_v30 = vld [vmem:[%s12772_s1 + $0x3ec] ss:$16 sps:$4 sm:$0xff]  }
  0x59   :  { %3922 = vmatprep.subr.bf16.mxu0 %v9633_v31  ;;  %5687 = vmatprep.subr.bf16.mxu1 %v9636_v32  ;;  %v9651_v31 = vld [vmem:[%s12773_s0 + $0x438] ss:$36 sps:$4 sm:$0xff]   ;;  %v9652_v32 = vld [vmem:[%s12773_s0 + $0x484] ss:$36 sps:$4 sm:$0xff]  }
  0x5a   :  { %3620 = vmatmul.mubr.bf16.gmra.mrb[12].mxu0 %v9579_v33  ;;  %5385 = vmatmul.mubr.bf16.gmra.mrb[12].mxu1 %v9579_v33  ;;  %v9654_v33 = vld [vmem:[%s12773_s0 + $0x480] ss:$36 sps:$4 sm:$0xff]  }
  0x5b   :  { %3629 = vmatprep.mubr.bf16.mxu0 %v9580_v34  ;;  %5394 = vmatprep.mubr.bf16.mxu1 %v9580_v34  ;;  %v9661_v34 = vld [vmem:[%s12773_s0 + $0x4cc] ss:$36 sps:$4 sm:$0xff]  }
  0x5c   :  { %3923 = vmatpush1.bf16.msra.mxu0 %v9631_v35  ;;  %5688 = vmatpush1.bf16.msra.mxu1 %v9634_v36  ;;  %v9753_v35 = vld [vmem:[%s12772_s1 + $0x404] ss:$16 sps:$4 sm:$0xff]   ;;  %v9756_v36 = vld [vmem:[%s12772_s1 + $0x40c] ss:$16 sps:$4 sm:$0xff]  }
  0x5d   :  { %3924 = vmatprep.subr.bf16.mxu0 %v9645_v37  ;;  %5689 = vmatprep.subr.bf16.mxu1 %v9648_v38  ;;  %v9663_v37 = vld [vmem:[%s12773_s0 + $0x4c8] ss:$36 sps:$4 sm:$0xff]   ;;  %v9664_v38 = vld [vmem:[%s12773_s0 + $0x514] ss:$36 sps:$4 sm:$0xff]  }
  0x60   :  { %3925 = vmatpush1.bf16.msra.mxu0 %v9643_v39  ;;  %5690 = vmatpush1.bf16.msra.mxu1 %v9646_v41  ;;  %v9666_v39 = vld [vmem:[%s12773_s0 + $0x510] ss:$36 sps:$4 sm:$0xff]   ;;  %v9675_v41 = vld [vmem:[%s12773_s0 + $0x558] ss:$36 sps:$4 sm:$0xff]  }
  0x61   :  { %3926 = vmatprep.subr.bf16.mxu0 %v9657_v43  ;;  %5691 = vmatprep.subr.bf16.mxu1 %v9660_v44  ;;  %v9678_v43 = vld [vmem:[%s12773_s0 + $0x5a0] ss:$36 sps:$4 sm:$0xff]   ;;  %v9685_v44 = vld [vmem:[%s12773_s0 + $0x5ec] ss:$36 sps:$4 sm:$0xff]  }
  0x62   :  { %3630 = vmatmul.mubr.bf16.gmra.mrb[16].mxu0 %v9582_v40  ;;  %5395 = vmatmul.mubr.bf16.gmra.mrb[16].mxu1 %v9582_v40  ;;  %v9673_v40 = vld [vmem:[%s12773_s0 + $0x55c] ss:$36 sps:$4 sm:$0xff]  }
  0x63   :  { %3639 = vmatprep.mubr.bf16.mxu0 %v9589_v42  ;;  %5404 = vmatprep.mubr.bf16.mxu1 %v9589_v42  ;;  %v9676_v42 = vld [vmem:[%s12773_s0 + $0x5a4] ss:$36 sps:$4 sm:$0xff]  }
  0x64   :  { %3927 = vmatpush1.bf16.msra.mxu0 %v9655_v45  ;;  %5692 = vmatpush1.bf16.msra.mxu1 %v9658_v46  ;;  %v9687_v45 = vld [vmem:[%s12773_s0 + $0x5e8] ss:$36 sps:$4 sm:$0xff]   ;;  %v9688_v46 = vld [vmem:[%s12773_s0 + $0x634] ss:$36 sps:$4 sm:$0xff]  }
  0x65   :  { %3928 = vmatprep.subr.bf16.mxu0 %v9669_v47  ;;  %5693 = vmatprep.subr.bf16.mxu1 %v9672_v48  ;;  %v9690_v47 = vld [vmem:[%s12773_s0 + $0x630] ss:$36 sps:$4 sm:$0xff]   ;;  %v9697_v48 = vld [vmem:[%s12773_s0 + $0x67c] ss:$36 sps:$4 sm:$0xff]  }
  0x68   :  { %3929 = vmatpush1.bf16.msra.mxu0 %v9667_v49  ;;  %5694 = vmatpush1.bf16.msra.mxu1 %v9670_v50  ;;  %v9699_v49 = vld [vmem:[%s12773_s0 + $0x678] ss:$36 sps:$4 sm:$0xff]   ;;  %v9700_v50 = vld [vmem:[%s12773_s0 + $0x6c4] ss:$36 sps:$4 sm:$0xff]  }
  0x69   :  { %3930 = vmatprep.subr.bf16.mxu0 %v9681_v51  ;;  %5695 = vmatprep.subr.bf16.mxu1 %v9684_v53  ;;  %v9702_v51 = vld [vmem:[%s12773_s0 + $0x6c0] ss:$36 sps:$4 sm:$0xff]   ;;  %v9711_v53 = vld [vmem:[%s12773_s0 + $0x708] ss:$36 sps:$4 sm:$0xff]  }
  0x6a   :  { %3640 = vmatmul.mubr.bf16.gmra.mrb[20].mxu0 %v9591_v52  ;;  %5405 = vmatmul.mubr.bf16.gmra.mrb[20].mxu1 %v9591_v52  ;;  %v9709_v52 = vld [vmem:[%s12773_s0 + $0x70c] ss:$36 sps:$4 sm:$0xff]  }
  0x6b   :  { %3649 = vmatprep.mubr.bf16.mxu0 %v9592_v54  ;;  %5414 = vmatprep.mubr.bf16.mxu1 %v9592_v54  ;;  %v9712_v54 = vld [vmem:[%s12773_s0 + $0x754] ss:$36 sps:$4 sm:$0xff]  }
  0x6c   :  { %3931 = vmatpush1.bf16.msra.mxu0 %v9679_v55  ;;  %5696 = vmatpush1.bf16.msra.mxu1 %v9682_v56  ;;  %v9714_v55 = vld [vmem:[%s12773_s0 + $0x750] ss:$36 sps:$4 sm:$0xff]   ;;  %v9721_v56 = vld [vmem:[%s12773_s0 + $0x79c] ss:$36 sps:$4 sm:$0xff]  }
  0x6d   :  { %3932 = vmatprep.subr.bf16.mxu0 %v9693_v60  ;;  %5697 = vmatprep.subr.bf16.mxu1 %v9696_v62  ;;  %v9733_v60 = vld [vmem:[%s12773_s0 + $0x82c] ss:$36 sps:$4 sm:$0xff]   ;;  %v9736_v62 = vld [vmem:[%s12773_s0 + $0x874] ss:$36 sps:$4 sm:$0xff]  }
  0x70   :  { %3933 = vmatpush1.bf16.msra.mxu0 %v9691_v59  ;;  %5698 = vmatpush1.bf16.msra.mxu1 %v9694_v61  ;;  %v9726_v59 = vld [vmem:[%s12773_s0 + $0x7e0] ss:$36 sps:$4 sm:$0xff]   ;;  %v9735_v61 = vld [vmem:[%s12773_s0 + $0x828] ss:$36 sps:$4 sm:$0xff]  }
  0x71   :  { %3934 = vmatprep.subr.bf16.mxu0 %v9705_v4  ;;  %5699 = vmatprep.subr.bf16.mxu1 %v9708_v6  ;;  %v9751_v4 = vld [vmem:[%s12772_s1 + $0x400] ss:$16 sps:$4 sm:$0xff]   ;;  %v9757_v6 = vld [vmem:[%s12773_s0 + $0x54] ss:$36 sps:$4 sm:$0xff]  }
  0x72   :  { %3650 = vmatmul.mubr.bf16.gmra.mrb[24].mxu0 %v9594_v57  ;;  %5415 = vmatmul.mubr.bf16.gmra.mrb[24].mxu1 %v9594_v57  ;;  %v9723_v57 = vld [vmem:[%s12773_s0 + $0x798] ss:$36 sps:$4 sm:$0xff]  }
  0x73   :  { %3659 = vmatprep.mubr.bf16.mxu0 %v9601_v58  ;;  %5424 = vmatprep.mubr.bf16.mxu1 %v9601_v58  ;;  %v9724_v58 = vld [vmem:[%s12773_s0 + $0x7e4] ss:$36 sps:$4 sm:$0xff]  }
  0x74   :  { %3935 = vmatpush1.bf16.msra.mxu0 %v9703_v3  ;;  %5700 = vmatpush1.bf16.msra.mxu1 %v9706_v5  ;;  %v9748_v3 = vld [vmem:[%s12773_s0 + $0x8] ss:$36 sps:$4 sm:$0xff]  }
  0x75   :  { %3936 = vmatprep.subr.bf16.mxu0 %v9717_v12  ;;  %5701 = vmatprep.subr.bf16.mxu1 %v9720_v14  ;;  %v9754_v5 = vld [vmem:[%s12772_s1 + $0x408] ss:$16 sps:$4 sm:$0xff]   ;;  %v9780_v12 = vld [vmem:[%s12772_s1 + $0x44c] ss:$16 sps:$4 sm:$0xff]  }
  0x76   :  { %v9760_v14 = vld [vmem:[%s12773_s0 + $0x9c] ss:$36 sps:$4 sm:$0xff]  }
  0x78   :  { %3937 = vmatpush1.bf16.msra.mxu0 %v9715_v11  ;;  %5702 = vmatpush1.bf16.msra.mxu1 %v9718_v13  ;;  %v9777_v11 = vld [vmem:[%s12772_s1 + $0x444] ss:$16 sps:$4 sm:$0xff]  }
  0x79   :  { %3938 = vmatprep.subr.bf16.mxu0 %v9729_v20  ;;  %5703 = vmatprep.subr.bf16.mxu1 %v9732_v22  ;;  %v9759_v13 = vld [vmem:[%s12773_s0 + $0x50] ss:$36 sps:$4 sm:$0xff]   ;;  %v9790_v20 = vld [vmem:[%s12772_s1 + $0x468] ss:$16 sps:$4 sm:$0xff]   ;;  %v9804_v22 = vld [vmem:[%s12772_s1 + $0x48c] ss:$16 sps:$4 sm:$0xff]  }
  0x7a   :  { %3660 = vmatmul.mubr.bf16.gmra.mrb[28].mxu0 %v9603_v63  ;;  %5425 = vmatmul.mubr.bf16.gmra.mrb[28].mxu1 %v9603_v63  ;;  %v9738_v63 = vld [vmem:[%s12773_s0 + $0x870] ss:$36 sps:$4 sm:$0xff]  }
  0x7b   :  { %3669 = vmatprep.mubr.bf16.mxu0 %v9604_v0  ;;  %5434 = vmatprep.mubr.bf16.mxu1 %v9604_v0  ;;  %v9745_v0 = vld [vmem:[%s12773_s0 + $0x8bc] ss:$36 sps:$4 sm:$0xff]  }
  0x7c   :  { %3939 = vmatpush1.bf16.msra.mxu0 %v9727_v19  ;;  %5704 = vmatpush1.bf16.msra.mxu1 %v9730_v21  ;;  %v9787_v19 = vld [vmem:[%s12772_s1 + $0x460] ss:$16 sps:$4 sm:$0xff]   ;;  %v9801_v21 = vld [vmem:[%s12772_s1 + $0x484] ss:$16 sps:$4 sm:$0xff]  }
  0x7d   :  { %3940 = vmatprep.subr.bf16.mxu0 %v9741_v28  ;;  %5705 = vmatprep.subr.bf16.mxu1 %v9744_v30  ;;  %v9816_v28 = vld [vmem:[%s12772_s1 + $0x4ac] ss:$16 sps:$4 sm:$0xff]   ;;  %v9814_v30 = vld [vmem:[%s12772_s1 + $0x4a8] ss:$16 sps:$4 sm:$0xff]  }
  0x80   :  { %3941 = vmatpush1.bf16.msra.mxu0 %v9739_v27  ;;  %5706 = vmatpush1.bf16.msra.mxu1 %v9742_v29  ;;  %v9813_v27 = vld [vmem:[%s12772_s1 + $0x4a4] ss:$16 sps:$4 sm:$0xff]   ;;  %v9811_v29 = vld [vmem:[%s12772_s1 + $0x4a0] ss:$16 sps:$4 sm:$0xff]  }
  0x81   :  { %4263 = vmatprep.subr.bf16.mxu0 %v9753_v35  ;;  %6028 = vmatprep.subr.bf16.mxu1 %v9756_v36  ;;  %v9823_v35 = vld [vmem:[%s12772_s1 + $0x4c0] ss:$16 sps:$4 sm:$0xff]   ;;  %v9826_v36 = vld [vmem:[%s12772_s1 + $0x4c8] ss:$16 sps:$4 sm:$0xff]  }
  0x82   :  { %3670 = vmatmul.mubr.bf16.gmra.mrb[32].mxu0 %v9606_v1  ;;  %5435 = vmatmul.mubr.bf16.gmra.mrb[32].mxu1 %v9606_v1  ;;  %v9747_v1 = vld [vmem:[%s12773_s0 + $0x8b8] ss:$36 sps:$4 sm:$0xff]  }
  0x83   :  { %3679 = vmatprep.mubr.bf16.mxu0 %v9613_v2  ;;  %5444 = vmatprep.mubr.bf16.mxu1 %v9613_v2  ;;  %v9750_v2 = vld [vmem:[%s12773_s0 + $0xc] ss:$36 sps:$4 sm:$0xff]  }
  0x8a   :  { %3680 = vmatmul.mubr.bf16.gmra.mrb[36].mxu0 %v9615_v7  ;;  %5445 = vmatmul.mubr.bf16.gmra.mrb[36].mxu1 %v9615_v7  ;;  %v9765_v7 = vld [vmem:[%s12772_s1 + $0x424] ss:$16 sps:$4 sm:$0xff]  }
  0x8b   :  { %3689 = vmatprep.mubr.bf16.mxu0 %v9616_v8  ;;  %5454 = vmatprep.mubr.bf16.mxu1 %v9616_v8  ;;  %v9768_v8 = vld [vmem:[%s12772_s1 + $0x42c] ss:$16 sps:$4 sm:$0xff]  }
  0x92   :  { %3690 = vmatmul.mubr.bf16.gmra.mrb[40].mxu0 %v9618_v9  ;;  %5455 = vmatmul.mubr.bf16.gmra.mrb[40].mxu1 %v9618_v9  ;;  %v9763_v9 = vld [vmem:[%s12772_s1 + $0x420] ss:$16 sps:$4 sm:$0xff]  }
  0x93   :  { %3699 = vmatprep.mubr.bf16.mxu0 %v9625_v10  ;;  %5464 = vmatprep.mubr.bf16.mxu1 %v9625_v10  ;;  %v9766_v10 = vld [vmem:[%s12772_s1 + $0x428] ss:$16 sps:$4 sm:$0xff]  }
  0x9a   :  { %3700 = vmatmul.mubr.bf16.gmra.mrb[44].mxu0 %v9627_v15  ;;  %5465 = vmatmul.mubr.bf16.gmra.mrb[44].mxu1 %v9627_v15  ;;  %v9775_v15 = vld [vmem:[%s12772_s1 + $0x440] ss:$16 sps:$4 sm:$0xff]  }
  0x9b   :  { %3709 = vmatprep.mubr.bf16.mxu0 %v9628_v16  ;;  %5474 = vmatprep.mubr.bf16.mxu1 %v9628_v16  ;;  %v9778_v16 = vld [vmem:[%s12772_s1 + $0x448] ss:$16 sps:$4 sm:$0xff]  }
  0xa2   :  { %3710 = vmatmul.mubr.bf16.gmra.mrb[48].mxu0 %v9630_v17  ;;  %5475 = vmatmul.mubr.bf16.gmra.mrb[48].mxu1 %v9630_v17  ;;  %v9789_v17 = vld [vmem:[%s12772_s1 + $0x464] ss:$16 sps:$4 sm:$0xff]  }
  0xa3   :  { %3719 = vmatprep.mubr.bf16.mxu0 %v9637_v18  ;;  %5484 = vmatprep.mubr.bf16.mxu1 %v9637_v18  ;;  %v9792_v18 = vld [vmem:[%s12772_s1 + $0x46c] ss:$16 sps:$4 sm:$0xff]  }
  0xaa   :  { %3720 = vmatmul.mubr.bf16.gmra.mrb[52].mxu0 %v9639_v23  ;;  %5485 = vmatmul.mubr.bf16.gmra.mrb[52].mxu1 %v9639_v23  ;;  %v9762_v23 = vld [vmem:[%s12773_s0 + $0x98] ss:$36 sps:$4 sm:$0xff]  }
  0xab   :  { %3729 = vmatprep.mubr.bf16.mxu0 %v9640_v24  ;;  %5494 = vmatprep.mubr.bf16.mxu1 %v9640_v24  ;;  %v9769_v24 = vld [vmem:[%s12773_s0 + $0xe4] ss:$36 sps:$4 sm:$0xff]  }
  0xb2   :  { %3730 = vmatmul.mubr.bf16.gmra.mrb[56].mxu0 %v9642_v25  ;;  %5495 = vmatmul.mubr.bf16.gmra.mrb[56].mxu1 %v9642_v25  ;;  %v9799_v25 = vld [vmem:[%s12772_s1 + $0x480] ss:$16 sps:$4 sm:$0xff]  }
  0xb3   :  { %3739 = vmatprep.mubr.bf16.mxu0 %v9649_v26  ;;  %5504 = vmatprep.mubr.bf16.mxu1 %v9649_v26  ;;  %v9802_v26 = vld [vmem:[%s12772_s1 + $0x488] ss:$16 sps:$4 sm:$0xff]  }
  0xba   :  { %3740 = vmatmul.mubr.bf16.gmra.mrb[60].mxu0 %v9651_v31  ;;  %5505 = vmatmul.mubr.bf16.gmra.mrb[60].mxu1 %v9651_v31  ;;  %v9825_v31 = vld [vmem:[%s12772_s1 + $0x4c4] ss:$16 sps:$4 sm:$0xff]  }
  0xbb   :  { %3749 = vmatprep.mubr.bf16.mxu0 %v9652_v32  ;;  %5514 = vmatprep.mubr.bf16.mxu1 %v9652_v32  ;;  %v9828_v32 = vld [vmem:[%s12772_s1 + $0x4cc] ss:$16 sps:$4 sm:$0xff]  }
  0xc2   :  { %3750 = vmatmul.mubr.bf16.gmra.mrb[64].mxu0 %v9654_v33  ;;  %5515 = vmatmul.mubr.bf16.gmra.mrb[64].mxu1 %v9654_v33  ;;  %v9771_v33 = vld [vmem:[%s12773_s0 + $0xe0] ss:$36 sps:$4 sm:$0xff]  }
  0xc3   :  { %3759 = vmatprep.mubr.bf16.mxu0 %v9661_v34  ;;  %5524 = vmatprep.mubr.bf16.mxu1 %v9661_v34  ;;  %v9772_v34 = vld [vmem:[%s12773_s0 + $0x12c] ss:$36 sps:$4 sm:$0xff]  }
  0xca   :  { %3760 = vmatmul.mubr.bf16.gmra.mrb[68].mxu0 %v9663_v37  ;;  %5525 = vmatmul.mubr.bf16.gmra.mrb[68].mxu1 %v9663_v37  ;;  %v9837_v37 = vld [vmem:[%s12772_s1 + $0x4e4] ss:$16 sps:$4 sm:$0xff]  }
  0xcb   :  { %3769 = vmatprep.mubr.bf16.mxu0 %v9664_v38  ;;  %5534 = vmatprep.mubr.bf16.mxu1 %v9664_v38  ;;  %v9840_v38 = vld [vmem:[%s12772_s1 + $0x4ec] ss:$16 sps:$4 sm:$0xff]  }
  0xd2   :  { %3770 = vmatmul.mubr.bf16.gmra.mrb[72].mxu0 %v9666_v39  ;;  %5535 = vmatmul.mubr.bf16.gmra.mrb[72].mxu1 %v9666_v39  ;;  %v9835_v39 = vld [vmem:[%s12772_s1 + $0x4e0] ss:$16 sps:$4 sm:$0xff]  }
  0xd3   :  { %3779 = vmatprep.mubr.bf16.mxu0 %v9673_v40  ;;  %5544 = vmatprep.mubr.bf16.mxu1 %v9673_v40  ;;  %v9838_v40 = vld [vmem:[%s12772_s1 + $0x4e8] ss:$16 sps:$4 sm:$0xff]  }
  0xda   :  { %3780 = vmatmul.mubr.bf16.gmra.mrb[76].mxu0 %v9675_v41  ;;  %5545 = vmatmul.mubr.bf16.gmra.mrb[76].mxu1 %v9675_v41  ;;  %v9849_v41 = vld [vmem:[%s12772_s1 + $0x504] ss:$16 sps:$4 sm:$0xff]  }
  0xdb   :  { %3789 = vmatprep.mubr.bf16.mxu0 %v9676_v42  ;;  %5554 = vmatprep.mubr.bf16.mxu1 %v9676_v42  ;;  %v9852_v42 = vld [vmem:[%s12772_s1 + $0x50c] ss:$16 sps:$4 sm:$0xff]  }
  0xe2   :  { %3790 = vmatmul.mubr.bf16.gmra.mrb[80].mxu0 %v9678_v43  ;;  %5555 = vmatmul.mubr.bf16.gmra.mrb[80].mxu1 %v9678_v43  ;;  %v9774_v43 = vld [vmem:[%s12773_s0 + $0x128] ss:$36 sps:$4 sm:$0xff]  }
  0xe3   :  { %3799 = vmatprep.mubr.bf16.mxu0 %v9685_v44  ;;  %5564 = vmatprep.mubr.bf16.mxu1 %v9685_v44  ;;  %v9781_v44 = vld [vmem:[%s12773_s0 + $0x174] ss:$36 sps:$4 sm:$0xff]  }
  0xea   :  { %3800 = vmatmul.mubr.bf16.gmra.mrb[84].mxu0 %v9687_v45  ;;  %5565 = vmatmul.mubr.bf16.gmra.mrb[84].mxu1 %v9687_v45  ;;  %v9847_v45 = vld [vmem:[%s12772_s1 + $0x500] ss:$16 sps:$4 sm:$0xff]  }
  0xeb   :  { %3809 = vmatprep.mubr.bf16.mxu0 %v9688_v46  ;;  %5574 = vmatprep.mubr.bf16.mxu1 %v9688_v46  ;;  %v9850_v46 = vld [vmem:[%s12772_s1 + $0x508] ss:$16 sps:$4 sm:$0xff]  }
  0xf2   :  { %3810 = vmatmul.mubr.bf16.gmra.mrb[88].mxu0 %v9690_v47  ;;  %5575 = vmatmul.mubr.bf16.gmra.mrb[88].mxu1 %v9690_v47  ;;  %v9861_v47 = vld [vmem:[%s12772_s1 + $0x524] ss:$16 sps:$4 sm:$0xff]  }
  0xf3   :  { %3819 = vmatprep.mubr.bf16.mxu0 %v9697_v48  ;;  %5584 = vmatprep.mubr.bf16.mxu1 %v9697_v48  ;;  %v9864_v48 = vld [vmem:[%s12772_s1 + $0x52c] ss:$16 sps:$4 sm:$0xff]  }
  0xfa   :  { %3820 = vmatmul.mubr.bf16.gmra.mrb[92].mxu0 %v9699_v49  ;;  %5585 = vmatmul.mubr.bf16.gmra.mrb[92].mxu1 %v9699_v49  ;;  %v9859_v49 = vld [vmem:[%s12772_s1 + $0x520] ss:$16 sps:$4 sm:$0xff]  }
  0xfb   :  { %3829 = vmatprep.mubr.bf16.mxu0 %v9700_v50  ;;  %5594 = vmatprep.mubr.bf16.mxu1 %v9700_v50  ;;  %v9862_v50 = vld [vmem:[%s12772_s1 + $0x528] ss:$16 sps:$4 sm:$0xff]  }
 0x102   :  { %3830 = vmatmul.mubr.bf16.gmra.mrb[96].mxu0 %v9702_v51  ;;  %5595 = vmatmul.mubr.bf16.gmra.mrb[96].mxu1 %v9702_v51  ;;  %v9873_v51 = vld [vmem:[%s12772_s1 + $0x544] ss:$16 sps:$4 sm:$0xff]  }
 0x103   :  { %3839 = vmatprep.mubr.bf16.mxu0 %v9709_v52  ;;  %5604 = vmatprep.mubr.bf16.mxu1 %v9709_v52  ;;  %v9876_v52 = vld [vmem:[%s12772_s1 + $0x54c] ss:$16 sps:$4 sm:$0xff]  }
 0x10a   :  { %3840 = vmatmul.mubr.bf16.gmra.mrb[100].mxu0 %v9711_v53  ;;  %5605 = vmatmul.mubr.bf16.gmra.mrb[100].mxu1 %v9711_v53  ;;  %v9783_v53 = vld [vmem:[%s12773_s0 + $0x170] ss:$36 sps:$4 sm:$0xff]  }
 0x10b   :  { %3849 = vmatprep.mubr.bf16.mxu0 %v9712_v54  ;;  %5614 = vmatprep.mubr.bf16.mxu1 %v9712_v54  ;;  %v9784_v54 = vld [vmem:[%s12773_s0 + $0x1bc] ss:$36 sps:$4 sm:$0xff]  }
 0x112   :  { %3850 = vmatmul.mubr.bf16.gmra.mrb[104].mxu0 %v9714_v55  ;;  %5615 = vmatmul.mubr.bf16.gmra.mrb[104].mxu1 %v9714_v55  ;;  %v9871_v55 = vld [vmem:[%s12772_s1 + $0x540] ss:$16 sps:$4 sm:$0xff]  }
 0x113   :  { %3859 = vmatprep.mubr.bf16.mxu0 %v9721_v56  ;;  %5624 = vmatprep.mubr.bf16.mxu1 %v9721_v56  ;;  %v9874_v56 = vld [vmem:[%s12772_s1 + $0x548] ss:$16 sps:$4 sm:$0xff]  }
 0x11a   :  { %3860 = vmatmul.mubr.bf16.gmra.mrb[108].mxu0 %v9723_v57  ;;  %5625 = vmatmul.mubr.bf16.gmra.mrb[108].mxu1 %v9723_v57  ;;  %v9786_v57 = vld [vmem:[%s12773_s0 + $0x1b8] ss:$36 sps:$4 sm:$0xff]  }
 0x11b   :  { %3869 = vmatprep.mubr.bf16.mxu0 %v9724_v58  ;;  %5634 = vmatprep.mubr.bf16.mxu1 %v9724_v58  ;;  %v9793_v58 = vld [vmem:[%s12773_s0 + $0x204] ss:$36 sps:$4 sm:$0xff]  }
 0x122   :  { %3870 = vmatmul.mubr.bf16.gmra.mrb[112].mxu0 %v9726_v59  ;;  %5635 = vmatmul.mubr.bf16.gmra.mrb[112].mxu1 %v9726_v59  ;;  %v9883_v59 = vld [vmem:[%s12772_s1 + $0x560] ss:$16 sps:$4 sm:$0xff]  }
 0x123   :  { %3879 = vmatprep.mubr.bf16.mxu0 %v9733_v60  ;;  %5644 = vmatprep.mubr.bf16.mxu1 %v9733_v60  ;;  %v9885_v60 = vld [vmem:[%s12772_s1 + $0x564] ss:$16 sps:$4 sm:$0xff]  }
 0x12a   :  { %3880 = vmatmul.mubr.bf16.gmra.mrb[116].mxu0 %v9735_v61  ;;  %5645 = vmatmul.mubr.bf16.gmra.mrb[116].mxu1 %v9735_v61  ;;  %v9886_v61 = vld [vmem:[%s12772_s1 + $0x568] ss:$16 sps:$4 sm:$0xff]  }
 0x12b   :  { %3889 = vmatprep.mubr.bf16.mxu0 %v9736_v62  ;;  %5654 = vmatprep.mubr.bf16.mxu1 %v9736_v62  ;;  %v9888_v62 = vld [vmem:[%s12772_s1 + $0x56c] ss:$16 sps:$4 sm:$0xff]  }
 0x132   :  { %3890 = vmatmul.mubr.bf16.gmra.mrb[120].mxu0 %v9738_v63  ;;  %5655 = vmatmul.mubr.bf16.gmra.mrb[120].mxu1 %v9738_v63  ;;  %v9795_v63 = vld [vmem:[%s12773_s0 + $0x200] ss:$36 sps:$4 sm:$0xff]  }
 0x133   :  { %3899 = vmatprep.mubr.bf16.mxu0 %v9745_v0  ;;  %5664 = vmatprep.mubr.bf16.mxu1 %v9745_v0  ;;  %v9796_v0 = vld [vmem:[%s12773_s0 + $0x24c] ss:$36 sps:$4 sm:$0xff]  }
 0x13a   :  { %3900 = vmatmul.mubr.bf16.gmra.mrb[124].mxu0 %v9747_v1  ;;  %5665 = vmatmul.mubr.bf16.gmra.mrb[124].mxu1 %v9747_v1  ;;  %v9798_v1 = vld [vmem:[%s12773_s0 + $0x248] ss:$36 sps:$4 sm:$0xff]  }
 0x13b   :  { %3942 = vmatprep.mubr.bf16.mxu0 %v9750_v2  ;;  %5707 = vmatprep.mubr.bf16.mxu1 %v9750_v2  ;;  %v9805_v2 = vld [vmem:[%s12773_s0 + $0x294] ss:$36 sps:$4 sm:$0xff]  }
 0x142   :  { %3943 = vmatmul.mubr.bf16.vlgmr.msra.gmra.mrb[0].mxu0 %v9748_v3  ;;  %5708 = vmatmul.mubr.bf16.vlgmr.msra.gmra.mrb[0].mxu1 %v9748_v3  ;;  %v9895_v3 = vld [vmem:[%s12772_s1 + $0x580] ss:$16 sps:$4 sm:$0xff]  }
 0x143   :  { %4264 = vmatpush1.bf16.msra.mxu0 %v9751_v4  ;;  %6029 = vmatpush1.bf16.msra.mxu1 %v9754_v5  ;;  %v9897_v4 = vld [vmem:[%s12772_s1 + $0x584] ss:$16 sps:$4 sm:$0xff]   ;;  %v9898_v5 = vld [vmem:[%s12772_s1 + $0x588] ss:$16 sps:$4 sm:$0xff]  }
 0x144   :  { %3952 = vmatprep.mubr.bf16.mxu0 %v9757_v6  ;;  %5717 = vmatprep.mubr.bf16.mxu1 %v9757_v6  ;;  %v9900_v6 = vld [vmem:[%s12772_s1 + $0x58c] ss:$16 sps:$4 sm:$0xff]  }
 0x145   :  { %4265 = vmatprep.subr.bf16.mxu0 %v9765_v7  ;;  %6030 = vmatprep.subr.bf16.mxu1 %v9768_v8  ;;  %v9807_v7 = vld [vmem:[%s12773_s0 + $0x290] ss:$36 sps:$4 sm:$0xff]   ;;  %v9808_v8 = vld [vmem:[%s12773_s0 + $0x2dc] ss:$36 sps:$4 sm:$0xff]  }
 0x147   :  { %4266 = vmatpush1.bf16.msra.mxu0 %v9763_v9  ;;  %6031 = vmatpush1.bf16.msra.mxu1 %v9766_v10  ;;  %v9810_v9 = vld [vmem:[%s12773_s0 + $0x2d8] ss:$36 sps:$4 sm:$0xff]   ;;  %v9817_v10 = vld [vmem:[%s12773_s0 + $0x324] ss:$36 sps:$4 sm:$0xff]  }
 0x148   :  { %4267 = vmatprep.subr.bf16.mxu0 %v9777_v11  ;;  %6032 = vmatprep.subr.bf16.mxu1 %v9780_v12  ;;  %v9907_v11 = vld [vmem:[%s12772_s1 + $0x5a0] ss:$16 sps:$4 sm:$0xff]   ;;  %v9909_v12 = vld [vmem:[%s12772_s1 + $0x5a4] ss:$16 sps:$4 sm:$0xff]  }
 0x14a   :  { %3953 = vmatmul.mubr.bf16.gmra.mrb[4].mxu0 %v9759_v13  ;;  %5718 = vmatmul.mubr.bf16.gmra.mrb[4].mxu1 %v9759_v13  ;;  %v9910_v13 = vld [vmem:[%s12772_s1 + $0x5a8] ss:$16 sps:$4 sm:$0xff]  }
 0x14b   :  { %3962 = vmatprep.mubr.bf16.mxu0 %v9760_v14  ;;  %5727 = vmatprep.mubr.bf16.mxu1 %v9760_v14  ;;  %v9912_v14 = vld [vmem:[%s12772_s1 + $0x5ac] ss:$16 sps:$4 sm:$0xff]  }
 0x14c   :  { %4268 = vmatpush1.bf16.msra.mxu0 %v9775_v15  ;;  %6033 = vmatpush1.bf16.msra.mxu1 %v9778_v16  ;;  %v9819_v15 = vld [vmem:[%s12773_s0 + $0x320] ss:$36 sps:$4 sm:$0xff]   ;;  %v9820_v16 = vld [vmem:[%s12773_s0 + $0x36c] ss:$36 sps:$4 sm:$0xff]  }
 0x14d   :  { %4269 = vmatprep.subr.bf16.mxu0 %v9789_v17  ;;  %6034 = vmatprep.subr.bf16.mxu1 %v9792_v18  ;;  %v9822_v17 = vld [vmem:[%s12773_s0 + $0x368] ss:$36 sps:$4 sm:$0xff]   ;;  %v9829_v18 = vld [vmem:[%s12773_s0 + $0x3b4] ss:$36 sps:$4 sm:$0xff]  }
 0x150   :  { %4270 = vmatpush1.bf16.msra.mxu0 %v9787_v19  ;;  %6035 = vmatpush1.bf16.msra.mxu1 %v9790_v20  ;;  %v9919_v19 = vld [vmem:[%s12772_s1 + $0x5c0] ss:$16 sps:$4 sm:$0xff]   ;;  %v9921_v20 = vld [vmem:[%s12772_s1 + $0x5c4] ss:$16 sps:$4 sm:$0xff]  }
 0x151   :  { %4271 = vmatprep.subr.bf16.mxu0 %v9801_v21  ;;  %6036 = vmatprep.subr.bf16.mxu1 %v9804_v22  ;;  %v9922_v21 = vld [vmem:[%s12772_s1 + $0x5c8] ss:$16 sps:$4 sm:$0xff]   ;;  %v9924_v22 = vld [vmem:[%s12772_s1 + $0x5cc] ss:$16 sps:$4 sm:$0xff]  }
 0x152   :  { %3963 = vmatmul.mubr.bf16.gmra.mrb[8].mxu0 %v9762_v23  ;;  %5728 = vmatmul.mubr.bf16.gmra.mrb[8].mxu1 %v9762_v23  ;;  %v9831_v23 = vld [vmem:[%s12773_s0 + $0x3b0] ss:$36 sps:$4 sm:$0xff]  }
 0x153   :  { %3972 = vmatprep.mubr.bf16.mxu0 %v9769_v24  ;;  %5737 = vmatprep.mubr.bf16.mxu1 %v9769_v24  ;;  %v9832_v24 = vld [vmem:[%s12773_s0 + $0x3fc] ss:$36 sps:$4 sm:$0xff]  }
 0x154   :  { %4272 = vmatpush1.bf16.msra.mxu0 %v9799_v25  ;;  %6037 = vmatpush1.bf16.msra.mxu1 %v9802_v26  ;;  %v9834_v25 = vld [vmem:[%s12773_s0 + $0x3f8] ss:$36 sps:$4 sm:$0xff]   ;;  %v9841_v26 = vld [vmem:[%s12773_s0 + $0x444] ss:$36 sps:$4 sm:$0xff]  }
 0x155   :  { %4273 = vmatprep.subr.bf16.mxu0 %v9813_v27  ;;  %6038 = vmatprep.subr.bf16.mxu1 %v9816_v28  ;;  %v9931_v27 = vld [vmem:[%s12772_s1 + $0x5e0] ss:$16 sps:$4 sm:$0xff]   ;;  %v9933_v28 = vld [vmem:[%s12772_s1 + $0x5e4] ss:$16 sps:$4 sm:$0xff]  }
 0x158   :  { %4274 = vmatpush1.bf16.msra.mxu0 %v9811_v29  ;;  %6039 = vmatpush1.bf16.msra.mxu1 %v9814_v30  ;;  %v9934_v29 = vld [vmem:[%s12772_s1 + $0x5e8] ss:$16 sps:$4 sm:$0xff]   ;;  %v9936_v30 = vld [vmem:[%s12772_s1 + $0x5ec] ss:$16 sps:$4 sm:$0xff]  }
 0x159   :  { %4275 = vmatprep.subr.bf16.mxu0 %v9825_v31  ;;  %6040 = vmatprep.subr.bf16.mxu1 %v9828_v32  ;;  %v9843_v31 = vld [vmem:[%s12773_s0 + $0x440] ss:$36 sps:$4 sm:$0xff]   ;;  %v9844_v32 = vld [vmem:[%s12773_s0 + $0x48c] ss:$36 sps:$4 sm:$0xff]  }
 0x15a   :  { %3973 = vmatmul.mubr.bf16.gmra.mrb[12].mxu0 %v9771_v33  ;;  %5738 = vmatmul.mubr.bf16.gmra.mrb[12].mxu1 %v9771_v33  ;;  %v9846_v33 = vld [vmem:[%s12773_s0 + $0x488] ss:$36 sps:$4 sm:$0xff]  }
 0x15b   :  { %3982 = vmatprep.mubr.bf16.mxu0 %v9772_v34  ;;  %5747 = vmatprep.mubr.bf16.mxu1 %v9772_v34  ;;  %v9853_v34 = vld [vmem:[%s12773_s0 + $0x4d4] ss:$36 sps:$4 sm:$0xff]  }
 0x15c   :  { %4276 = vmatpush1.bf16.msra.mxu0 %v9823_v35  ;;  %6041 = vmatpush1.bf16.msra.mxu1 %v9826_v36  ;;  %v9945_v35 = vld [vmem:[%s12772_s1 + $0x604] ss:$16 sps:$4 sm:$0xff]   ;;  %v9948_v36 = vld [vmem:[%s12772_s1 + $0x60c] ss:$16 sps:$4 sm:$0xff]  }
 0x15d   :  { %4277 = vmatprep.subr.bf16.mxu0 %v9837_v37  ;;  %6042 = vmatprep.subr.bf16.mxu1 %v9840_v38  ;;  %v9855_v37 = vld [vmem:[%s12773_s0 + $0x4d0] ss:$36 sps:$4 sm:$0xff]   ;;  %v9856_v38 = vld [vmem:[%s12773_s0 + $0x51c] ss:$36 sps:$4 sm:$0xff]  }
 0x160   :  { %4278 = vmatpush1.bf16.msra.mxu0 %v9835_v39  ;;  %6043 = vmatpush1.bf16.msra.mxu1 %v9838_v40  ;;  %v9858_v39 = vld [vmem:[%s12773_s0 + $0x518] ss:$36 sps:$4 sm:$0xff]   ;;  %v9865_v40 = vld [vmem:[%s12773_s0 + $0x564] ss:$36 sps:$4 sm:$0xff]  }
 0x161   :  { %4279 = vmatprep.subr.bf16.mxu0 %v9849_v41  ;;  %6044 = vmatprep.subr.bf16.mxu1 %v9852_v42  ;;  %v9867_v41 = vld [vmem:[%s12773_s0 + $0x560] ss:$36 sps:$4 sm:$0xff]   ;;  %v9868_v42 = vld [vmem:[%s12773_s0 + $0x5ac] ss:$36 sps:$4 sm:$0xff]  }
 0x162   :  { %3983 = vmatmul.mubr.bf16.gmra.mrb[16].mxu0 %v9774_v43  ;;  %5748 = vmatmul.mubr.bf16.gmra.mrb[16].mxu1 %v9774_v43  ;;  %v9870_v43 = vld [vmem:[%s12773_s0 + $0x5a8] ss:$36 sps:$4 sm:$0xff]  }
 0x163   :  { %3992 = vmatprep.mubr.bf16.mxu0 %v9781_v44  ;;  %5757 = vmatprep.mubr.bf16.mxu1 %v9781_v44  ;;  %v9877_v44 = vld [vmem:[%s12773_s0 + $0x5f4] ss:$36 sps:$4 sm:$0xff]  }
 0x164   :  { %4280 = vmatpush1.bf16.msra.mxu0 %v9847_v45  ;;  %6045 = vmatpush1.bf16.msra.mxu1 %v9850_v46  ;;  %v9879_v45 = vld [vmem:[%s12773_s0 + $0x5f0] ss:$36 sps:$4 sm:$0xff]   ;;  %v9880_v46 = vld [vmem:[%s12773_s0 + $0x63c] ss:$36 sps:$4 sm:$0xff]  }
 0x165   :  { %4281 = vmatprep.subr.bf16.mxu0 %v9861_v47  ;;  %6046 = vmatprep.subr.bf16.mxu1 %v9864_v48  ;;  %v9882_v47 = vld [vmem:[%s12773_s0 + $0x638] ss:$36 sps:$4 sm:$0xff]   ;;  %v9889_v48 = vld [vmem:[%s12773_s0 + $0x684] ss:$36 sps:$4 sm:$0xff]  }
 0x168   :  { %4282 = vmatpush1.bf16.msra.mxu0 %v9859_v49  ;;  %6047 = vmatpush1.bf16.msra.mxu1 %v9862_v50  ;;  %v9891_v49 = vld [vmem:[%s12773_s0 + $0x680] ss:$36 sps:$4 sm:$0xff]   ;;  %v9892_v50 = vld [vmem:[%s12773_s0 + $0x6cc] ss:$36 sps:$4 sm:$0xff]  }
 0x169   :  { %4283 = vmatprep.subr.bf16.mxu0 %v9873_v51  ;;  %6048 = vmatprep.subr.bf16.mxu1 %v9876_v52  ;;  %v9894_v51 = vld [vmem:[%s12773_s0 + $0x6c8] ss:$36 sps:$4 sm:$0xff]   ;;  %v9901_v52 = vld [vmem:[%s12773_s0 + $0x714] ss:$36 sps:$4 sm:$0xff]  }
 0x16a   :  { %3993 = vmatmul.mubr.bf16.gmra.mrb[20].mxu0 %v9783_v53  ;;  %5758 = vmatmul.mubr.bf16.gmra.mrb[20].mxu1 %v9783_v53  ;;  %v9903_v53 = vld [vmem:[%s12773_s0 + $0x710] ss:$36 sps:$4 sm:$0xff]  }
 0x16b   :  { %4002 = vmatprep.mubr.bf16.mxu0 %v9784_v54  ;;  %5767 = vmatprep.mubr.bf16.mxu1 %v9784_v54  ;;  %v9904_v54 = vld [vmem:[%s12773_s0 + $0x75c] ss:$36 sps:$4 sm:$0xff]  }
 0x16c   :  { %4284 = vmatpush1.bf16.msra.mxu0 %v9871_v55  ;;  %6049 = vmatpush1.bf16.msra.mxu1 %v9874_v56  ;;  %v9906_v55 = vld [vmem:[%s12773_s0 + $0x758] ss:$36 sps:$4 sm:$0xff]   ;;  %v9913_v56 = vld [vmem:[%s12773_s0 + $0x7a4] ss:$36 sps:$4 sm:$0xff]  }
 0x16d   :  { %4285 = vmatprep.subr.bf16.mxu0 %v9885_v60  ;;  %6050 = vmatprep.subr.bf16.mxu1 %v9888_v62  ;;  %v9925_v60 = vld [vmem:[%s12773_s0 + $0x834] ss:$36 sps:$4 sm:$0xff]   ;;  %v9928_v62 = vld [vmem:[%s12773_s0 + $0x87c] ss:$36 sps:$4 sm:$0xff]  }
 0x170   :  { %4286 = vmatpush1.bf16.msra.mxu0 %v9883_v59  ;;  %6051 = vmatpush1.bf16.msra.mxu1 %v9886_v61  ;;  %v9918_v59 = vld [vmem:[%s12773_s0 + $0x7e8] ss:$36 sps:$4 sm:$0xff]   ;;  %v9927_v61 = vld [vmem:[%s12773_s0 + $0x830] ss:$36 sps:$4 sm:$0xff]  }
 0x171   :  { %4287 = vmatprep.subr.bf16.mxu0 %v9897_v4  ;;  %6052 = vmatprep.subr.bf16.mxu1 %v9900_v6  ;;  %v9943_v4 = vld [vmem:[%s12772_s1 + $0x600] ss:$16 sps:$4 sm:$0xff]  }
 0x172   :  { %4003 = vmatmul.mubr.bf16.gmra.mrb[24].mxu0 %v9786_v57  ;;  %5768 = vmatmul.mubr.bf16.gmra.mrb[24].mxu1 %v9786_v57  ;;  %v9915_v57 = vld [vmem:[%s12773_s0 + $0x7a0] ss:$36 sps:$4 sm:$0xff]  }
 0x173   :  { %4012 = vmatprep.mubr.bf16.mxu0 %v9793_v58  ;;  %5777 = vmatprep.mubr.bf16.mxu1 %v9793_v58  ;;  %v9916_v58 = vld [vmem:[%s12773_s0 + $0x7ec] ss:$36 sps:$4 sm:$0xff]   ;;  %v9949_v6 = vld [vmem:[%s12773_s0 + $0x5c] ss:$36 sps:$4 sm:$0xff]  }
 0x174   :  { %4288 = vmatpush1.bf16.msra.mxu0 %v9895_v3  ;;  %6053 = vmatpush1.bf16.msra.mxu1 %v9898_v5  ;;  %v9940_v3 = vld [vmem:[%s12773_s0 + $0x10] ss:$36 sps:$4 sm:$0xff]   ;;  %v9946_v5 = vld [vmem:[%s12772_s1 + $0x608] ss:$16 sps:$4 sm:$0xff]  }
 0x175   :  { %4289 = vmatprep.subr.bf16.mxu0 %v9909_v12  ;;  %6054 = vmatprep.subr.bf16.mxu1 %v9912_v14  ;;  %v9972_v12 = vld [vmem:[%s12772_s1 + $0x64c] ss:$16 sps:$4 sm:$0xff]   ;;  %v9952_v14 = vld [vmem:[%s12773_s0 + $0xa4] ss:$36 sps:$4 sm:$0xff]  }
 0x178   :  { %4290 = vmatpush1.bf16.msra.mxu0 %v9907_v11  ;;  %6055 = vmatpush1.bf16.msra.mxu1 %v9910_v13  ;;  %v9969_v11 = vld [vmem:[%s12772_s1 + $0x644] ss:$16 sps:$4 sm:$0xff]   ;;  %v9951_v13 = vld [vmem:[%s12773_s0 + $0x58] ss:$36 sps:$4 sm:$0xff]  }
 0x179   :  { %4291 = vmatprep.subr.bf16.mxu0 %v9921_v20  ;;  %6056 = vmatprep.subr.bf16.mxu1 %v9924_v22  ;;  %v9982_v20 = vld [vmem:[%s12772_s1 + $0x668] ss:$16 sps:$4 sm:$0xff]   ;;  %v9996_v22 = vld [vmem:[%s12772_s1 + $0x68c] ss:$16 sps:$4 sm:$0xff]  }
 0x17a   :  { %4013 = vmatmul.mubr.bf16.gmra.mrb[28].mxu0 %v9795_v63  ;;  %5778 = vmatmul.mubr.bf16.gmra.mrb[28].mxu1 %v9795_v63  ;;  %v9930_v63 = vld [vmem:[%s12773_s0 + $0x878] ss:$36 sps:$4 sm:$0xff]  }
 0x17b   :  { %4022 = vmatprep.mubr.bf16.mxu0 %v9796_v0  ;;  %5787 = vmatprep.mubr.bf16.mxu1 %v9796_v0  ;;  %v9937_v0 = vld [vmem:[%s12773_s0 + $0x8c4] ss:$36 sps:$4 sm:$0xff]  }
 0x17c   :  { %4292 = vmatpush1.bf16.msra.mxu0 %v9919_v19  ;;  %6057 = vmatpush1.bf16.msra.mxu1 %v9922_v21  ;;  %v9979_v19 = vld [vmem:[%s12772_s1 + $0x660] ss:$16 sps:$4 sm:$0xff]   ;;  %v9993_v21 = vld [vmem:[%s12772_s1 + $0x684] ss:$16 sps:$4 sm:$0xff]  }
 0x17d   :  { %4293 = vmatprep.subr.bf16.mxu0 %v9933_v28  ;;  %6058 = vmatprep.subr.bf16.mxu1 %v9936_v30  ;;  %v10008_v28 = vld [vmem:[%s12772_s1 + $0x6ac] ss:$16 sps:$4 sm:$0xff]   ;;  %v10006_v30 = vld [vmem:[%s12772_s1 + $0x6a8] ss:$16 sps:$4 sm:$0xff]  }
 0x180   :  { %4294 = vmatpush1.bf16.msra.mxu0 %v9931_v27  ;;  %6059 = vmatpush1.bf16.msra.mxu1 %v9934_v29  ;;  %v10005_v27 = vld [vmem:[%s12772_s1 + $0x6a4] ss:$16 sps:$4 sm:$0xff]   ;;  %v10003_v29 = vld [vmem:[%s12772_s1 + $0x6a0] ss:$16 sps:$4 sm:$0xff]  }
 0x181   :  { %4616 = vmatprep.subr.bf16.mxu0 %v9945_v35  ;;  %6381 = vmatprep.subr.bf16.mxu1 %v9948_v36  ;;  %v10015_v35 = vld [vmem:[%s12772_s1 + $0x6c0] ss:$16 sps:$4 sm:$0xff]   ;;  %v10018_v36 = vld [vmem:[%s12772_s1 + $0x6c8] ss:$16 sps:$4 sm:$0xff]  }
 0x182   :  { %4023 = vmatmul.mubr.bf16.gmra.mrb[32].mxu0 %v9798_v1  ;;  %5788 = vmatmul.mubr.bf16.gmra.mrb[32].mxu1 %v9798_v1  ;;  %v9939_v1 = vld [vmem:[%s12773_s0 + $0x8c0] ss:$36 sps:$4 sm:$0xff]  }
 0x183   :  { %4032 = vmatprep.mubr.bf16.mxu0 %v9805_v2  ;;  %5797 = vmatprep.mubr.bf16.mxu1 %v9805_v2  ;;  %v9942_v2 = vld [vmem:[%s12773_s0 + $0x14] ss:$36 sps:$4 sm:$0xff]  }
 0x18a   :  { %4033 = vmatmul.mubr.bf16.gmra.mrb[36].mxu0 %v9807_v7  ;;  %5798 = vmatmul.mubr.bf16.gmra.mrb[36].mxu1 %v9807_v7  ;;  %v9957_v7 = vld [vmem:[%s12772_s1 + $0x624] ss:$16 sps:$4 sm:$0xff]  }
 0x18b   :  { %4042 = vmatprep.mubr.bf16.mxu0 %v9808_v8  ;;  %5807 = vmatprep.mubr.bf16.mxu1 %v9808_v8  ;;  %v9960_v8 = vld [vmem:[%s12772_s1 + $0x62c] ss:$16 sps:$4 sm:$0xff]  }
 0x192   :  { %4043 = vmatmul.mubr.bf16.gmra.mrb[40].mxu0 %v9810_v9  ;;  %5808 = vmatmul.mubr.bf16.gmra.mrb[40].mxu1 %v9810_v9  ;;  %v9955_v9 = vld [vmem:[%s12772_s1 + $0x620] ss:$16 sps:$4 sm:$0xff]  }
 0x193   :  { %4052 = vmatprep.mubr.bf16.mxu0 %v9817_v10  ;;  %5817 = vmatprep.mubr.bf16.mxu1 %v9817_v10  ;;  %v9958_v10 = vld [vmem:[%s12772_s1 + $0x628] ss:$16 sps:$4 sm:$0xff]  }
 0x19a   :  { %4053 = vmatmul.mubr.bf16.gmra.mrb[44].mxu0 %v9819_v15  ;;  %5818 = vmatmul.mubr.bf16.gmra.mrb[44].mxu1 %v9819_v15  ;;  %v9967_v15 = vld [vmem:[%s12772_s1 + $0x640] ss:$16 sps:$4 sm:$0xff]  }
 0x19b   :  { %4062 = vmatprep.mubr.bf16.mxu0 %v9820_v16  ;;  %5827 = vmatprep.mubr.bf16.mxu1 %v9820_v16  ;;  %v9970_v16 = vld [vmem:[%s12772_s1 + $0x648] ss:$16 sps:$4 sm:$0xff]  }
 0x1a2   :  { %4063 = vmatmul.mubr.bf16.gmra.mrb[48].mxu0 %v9822_v17  ;;  %5828 = vmatmul.mubr.bf16.gmra.mrb[48].mxu1 %v9822_v17  ;;  %v9981_v17 = vld [vmem:[%s12772_s1 + $0x664] ss:$16 sps:$4 sm:$0xff]  }
 0x1a3   :  { %4072 = vmatprep.mubr.bf16.mxu0 %v9829_v18  ;;  %5837 = vmatprep.mubr.bf16.mxu1 %v9829_v18  ;;  %v9984_v18 = vld [vmem:[%s12772_s1 + $0x66c] ss:$16 sps:$4 sm:$0xff]  }
 0x1aa   :  { %4073 = vmatmul.mubr.bf16.gmra.mrb[52].mxu0 %v9831_v23  ;;  %5838 = vmatmul.mubr.bf16.gmra.mrb[52].mxu1 %v9831_v23  ;;  %v9954_v23 = vld [vmem:[%s12773_s0 + $0xa0] ss:$36 sps:$4 sm:$0xff]  }
 0x1ab   :  { %4082 = vmatprep.mubr.bf16.mxu0 %v9832_v24  ;;  %5847 = vmatprep.mubr.bf16.mxu1 %v9832_v24  ;;  %v9961_v24 = vld [vmem:[%s12773_s0 + $0xec] ss:$36 sps:$4 sm:$0xff]  }
 0x1b2   :  { %4083 = vmatmul.mubr.bf16.gmra.mrb[56].mxu0 %v9834_v25  ;;  %5848 = vmatmul.mubr.bf16.gmra.mrb[56].mxu1 %v9834_v25  ;;  %v9991_v25 = vld [vmem:[%s12772_s1 + $0x680] ss:$16 sps:$4 sm:$0xff]  }
 0x1b3   :  { %4092 = vmatprep.mubr.bf16.mxu0 %v9841_v26  ;;  %5857 = vmatprep.mubr.bf16.mxu1 %v9841_v26  ;;  %v9994_v26 = vld [vmem:[%s12772_s1 + $0x688] ss:$16 sps:$4 sm:$0xff]  }
 0x1ba   :  { %4093 = vmatmul.mubr.bf16.gmra.mrb[60].mxu0 %v9843_v31  ;;  %5858 = vmatmul.mubr.bf16.gmra.mrb[60].mxu1 %v9843_v31  ;;  %v10017_v31 = vld [vmem:[%s12772_s1 + $0x6c4] ss:$16 sps:$4 sm:$0xff]  }
 0x1bb   :  { %4102 = vmatprep.mubr.bf16.mxu0 %v9844_v32  ;;  %5867 = vmatprep.mubr.bf16.mxu1 %v9844_v32  ;;  %v10020_v32 = vld [vmem:[%s12772_s1 + $0x6cc] ss:$16 sps:$4 sm:$0xff]  }
 0x1c2   :  { %4103 = vmatmul.mubr.bf16.gmra.mrb[64].mxu0 %v9846_v33  ;;  %5868 = vmatmul.mubr.bf16.gmra.mrb[64].mxu1 %v9846_v33  ;;  %v9963_v33 = vld [vmem:[%s12773_s0 + $0xe8] ss:$36 sps:$4 sm:$0xff]  }
 0x1c3   :  { %4112 = vmatprep.mubr.bf16.mxu0 %v9853_v34  ;;  %5877 = vmatprep.mubr.bf16.mxu1 %v9853_v34  ;;  %v9964_v34 = vld [vmem:[%s12773_s0 + $0x134] ss:$36 sps:$4 sm:$0xff]  }
 0x1ca   :  { %4113 = vmatmul.mubr.bf16.gmra.mrb[68].mxu0 %v9855_v37  ;;  %5878 = vmatmul.mubr.bf16.gmra.mrb[68].mxu1 %v9855_v37  ;;  %v10029_v37 = vld [vmem:[%s12772_s1 + $0x6e4] ss:$16 sps:$4 sm:$0xff]  }
 0x1cb   :  { %4122 = vmatprep.mubr.bf16.mxu0 %v9856_v38  ;;  %5887 = vmatprep.mubr.bf16.mxu1 %v9856_v38  ;;  %v10032_v38 = vld [vmem:[%s12772_s1 + $0x6ec] ss:$16 sps:$4 sm:$0xff]  }
 0x1d2   :  { %4123 = vmatmul.mubr.bf16.gmra.mrb[72].mxu0 %v9858_v39  ;;  %5888 = vmatmul.mubr.bf16.gmra.mrb[72].mxu1 %v9858_v39  ;;  %v10027_v39 = vld [vmem:[%s12772_s1 + $0x6e0] ss:$16 sps:$4 sm:$0xff]  }
 0x1d3   :  { %4132 = vmatprep.mubr.bf16.mxu0 %v9865_v40  ;;  %5897 = vmatprep.mubr.bf16.mxu1 %v9865_v40  ;;  %v10030_v40 = vld [vmem:[%s12772_s1 + $0x6e8] ss:$16 sps:$4 sm:$0xff]  }
 0x1da   :  { %4133 = vmatmul.mubr.bf16.gmra.mrb[76].mxu0 %v9867_v41  ;;  %5898 = vmatmul.mubr.bf16.gmra.mrb[76].mxu1 %v9867_v41  ;;  %v10041_v41 = vld [vmem:[%s12772_s1 + $0x704] ss:$16 sps:$4 sm:$0xff]  }
 0x1db   :  { %4142 = vmatprep.mubr.bf16.mxu0 %v9868_v42  ;;  %5907 = vmatprep.mubr.bf16.mxu1 %v9868_v42  ;;  %v10044_v42 = vld [vmem:[%s12772_s1 + $0x70c] ss:$16 sps:$4 sm:$0xff]  }
 0x1e2   :  { %4143 = vmatmul.mubr.bf16.gmra.mrb[80].mxu0 %v9870_v43  ;;  %5908 = vmatmul.mubr.bf16.gmra.mrb[80].mxu1 %v9870_v43  ;;  %v9966_v43 = vld [vmem:[%s12773_s0 + $0x130] ss:$36 sps:$4 sm:$0xff]  }
 0x1e3   :  { %4152 = vmatprep.mubr.bf16.mxu0 %v9877_v44  ;;  %5917 = vmatprep.mubr.bf16.mxu1 %v9877_v44  ;;  %v9973_v44 = vld [vmem:[%s12773_s0 + $0x17c] ss:$36 sps:$4 sm:$0xff]  }
 0x1ea   :  { %4153 = vmatmul.mubr.bf16.gmra.mrb[84].mxu0 %v9879_v45  ;;  %5918 = vmatmul.mubr.bf16.gmra.mrb[84].mxu1 %v9879_v45  ;;  %v10039_v45 = vld [vmem:[%s12772_s1 + $0x700] ss:$16 sps:$4 sm:$0xff]  }
 0x1eb   :  { %4162 = vmatprep.mubr.bf16.mxu0 %v9880_v46  ;;  %5927 = vmatprep.mubr.bf16.mxu1 %v9880_v46  ;;  %v10042_v46 = vld [vmem:[%s12772_s1 + $0x708] ss:$16 sps:$4 sm:$0xff]  }
 0x1f2   :  { %4163 = vmatmul.mubr.bf16.gmra.mrb[88].mxu0 %v9882_v47  ;;  %5928 = vmatmul.mubr.bf16.gmra.mrb[88].mxu1 %v9882_v47  ;;  %v10053_v47 = vld [vmem:[%s12772_s1 + $0x724] ss:$16 sps:$4 sm:$0xff]  }
 0x1f3   :  { %4172 = vmatprep.mubr.bf16.mxu0 %v9889_v48  ;;  %5937 = vmatprep.mubr.bf16.mxu1 %v9889_v48  ;;  %v10056_v48 = vld [vmem:[%s12772_s1 + $0x72c] ss:$16 sps:$4 sm:$0xff]  }
 0x1fa   :  { %4173 = vmatmul.mubr.bf16.gmra.mrb[92].mxu0 %v9891_v49  ;;  %5938 = vmatmul.mubr.bf16.gmra.mrb[92].mxu1 %v9891_v49  ;;  %v10051_v49 = vld [vmem:[%s12772_s1 + $0x720] ss:$16 sps:$4 sm:$0xff]  }
 0x1fb   :  { %4182 = vmatprep.mubr.bf16.mxu0 %v9892_v50  ;;  %5947 = vmatprep.mubr.bf16.mxu1 %v9892_v50  ;;  %v10054_v50 = vld [vmem:[%s12772_s1 + $0x728] ss:$16 sps:$4 sm:$0xff]  }
 0x202   :  { %4183 = vmatmul.mubr.bf16.gmra.mrb[96].mxu0 %v9894_v51  ;;  %5948 = vmatmul.mubr.bf16.gmra.mrb[96].mxu1 %v9894_v51  ;;  %v10065_v51 = vld [vmem:[%s12772_s1 + $0x744] ss:$16 sps:$4 sm:$0xff]  }
 0x203   :  { %4192 = vmatprep.mubr.bf16.mxu0 %v9901_v52  ;;  %5957 = vmatprep.mubr.bf16.mxu1 %v9901_v52  ;;  %v10068_v52 = vld [vmem:[%s12772_s1 + $0x74c] ss:$16 sps:$4 sm:$0xff]  }
 0x20a   :  { %4193 = vmatmul.mubr.bf16.gmra.mrb[100].mxu0 %v9903_v53  ;;  %5958 = vmatmul.mubr.bf16.gmra.mrb[100].mxu1 %v9903_v53  ;;  %v9975_v53 = vld [vmem:[%s12773_s0 + $0x178] ss:$36 sps:$4 sm:$0xff]  }
 0x20b   :  { %4202 = vmatprep.mubr.bf16.mxu0 %v9904_v54  ;;  %5967 = vmatprep.mubr.bf16.mxu1 %v9904_v54  ;;  %v9976_v54 = vld [vmem:[%s12773_s0 + $0x1c4] ss:$36 sps:$4 sm:$0xff]  }
 0x212   :  { %4203 = vmatmul.mubr.bf16.gmra.mrb[104].mxu0 %v9906_v55  ;;  %5968 = vmatmul.mubr.bf16.gmra.mrb[104].mxu1 %v9906_v55  ;;  %v10063_v55 = vld [vmem:[%s12772_s1 + $0x740] ss:$16 sps:$4 sm:$0xff]  }
 0x213   :  { %4212 = vmatprep.mubr.bf16.mxu0 %v9913_v56  ;;  %5977 = vmatprep.mubr.bf16.mxu1 %v9913_v56  ;;  %v10066_v56 = vld [vmem:[%s12772_s1 + $0x748] ss:$16 sps:$4 sm:$0xff]  }
 0x21a   :  { %4213 = vmatmul.mubr.bf16.gmra.mrb[108].mxu0 %v9915_v57  ;;  %5978 = vmatmul.mubr.bf16.gmra.mrb[108].mxu1 %v9915_v57  ;;  %v9978_v57 = vld [vmem:[%s12773_s0 + $0x1c0] ss:$36 sps:$4 sm:$0xff]  }
 0x21b   :  { %4222 = vmatprep.mubr.bf16.mxu0 %v9916_v58  ;;  %5987 = vmatprep.mubr.bf16.mxu1 %v9916_v58  ;;  %v9985_v58 = vld [vmem:[%s12773_s0 + $0x20c] ss:$36 sps:$4 sm:$0xff]  }
 0x222   :  { %4223 = vmatmul.mubr.bf16.gmra.mrb[112].mxu0 %v9918_v59  ;;  %5988 = vmatmul.mubr.bf16.gmra.mrb[112].mxu1 %v9918_v59  ;;  %v10075_v59 = vld [vmem:[%s12772_s1 + $0x760] ss:$16 sps:$4 sm:$0xff]  }
 0x223   :  { %4232 = vmatprep.mubr.bf16.mxu0 %v9925_v60  ;;  %5997 = vmatprep.mubr.bf16.mxu1 %v9925_v60  ;;  %v10077_v60 = vld [vmem:[%s12772_s1 + $0x764] ss:$16 sps:$4 sm:$0xff]  }
 0x22a   :  { %4233 = vmatmul.mubr.bf16.gmra.mrb[116].mxu0 %v9927_v61  ;;  %5998 = vmatmul.mubr.bf16.gmra.mrb[116].mxu1 %v9927_v61  ;;  %v10078_v61 = vld [vmem:[%s12772_s1 + $0x768] ss:$16 sps:$4 sm:$0xff]  }
 0x22b   :  { %4242 = vmatprep.mubr.bf16.mxu0 %v9928_v62  ;;  %6007 = vmatprep.mubr.bf16.mxu1 %v9928_v62  ;;  %v10080_v62 = vld [vmem:[%s12772_s1 + $0x76c] ss:$16 sps:$4 sm:$0xff]  }
 0x232   :  { %4243 = vmatmul.mubr.bf16.gmra.mrb[120].mxu0 %v9930_v63  ;;  %6008 = vmatmul.mubr.bf16.gmra.mrb[120].mxu1 %v9930_v63  ;;  %v9987_v63 = vld [vmem:[%s12773_s0 + $0x208] ss:$36 sps:$4 sm:$0xff]  }
 0x233   :  { %4252 = vmatprep.mubr.bf16.mxu0 %v9937_v0  ;;  %6017 = vmatprep.mubr.bf16.mxu1 %v9937_v0  ;;  %v9988_v0 = vld [vmem:[%s12773_s0 + $0x254] ss:$36 sps:$4 sm:$0xff]  }
 0x23a   :  { %4253 = vmatmul.mubr.bf16.gmra.mrb[124].mxu0 %v9939_v1  ;;  %6018 = vmatmul.mubr.bf16.gmra.mrb[124].mxu1 %v9939_v1  ;;  %v9990_v1 = vld [vmem:[%s12773_s0 + $0x250] ss:$36 sps:$4 sm:$0xff]  }
 0x23b   :  { %4295 = vmatprep.mubr.bf16.mxu0 %v9942_v2  ;;  %6060 = vmatprep.mubr.bf16.mxu1 %v9942_v2  ;;  %v9997_v2 = vld [vmem:[%s12773_s0 + $0x29c] ss:$36 sps:$4 sm:$0xff]  }
 0x242   :  { %4296 = vmatmul.mubr.bf16.vlgmr.msra.gmra.mrb[0].mxu0 %v9940_v3  ;;  %6061 = vmatmul.mubr.bf16.vlgmr.msra.gmra.mrb[0].mxu1 %v9940_v3  ;;  %v10087_v3 = vld [vmem:[%s12772_s1 + $0x780] ss:$16 sps:$4 sm:$0xff]  }
 0x243   :  { %4617 = vmatpush1.bf16.msra.mxu0 %v9943_v4  ;;  %6382 = vmatpush1.bf16.msra.mxu1 %v9946_v5  ;;  %v10089_v4 = vld [vmem:[%s12772_s1 + $0x784] ss:$16 sps:$4 sm:$0xff]   ;;  %v10090_v5 = vld [vmem:[%s12772_s1 + $0x788] ss:$16 sps:$4 sm:$0xff]  }
 0x244   :  { %4305 = vmatprep.mubr.bf16.mxu0 %v9949_v6  ;;  %6070 = vmatprep.mubr.bf16.mxu1 %v9949_v6  ;;  %v10092_v6 = vld [vmem:[%s12772_s1 + $0x78c] ss:$16 sps:$4 sm:$0xff]  }
 0x245   :  { %4618 = vmatprep.subr.bf16.mxu0 %v9957_v7  ;;  %6383 = vmatprep.subr.bf16.mxu1 %v9960_v8  ;;  %v9999_v7 = vld [vmem:[%s12773_s0 + $0x298] ss:$36 sps:$4 sm:$0xff]   ;;  %v10000_v8 = vld [vmem:[%s12773_s0 + $0x2e4] ss:$36 sps:$4 sm:$0xff]  }
 0x247   :  { %4619 = vmatpush1.bf16.msra.mxu0 %v9955_v9  ;;  %6384 = vmatpush1.bf16.msra.mxu1 %v9958_v10  ;;  %v10002_v9 = vld [vmem:[%s12773_s0 + $0x2e0] ss:$36 sps:$4 sm:$0xff]   ;;  %v10009_v10 = vld [vmem:[%s12773_s0 + $0x32c] ss:$36 sps:$4 sm:$0xff]  }
 0x248   :  { %4620 = vmatprep.subr.bf16.mxu0 %v9969_v11  ;;  %6385 = vmatprep.subr.bf16.mxu1 %v9972_v12  ;;  %v10099_v11 = vld [vmem:[%s12772_s1 + $0x7a0] ss:$16 sps:$4 sm:$0xff]   ;;  %v10101_v12 = vld [vmem:[%s12772_s1 + $0x7a4] ss:$16 sps:$4 sm:$0xff]  }
 0x24a   :  { %4306 = vmatmul.mubr.bf16.gmra.mrb[4].mxu0 %v9951_v13  ;;  %6071 = vmatmul.mubr.bf16.gmra.mrb[4].mxu1 %v9951_v13  ;;  %v10102_v13 = vld [vmem:[%s12772_s1 + $0x7a8] ss:$16 sps:$4 sm:$0xff]  }
 0x24b   :  { %4315 = vmatprep.mubr.bf16.mxu0 %v9952_v14  ;;  %6080 = vmatprep.mubr.bf16.mxu1 %v9952_v14  ;;  %v10104_v14 = vld [vmem:[%s12772_s1 + $0x7ac] ss:$16 sps:$4 sm:$0xff]  }
 0x24c   :  { %4621 = vmatpush1.bf16.msra.mxu0 %v9967_v15  ;;  %6386 = vmatpush1.bf16.msra.mxu1 %v9970_v16  ;;  %v10011_v15 = vld [vmem:[%s12773_s0 + $0x328] ss:$36 sps:$4 sm:$0xff]   ;;  %v10012_v16 = vld [vmem:[%s12773_s0 + $0x374] ss:$36 sps:$4 sm:$0xff]  }
 0x24d   :  { %4622 = vmatprep.subr.bf16.mxu0 %v9981_v17  ;;  %6387 = vmatprep.subr.bf16.mxu1 %v9984_v18  ;;  %v10014_v17 = vld [vmem:[%s12773_s0 + $0x370] ss:$36 sps:$4 sm:$0xff]   ;;  %v10021_v18 = vld [vmem:[%s12773_s0 + $0x3bc] ss:$36 sps:$4 sm:$0xff]  }
 0x250   :  { %4623 = vmatpush1.bf16.msra.mxu0 %v9979_v19  ;;  %6388 = vmatpush1.bf16.msra.mxu1 %v9982_v20  ;;  %v10111_v19 = vld [vmem:[%s12772_s1 + $0x7c0] ss:$16 sps:$4 sm:$0xff]   ;;  %v10113_v20 = vld [vmem:[%s12772_s1 + $0x7c4] ss:$16 sps:$4 sm:$0xff]  }
 0x251   :  { %4624 = vmatprep.subr.bf16.mxu0 %v9993_v21  ;;  %6389 = vmatprep.subr.bf16.mxu1 %v9996_v22  ;;  %v10114_v21 = vld [vmem:[%s12772_s1 + $0x7c8] ss:$16 sps:$4 sm:$0xff]   ;;  %v10116_v22 = vld [vmem:[%s12772_s1 + $0x7cc] ss:$16 sps:$4 sm:$0xff]  }
 0x252   :  { %4316 = vmatmul.mubr.bf16.gmra.mrb[8].mxu0 %v9954_v23  ;;  %6081 = vmatmul.mubr.bf16.gmra.mrb[8].mxu1 %v9954_v23  ;;  %v10023_v23 = vld [vmem:[%s12773_s0 + $0x3b8] ss:$36 sps:$4 sm:$0xff]  }
 0x253   :  { %4325 = vmatprep.mubr.bf16.mxu0 %v9961_v24  ;;  %6090 = vmatprep.mubr.bf16.mxu1 %v9961_v24  ;;  %v10024_v24 = vld [vmem:[%s12773_s0 + $0x404] ss:$36 sps:$4 sm:$0xff]  }
 0x254   :  { %4625 = vmatpush1.bf16.msra.mxu0 %v9991_v25  ;;  %6390 = vmatpush1.bf16.msra.mxu1 %v9994_v26  ;;  %v10026_v25 = vld [vmem:[%s12773_s0 + $0x400] ss:$36 sps:$4 sm:$0xff]   ;;  %v10033_v26 = vld [vmem:[%s12773_s0 + $0x44c] ss:$36 sps:$4 sm:$0xff]  }
 0x255   :  { %4626 = vmatprep.subr.bf16.mxu0 %v10005_v27  ;;  %6391 = vmatprep.subr.bf16.mxu1 %v10008_v28  ;;  %v10123_v27 = vld [vmem:[%s12772_s1 + $0x7e0] ss:$16 sps:$4 sm:$0xff]   ;;  %v10125_v28 = vld [vmem:[%s12772_s1 + $0x7e4] ss:$16 sps:$4 sm:$0xff]  }
 0x258   :  { %4627 = vmatpush1.bf16.msra.mxu0 %v10003_v29  ;;  %6392 = vmatpush1.bf16.msra.mxu1 %v10006_v30  ;;  %v10126_v29 = vld [vmem:[%s12772_s1 + $0x7e8] ss:$16 sps:$4 sm:$0xff]   ;;  %v10128_v30 = vld [vmem:[%s12772_s1 + $0x7ec] ss:$16 sps:$4 sm:$0xff]  }
 0x259   :  { %4628 = vmatprep.subr.bf16.mxu0 %v10017_v31  ;;  %6393 = vmatprep.subr.bf16.mxu1 %v10020_v32  ;;  %v10035_v31 = vld [vmem:[%s12773_s0 + $0x448] ss:$36 sps:$4 sm:$0xff]   ;;  %v10036_v32 = vld [vmem:[%s12773_s0 + $0x494] ss:$36 sps:$4 sm:$0xff]  }
 0x25a   :  { %4326 = vmatmul.mubr.bf16.gmra.mrb[12].mxu0 %v9963_v33  ;;  %6091 = vmatmul.mubr.bf16.gmra.mrb[12].mxu1 %v9963_v33  ;;  %v10038_v33 = vld [vmem:[%s12773_s0 + $0x490] ss:$36 sps:$4 sm:$0xff]  }
 0x25b   :  { %4335 = vmatprep.mubr.bf16.mxu0 %v9964_v34  ;;  %6100 = vmatprep.mubr.bf16.mxu1 %v9964_v34  ;;  %v10045_v34 = vld [vmem:[%s12773_s0 + $0x4dc] ss:$36 sps:$4 sm:$0xff]  }
 0x25c   :  { %4629 = vmatpush1.bf16.msra.mxu0 %v10015_v35  ;;  %6394 = vmatpush1.bf16.msra.mxu1 %v10018_v36  ;;  %v10137_v35 = vld [vmem:[%s12772_s1 + $0x804] ss:$16 sps:$4 sm:$0xff]   ;;  %v10140_v36 = vld [vmem:[%s12772_s1 + $0x80c] ss:$16 sps:$4 sm:$0xff]  }
 0x25d   :  { %4630 = vmatprep.subr.bf16.mxu0 %v10029_v37  ;;  %6395 = vmatprep.subr.bf16.mxu1 %v10032_v38  ;;  %v10047_v37 = vld [vmem:[%s12773_s0 + $0x4d8] ss:$36 sps:$4 sm:$0xff]   ;;  %v10048_v38 = vld [vmem:[%s12773_s0 + $0x524] ss:$36 sps:$4 sm:$0xff]  }
 0x260   :  { %4631 = vmatpush1.bf16.msra.mxu0 %v10027_v39  ;;  %6396 = vmatpush1.bf16.msra.mxu1 %v10030_v40  ;;  %v10050_v39 = vld [vmem:[%s12773_s0 + $0x520] ss:$36 sps:$4 sm:$0xff]   ;;  %v10057_v40 = vld [vmem:[%s12773_s0 + $0x56c] ss:$36 sps:$4 sm:$0xff]  }
 0x261   :  { %4632 = vmatprep.subr.bf16.mxu0 %v10041_v41  ;;  %6397 = vmatprep.subr.bf16.mxu1 %v10044_v42  ;;  %v10059_v41 = vld [vmem:[%s12773_s0 + $0x568] ss:$36 sps:$4 sm:$0xff]   ;;  %v10060_v42 = vld [vmem:[%s12773_s0 + $0x5b4] ss:$36 sps:$4 sm:$0xff]  }
 0x262   :  { %4336 = vmatmul.mubr.bf16.gmra.mrb[16].mxu0 %v9966_v43  ;;  %6101 = vmatmul.mubr.bf16.gmra.mrb[16].mxu1 %v9966_v43  ;;  %v10062_v43 = vld [vmem:[%s12773_s0 + $0x5b0] ss:$36 sps:$4 sm:$0xff]  }
 0x263   :  { %4345 = vmatprep.mubr.bf16.mxu0 %v9973_v44  ;;  %6110 = vmatprep.mubr.bf16.mxu1 %v9973_v44  ;;  %v10069_v44 = vld [vmem:[%s12773_s0 + $0x5fc] ss:$36 sps:$4 sm:$0xff]  }
 0x264   :  { %4633 = vmatpush1.bf16.msra.mxu0 %v10039_v45  ;;  %6398 = vmatpush1.bf16.msra.mxu1 %v10042_v46  ;;  %v10071_v45 = vld [vmem:[%s12773_s0 + $0x5f8] ss:$36 sps:$4 sm:$0xff]   ;;  %v10072_v46 = vld [vmem:[%s12773_s0 + $0x644] ss:$36 sps:$4 sm:$0xff]  }
 0x265   :  { %4634 = vmatprep.subr.bf16.mxu0 %v10053_v47  ;;  %6399 = vmatprep.subr.bf16.mxu1 %v10056_v48  ;;  %v10074_v47 = vld [vmem:[%s12773_s0 + $0x640] ss:$36 sps:$4 sm:$0xff]   ;;  %v10081_v48 = vld [vmem:[%s12773_s0 + $0x68c] ss:$36 sps:$4 sm:$0xff]  }
 0x268   :  { %4635 = vmatpush1.bf16.msra.mxu0 %v10051_v49  ;;  %6400 = vmatpush1.bf16.msra.mxu1 %v10054_v50  ;;  %v10083_v49 = vld [vmem:[%s12773_s0 + $0x688] ss:$36 sps:$4 sm:$0xff]   ;;  %v10084_v50 = vld [vmem:[%s12773_s0 + $0x6d4] ss:$36 sps:$4 sm:$0xff]  }
 0x269   :  { %4636 = vmatprep.subr.bf16.mxu0 %v10065_v51  ;;  %6401 = vmatprep.subr.bf16.mxu1 %v10068_v52  ;;  %v10086_v51 = vld [vmem:[%s12773_s0 + $0x6d0] ss:$36 sps:$4 sm:$0xff]   ;;  %v10093_v52 = vld [vmem:[%s12773_s0 + $0x71c] ss:$36 sps:$4 sm:$0xff]  }
 0x26a   :  { %4346 = vmatmul.mubr.bf16.gmra.mrb[20].mxu0 %v9975_v53  ;;  %6111 = vmatmul.mubr.bf16.gmra.mrb[20].mxu1 %v9975_v53  ;;  %v10095_v53 = vld [vmem:[%s12773_s0 + $0x718] ss:$36 sps:$4 sm:$0xff]  }
 0x26b   :  { %4355 = vmatprep.mubr.bf16.mxu0 %v9976_v54  ;;  %6120 = vmatprep.mubr.bf16.mxu1 %v9976_v54  ;;  %v10096_v54 = vld [vmem:[%s12773_s0 + $0x764] ss:$36 sps:$4 sm:$0xff]  }
 0x26c   :  { %4637 = vmatpush1.bf16.msra.mxu0 %v10063_v55  ;;  %6402 = vmatpush1.bf16.msra.mxu1 %v10066_v56  ;;  %v10098_v55 = vld [vmem:[%s12773_s0 + $0x760] ss:$36 sps:$4 sm:$0xff]   ;;  %v10105_v56 = vld [vmem:[%s12773_s0 + $0x7ac] ss:$36 sps:$4 sm:$0xff]  }
 0x26d   :  { %4638 = vmatprep.subr.bf16.mxu0 %v10077_v60  ;;  %6403 = vmatprep.subr.bf16.mxu1 %v10080_v62  ;;  %v10117_v60 = vld [vmem:[%s12773_s0 + $0x83c] ss:$36 sps:$4 sm:$0xff]   ;;  %v10120_v62 = vld [vmem:[%s12773_s0 + $0x884] ss:$36 sps:$4 sm:$0xff]  }
 0x270   :  { %4639 = vmatpush1.bf16.msra.mxu0 %v10075_v59  ;;  %6404 = vmatpush1.bf16.msra.mxu1 %v10078_v61  ;;  %v10110_v59 = vld [vmem:[%s12773_s0 + $0x7f0] ss:$36 sps:$4 sm:$0xff]   ;;  %v10119_v61 = vld [vmem:[%s12773_s0 + $0x838] ss:$36 sps:$4 sm:$0xff]  }
 0x271   :  { %4640 = vmatprep.subr.bf16.mxu0 %v10089_v4  ;;  %6405 = vmatprep.subr.bf16.mxu1 %v10092_v6  ;;  %v10135_v4 = vld [vmem:[%s12772_s1 + $0x800] ss:$16 sps:$4 sm:$0xff]   ;;  %v10141_v6 = vld [vmem:[%s12773_s0 + $0x64] ss:$36 sps:$4 sm:$0xff]  }
 0x272   :  { %4356 = vmatmul.mubr.bf16.gmra.mrb[24].mxu0 %v9978_v57  ;;  %6121 = vmatmul.mubr.bf16.gmra.mrb[24].mxu1 %v9978_v57  ;;  %v10107_v57 = vld [vmem:[%s12773_s0 + $0x7a8] ss:$36 sps:$4 sm:$0xff]  }
 0x273   :  { %4365 = vmatprep.mubr.bf16.mxu0 %v9985_v58  ;;  %6130 = vmatprep.mubr.bf16.mxu1 %v9985_v58  ;;  %v10108_v58 = vld [vmem:[%s12773_s0 + $0x7f4] ss:$36 sps:$4 sm:$0xff]  }
 0x274   :  { %4641 = vmatpush1.bf16.msra.mxu0 %v10087_v3  ;;  %6406 = vmatpush1.bf16.msra.mxu1 %v10090_v5  ;;  %v10132_v3 = vld [vmem:[%s12773_s0 + $0x18] ss:$36 sps:$4 sm:$0xff]  }
 0x275   :  { %4642 = vmatprep.subr.bf16.mxu0 %v10101_v12  ;;  %6407 = vmatprep.subr.bf16.mxu1 %v10104_v14  ;;  %v10138_v5 = vld [vmem:[%s12772_s1 + $0x808] ss:$16 sps:$4 sm:$0xff]   ;;  %v10176_v12 = vld [vmem:[%s12772_s1 + $0x84c] ss:$16 sps:$4 sm:$0xff]  }
 0x276   :  { %v10144_v14 = vld [vmem:[%s12773_s0 + $0xac] ss:$36 sps:$4 sm:$0xff]  }
 0x278   :  { %4643 = vmatpush1.bf16.msra.mxu0 %v10099_v11  ;;  %6408 = vmatpush1.bf16.msra.mxu1 %v10102_v13  ;;  %v10173_v11 = vld [vmem:[%s12772_s1 + $0x844] ss:$16 sps:$4 sm:$0xff]  }
 0x279   :  { %4644 = vmatprep.subr.bf16.mxu0 %v10113_v20  ;;  %6409 = vmatprep.subr.bf16.mxu1 %v10116_v22  ;;  %v10143_v13 = vld [vmem:[%s12773_s0 + $0x60] ss:$36 sps:$4 sm:$0xff]   ;;  %v10192_v20 = vld [vmem:[%s12772_s1 + $0x868] ss:$16 sps:$4 sm:$0xff]   ;;  %v10212_v22 = vld [vmem:[%s12772_s1 + $0x88c] ss:$16 sps:$4 sm:$0xff]  }
 0x27a   :  { %4366 = vmatmul.mubr.bf16.gmra.mrb[28].mxu0 %v9987_v63  ;;  %6131 = vmatmul.mubr.bf16.gmra.mrb[28].mxu1 %v9987_v63  ;;  %v10122_v63 = vld [vmem:[%s12773_s0 + $0x880] ss:$36 sps:$4 sm:$0xff]  }
 0x27b   :  { %4375 = vmatprep.mubr.bf16.mxu0 %v9988_v0  ;;  %6140 = vmatprep.mubr.bf16.mxu1 %v9988_v0  ;;  %v10129_v0 = vld [vmem:[%s12773_s0 + $0x8cc] ss:$36 sps:$4 sm:$0xff]  }
 0x27c   :  { %4645 = vmatpush1.bf16.msra.mxu0 %v10111_v19  ;;  %6410 = vmatpush1.bf16.msra.mxu1 %v10114_v21  ;;  %v10189_v19 = vld [vmem:[%s12772_s1 + $0x860] ss:$16 sps:$4 sm:$0xff]   ;;  %v10209_v21 = vld [vmem:[%s12772_s1 + $0x884] ss:$16 sps:$4 sm:$0xff]  }
 0x27d   :  { %4646 = vmatprep.subr.bf16.mxu0 %v10125_v28  ;;  %6411 = vmatprep.subr.bf16.mxu1 %v10128_v30  ;;  %v10150_v28 = vld [vmem:[%s12773_s0 + $0x13c] ss:$36 sps:$4 sm:$0xff]   ;;  %v10159_v30 = vld [vmem:[%s12773_s0 + $0x184] ss:$36 sps:$4 sm:$0xff]  }
 0x280   :  { %4647 = vmatpush1.bf16.msra.mxu0 %v10123_v27  ;;  %6412 = vmatpush1.bf16.msra.mxu1 %v10126_v29  ;;  %v10149_v27 = vld [vmem:[%s12773_s0 + $0xf0] ss:$36 sps:$4 sm:$0xff]   ;;  %v10152_v29 = vld [vmem:[%s12773_s0 + $0x138] ss:$36 sps:$4 sm:$0xff]  }
 0x281   :  { %4969 = vmatprep.subr.bf16.mxu0 %v10137_v35  ;;  %6734 = vmatprep.subr.bf16.mxu1 %v10140_v36  ;;  %v10161_v35 = vld [vmem:[%s12773_s0 + $0x180] ss:$36 sps:$4 sm:$0xff]   ;;  %v10162_v36 = vld [vmem:[%s12773_s0 + $0x1cc] ss:$36 sps:$4 sm:$0xff]  }
 0x282   :  { %4376 = vmatmul.mubr.bf16.gmra.mrb[32].mxu0 %v9990_v1  ;;  %6141 = vmatmul.mubr.bf16.gmra.mrb[32].mxu1 %v9990_v1  ;;  %v10131_v1 = vld [vmem:[%s12773_s0 + $0x8c8] ss:$36 sps:$4 sm:$0xff]  }
 0x283   :  { %4385 = vmatprep.mubr.bf16.mxu0 %v9997_v2  ;;  %6150 = vmatprep.mubr.bf16.mxu1 %v9997_v2  ;;  %v10134_v2 = vld [vmem:[%s12773_s0 + $0x1c] ss:$36 sps:$4 sm:$0xff]  }
 0x28a   :  { %4386 = vmatmul.mubr.bf16.gmra.mrb[36].mxu0 %v9999_v7  ;;  %6151 = vmatmul.mubr.bf16.gmra.mrb[36].mxu1 %v9999_v7  ;;  %v10155_v7 = vld [vmem:[%s12772_s1 + $0x824] ss:$16 sps:$4 sm:$0xff]  }
 0x28b   :  { %4395 = vmatprep.mubr.bf16.mxu0 %v10000_v8  ;;  %6160 = vmatprep.mubr.bf16.mxu1 %v10000_v8  ;;  %v10158_v8 = vld [vmem:[%s12772_s1 + $0x82c] ss:$16 sps:$4 sm:$0xff]  }
 0x292   :  { %4396 = vmatmul.mubr.bf16.gmra.mrb[40].mxu0 %v10002_v9  ;;  %6161 = vmatmul.mubr.bf16.gmra.mrb[40].mxu1 %v10002_v9  ;;  %v10153_v9 = vld [vmem:[%s12772_s1 + $0x820] ss:$16 sps:$4 sm:$0xff]  }
 0x293   :  { %4405 = vmatprep.mubr.bf16.mxu0 %v10009_v10  ;;  %6170 = vmatprep.mubr.bf16.mxu1 %v10009_v10  ;;  %v10156_v10 = vld [vmem:[%s12772_s1 + $0x828] ss:$16 sps:$4 sm:$0xff]  }
 0x29a   :  { %4406 = vmatmul.mubr.bf16.gmra.mrb[44].mxu0 %v10011_v15  ;;  %6171 = vmatmul.mubr.bf16.gmra.mrb[44].mxu1 %v10011_v15  ;;  %v10171_v15 = vld [vmem:[%s12772_s1 + $0x840] ss:$16 sps:$4 sm:$0xff]  }
 0x29b   :  { %4415 = vmatprep.mubr.bf16.mxu0 %v10012_v16  ;;  %6180 = vmatprep.mubr.bf16.mxu1 %v10012_v16  ;;  %v10174_v16 = vld [vmem:[%s12772_s1 + $0x848] ss:$16 sps:$4 sm:$0xff]  }
 0x2a2   :  { %4416 = vmatmul.mubr.bf16.gmra.mrb[48].mxu0 %v10014_v17  ;;  %6181 = vmatmul.mubr.bf16.gmra.mrb[48].mxu1 %v10014_v17  ;;  %v10191_v17 = vld [vmem:[%s12772_s1 + $0x864] ss:$16 sps:$4 sm:$0xff]  }
 0x2a3   :  { %4425 = vmatprep.mubr.bf16.mxu0 %v10021_v18  ;;  %6190 = vmatprep.mubr.bf16.mxu1 %v10021_v18  ;;  %v10194_v18 = vld [vmem:[%s12772_s1 + $0x86c] ss:$16 sps:$4 sm:$0xff]  }
 0x2aa   :  { %4426 = vmatmul.mubr.bf16.gmra.mrb[52].mxu0 %v10023_v23  ;;  %6191 = vmatmul.mubr.bf16.gmra.mrb[52].mxu1 %v10023_v23  ;;  %v10146_v23 = vld [vmem:[%s12773_s0 + $0xa8] ss:$36 sps:$4 sm:$0xff]  }
 0x2ab   :  { %4435 = vmatprep.mubr.bf16.mxu0 %v10024_v24  ;;  %6200 = vmatprep.mubr.bf16.mxu1 %v10024_v24  ;;  %v10147_v24 = vld [vmem:[%s12773_s0 + $0xf4] ss:$36 sps:$4 sm:$0xff]  }
 0x2b2   :  { %4436 = vmatmul.mubr.bf16.gmra.mrb[56].mxu0 %v10026_v25  ;;  %6201 = vmatmul.mubr.bf16.gmra.mrb[56].mxu1 %v10026_v25  ;;  %v10207_v25 = vld [vmem:[%s12772_s1 + $0x880] ss:$16 sps:$4 sm:$0xff]  }
 0x2b3   :  { %4445 = vmatprep.mubr.bf16.mxu0 %v10033_v26  ;;  %6210 = vmatprep.mubr.bf16.mxu1 %v10033_v26  ;;  %v10210_v26 = vld [vmem:[%s12772_s1 + $0x888] ss:$16 sps:$4 sm:$0xff]  }
 0x2ba   :  { %4446 = vmatmul.mubr.bf16.gmra.mrb[60].mxu0 %v10035_v31  ;;  %6211 = vmatmul.mubr.bf16.gmra.mrb[60].mxu1 %v10035_v31  ;;  %v10225_v31 = vld [vmem:[%s12772_s1 + $0x8a0] ss:$16 sps:$4 sm:$0xff]  }
 0x2bb   :  { %4455 = vmatprep.mubr.bf16.mxu0 %v10036_v32  ;;  %6220 = vmatprep.mubr.bf16.mxu1 %v10036_v32  ;;  %v10227_v32 = vld [vmem:[%s12772_s1 + $0x8a4] ss:$16 sps:$4 sm:$0xff]  }
 0x2c2   :  { %4456 = vmatmul.mubr.bf16.gmra.mrb[64].mxu0 %v10038_v33  ;;  %6221 = vmatmul.mubr.bf16.gmra.mrb[64].mxu1 %v10038_v33  ;;  %v10228_v33 = vld [vmem:[%s12772_s1 + $0x8a8] ss:$16 sps:$4 sm:$0xff]  }
 0x2c3   :  { %4465 = vmatprep.mubr.bf16.mxu0 %v10045_v34  ;;  %6230 = vmatprep.mubr.bf16.mxu1 %v10045_v34  ;;  %v10230_v34 = vld [vmem:[%s12772_s1 + $0x8ac] ss:$16 sps:$4 sm:$0xff]  }
 0x2ca   :  { %4466 = vmatmul.mubr.bf16.gmra.mrb[68].mxu0 %v10047_v37  ;;  %6231 = vmatmul.mubr.bf16.gmra.mrb[68].mxu1 %v10047_v37  ;;  %v10164_v37 = vld [vmem:[%s12773_s0 + $0x1c8] ss:$36 sps:$4 sm:$0xff]  }
 0x2cb   :  { %4475 = vmatprep.mubr.bf16.mxu0 %v10048_v38  ;;  %6240 = vmatprep.mubr.bf16.mxu1 %v10048_v38  ;;  %v10165_v38 = vld [vmem:[%s12773_s0 + $0x214] ss:$36 sps:$4 sm:$0xff]  }
 0x2d2   :  { %4476 = vmatmul.mubr.bf16.gmra.mrb[72].mxu0 %v10050_v39  ;;  %6241 = vmatmul.mubr.bf16.gmra.mrb[72].mxu1 %v10050_v39  ;;  %v10167_v39 = vld [vmem:[%s12773_s0 + $0x210] ss:$36 sps:$4 sm:$0xff]  }
 0x2d3   :  { %4485 = vmatprep.mubr.bf16.mxu0 %v10057_v40  ;;  %6250 = vmatprep.mubr.bf16.mxu1 %v10057_v40  ;;  %v10168_v40 = vld [vmem:[%s12773_s0 + $0x25c] ss:$36 sps:$4 sm:$0xff]  }
 0x2da   :  { %4486 = vmatmul.mubr.bf16.gmra.mrb[76].mxu0 %v10059_v41  ;;  %6251 = vmatmul.mubr.bf16.gmra.mrb[76].mxu1 %v10059_v41  ;;  %v10170_v41 = vld [vmem:[%s12773_s0 + $0x258] ss:$36 sps:$4 sm:$0xff]  }
 0x2db   :  { %4495 = vmatprep.mubr.bf16.mxu0 %v10060_v42  ;;  %6260 = vmatprep.mubr.bf16.mxu1 %v10060_v42  ;;  %v10177_v42 = vld [vmem:[%s12773_s0 + $0x2a4] ss:$36 sps:$4 sm:$0xff]  }
 0x2e2   :  { %4496 = vmatmul.mubr.bf16.gmra.mrb[80].mxu0 %v10062_v43  ;;  %6261 = vmatmul.mubr.bf16.gmra.mrb[80].mxu1 %v10062_v43  ;;  %v10243_v43 = vld [vmem:[%s12772_s1 + $0x8c0] ss:$16 sps:$4 sm:$0xff]  }
 0x2e3   :  { %4505 = vmatprep.mubr.bf16.mxu0 %v10069_v44  ;;  %6270 = vmatprep.mubr.bf16.mxu1 %v10069_v44  ;;  %v10245_v44 = vld [vmem:[%s12772_s1 + $0x8c4] ss:$16 sps:$4 sm:$0xff]  }
 0x2ea   :  { %4506 = vmatmul.mubr.bf16.gmra.mrb[84].mxu0 %v10071_v45  ;;  %6271 = vmatmul.mubr.bf16.gmra.mrb[84].mxu1 %v10071_v45  ;;  %v10246_v45 = vld [vmem:[%s12772_s1 + $0x8c8] ss:$16 sps:$4 sm:$0xff]  }
 0x2eb   :  { %4515 = vmatprep.mubr.bf16.mxu0 %v10072_v46  ;;  %6280 = vmatprep.mubr.bf16.mxu1 %v10072_v46  ;;  %v10248_v46 = vld [vmem:[%s12772_s1 + $0x8cc] ss:$16 sps:$4 sm:$0xff]  }
 0x2f2   :  { %4516 = vmatmul.mubr.bf16.gmra.mrb[88].mxu0 %v10074_v47  ;;  %6281 = vmatmul.mubr.bf16.gmra.mrb[88].mxu1 %v10074_v47  ;;  %v10179_v47 = vld [vmem:[%s12773_s0 + $0x2a0] ss:$36 sps:$4 sm:$0xff]  }
 0x2f3   :  { %4525 = vmatprep.mubr.bf16.mxu0 %v10081_v48  ;;  %6290 = vmatprep.mubr.bf16.mxu1 %v10081_v48  ;;  %v10180_v48 = vld [vmem:[%s12773_s0 + $0x2ec] ss:$36 sps:$4 sm:$0xff]  }
 0x2fa   :  { %4526 = vmatmul.mubr.bf16.gmra.mrb[92].mxu0 %v10083_v49  ;;  %6291 = vmatmul.mubr.bf16.gmra.mrb[92].mxu1 %v10083_v49  ;;  %v10182_v49 = vld [vmem:[%s12773_s0 + $0x2e8] ss:$36 sps:$4 sm:$0xff]  }
 0x2fb   :  { %4535 = vmatprep.mubr.bf16.mxu0 %v10084_v50  ;;  %6300 = vmatprep.mubr.bf16.mxu1 %v10084_v50  ;;  %v10183_v50 = vld [vmem:[%s12773_s0 + $0x334] ss:$36 sps:$4 sm:$0xff]  }
 0x302   :  { %4536 = vmatmul.mubr.bf16.gmra.mrb[96].mxu0 %v10086_v51  ;;  %6301 = vmatmul.mubr.bf16.gmra.mrb[96].mxu1 %v10086_v51  ;;  %v10185_v51 = vld [vmem:[%s12773_s0 + $0x330] ss:$36 sps:$4 sm:$0xff]  }
 0x303   :  { %4545 = vmatprep.mubr.bf16.mxu0 %v10093_v52  ;;  %6310 = vmatprep.mubr.bf16.mxu1 %v10093_v52  ;;  %v10186_v52 = vld [vmem:[%s12773_s0 + $0x37c] ss:$36 sps:$4 sm:$0xff]  }
 0x30a   :  { %4546 = vmatmul.mubr.bf16.gmra.mrb[100].mxu0 %v10095_v53  ;;  %6311 = vmatmul.mubr.bf16.gmra.mrb[100].mxu1 %v10095_v53  ;;  %v10188_v53 = vld [vmem:[%s12773_s0 + $0x378] ss:$36 sps:$4 sm:$0xff]  }
 0x30b   :  { %4555 = vmatprep.mubr.bf16.mxu0 %v10096_v54  ;;  %6320 = vmatprep.mubr.bf16.mxu1 %v10096_v54  ;;  %v10195_v54 = vld [vmem:[%s12773_s0 + $0x3c4] ss:$36 sps:$4 sm:$0xff]  }
 0x312   :  { %4556 = vmatmul.mubr.bf16.gmra.mrb[104].mxu0 %v10098_v55  ;;  %6321 = vmatmul.mubr.bf16.gmra.mrb[104].mxu1 %v10098_v55  ;;  %v10261_v55 = vld [vmem:[%s12772_s1 + $0x8e0] ss:$16 sps:$4 sm:$0xff]  }
 0x313   :  { %4565 = vmatprep.mubr.bf16.mxu0 %v10105_v56  ;;  %6330 = vmatprep.mubr.bf16.mxu1 %v10105_v56  ;;  %v10263_v56 = vld [vmem:[%s12772_s1 + $0x8e4] ss:$16 sps:$4 sm:$0xff]  }
 0x31a   :  { %4566 = vmatmul.mubr.bf16.gmra.mrb[108].mxu0 %v10107_v57  ;;  %6331 = vmatmul.mubr.bf16.gmra.mrb[108].mxu1 %v10107_v57  ;;  %v10264_v57 = vld [vmem:[%s12772_s1 + $0x8e8] ss:$16 sps:$4 sm:$0xff]  }
 0x31b   :  { %4575 = vmatprep.mubr.bf16.mxu0 %v10108_v58  ;;  %6340 = vmatprep.mubr.bf16.mxu1 %v10108_v58  ;;  %v10266_v58 = vld [vmem:[%s12772_s1 + $0x8ec] ss:$16 sps:$4 sm:$0xff]  }
 0x322   :  { %4576 = vmatmul.mubr.bf16.gmra.mrb[112].mxu0 %v10110_v59  ;;  %6341 = vmatmul.mubr.bf16.gmra.mrb[112].mxu1 %v10110_v59  ;;  %v10197_v59 = vld [vmem:[%s12773_s0 + $0x3c0] ss:$36 sps:$4 sm:$0xff]  }
 0x323   :  { %4585 = vmatprep.mubr.bf16.mxu0 %v10117_v60  ;;  %6350 = vmatprep.mubr.bf16.mxu1 %v10117_v60  ;;  %v10198_v60 = vld [vmem:[%s12773_s0 + $0x40c] ss:$36 sps:$4 sm:$0xff]  }
 0x32a   :  { %4586 = vmatmul.mubr.bf16.gmra.mrb[116].mxu0 %v10119_v61  ;;  %6351 = vmatmul.mubr.bf16.gmra.mrb[116].mxu1 %v10119_v61  ;;  %v10200_v61 = vld [vmem:[%s12773_s0 + $0x408] ss:$36 sps:$4 sm:$0xff]  }
 0x32b   :  { %4595 = vmatprep.mubr.bf16.mxu0 %v10120_v62  ;;  %6360 = vmatprep.mubr.bf16.mxu1 %v10120_v62  ;;  %v10201_v62 = vld [vmem:[%s12773_s0 + $0x454] ss:$36 sps:$4 sm:$0xff]  }
 0x332   :  { %4596 = vmatmul.mubr.bf16.gmra.mrb[120].mxu0 %v10122_v63  ;;  %6361 = vmatmul.mubr.bf16.gmra.mrb[120].mxu1 %v10122_v63  ;;  %v10203_v63 = vld [vmem:[%s12773_s0 + $0x450] ss:$36 sps:$4 sm:$0xff]  }
 0x333   :  { %4605 = vmatprep.mubr.bf16.mxu0 %v10129_v0  ;;  %6370 = vmatprep.mubr.bf16.mxu1 %v10129_v0  ;;  %v10204_v0 = vld [vmem:[%s12773_s0 + $0x49c] ss:$36 sps:$4 sm:$0xff]  }
 0x33a   :  { %4606 = vmatmul.mubr.bf16.gmra.mrb[124].mxu0 %v10131_v1  ;;  %6371 = vmatmul.mubr.bf16.gmra.mrb[124].mxu1 %v10131_v1  ;;  %v10206_v1 = vld [vmem:[%s12773_s0 + $0x498] ss:$36 sps:$4 sm:$0xff]  }
 0x33b   :  { %4648 = vmatprep.mubr.bf16.mxu0 %v10134_v2  ;;  %6413 = vmatprep.mubr.bf16.mxu1 %v10134_v2  ;;  %v10213_v2 = vld [vmem:[%s12773_s0 + $0x4e4] ss:$36 sps:$4 sm:$0xff]  }
 0x342   :  { %4649 = vmatmul.mubr.bf16.vlgmr.msra.gmra.mrb[0].mxu0 %v10132_v3  ;;  %6414 = vmatmul.mubr.bf16.vlgmr.msra.gmra.mrb[0].mxu1 %v10132_v3  ;;  %v10215_v3 = vld [vmem:[%s12773_s0 + $0x4e0] ss:$36 sps:$4 sm:$0xff]  }
 0x343   :  { %4970 = vmatpush1.bf16.msra.mxu0 %v10135_v4  ;;  %6735 = vmatpush1.bf16.msra.mxu1 %v10138_v5  ;;  %v10216_v4 = vld [vmem:[%s12773_s0 + $0x52c] ss:$36 sps:$4 sm:$0xff]  }
 0x344   :  { %4658 = vmatprep.mubr.bf16.mxu0 %v10141_v6  ;;  %6423 = vmatprep.mubr.bf16.mxu1 %v10141_v6  ;;  %v10218_v5 = vld [vmem:[%s12773_s0 + $0x528] ss:$36 sps:$4 sm:$0xff]   ;;  %v10219_v6 = vld [vmem:[%s12773_s0 + $0x574] ss:$36 sps:$4 sm:$0xff]  }
 0x345   :  { %4971 = vmatprep.subr.bf16.mxu0 %v10155_v7  ;;  %6736 = vmatprep.subr.bf16.mxu1 %v10158_v8  ;;  %v10221_v7 = vld [vmem:[%s12773_s0 + $0x570] ss:$36 sps:$4 sm:$0xff]   ;;  %v10222_v8 = vld [vmem:[%s12773_s0 + $0x5bc] ss:$36 sps:$4 sm:$0xff]  }
 0x347   :  { %4972 = vmatpush1.bf16.msra.mxu0 %v10153_v9  ;;  %6737 = vmatpush1.bf16.msra.mxu1 %v10156_v10  ;;  %v10224_v9 = vld [vmem:[%s12773_s0 + $0x5b8] ss:$36 sps:$4 sm:$0xff]   ;;  %v10231_v10 = vld [vmem:[%s12773_s0 + $0x604] ss:$36 sps:$4 sm:$0xff]  }
 0x348   :  { %4973 = vmatprep.subr.bf16.mxu0 %v10173_v11  ;;  %6738 = vmatprep.subr.bf16.mxu1 %v10176_v12  ;;  %v10233_v11 = vld [vmem:[%s12773_s0 + $0x600] ss:$36 sps:$4 sm:$0xff]   ;;  %v10234_v12 = vld [vmem:[%s12773_s0 + $0x64c] ss:$36 sps:$4 sm:$0xff]  }
 0x34a   :  { %4659 = vmatmul.mubr.bf16.gmra.mrb[4].mxu0 %v10143_v13  ;;  %6424 = vmatmul.mubr.bf16.gmra.mrb[4].mxu1 %v10143_v13  ;;  %v10236_v13 = vld [vmem:[%s12773_s0 + $0x648] ss:$36 sps:$4 sm:$0xff]  }
 0x34b   :  { %4668 = vmatprep.mubr.bf16.mxu0 %v10144_v14  ;;  %6433 = vmatprep.mubr.bf16.mxu1 %v10144_v14  ;;  %v10237_v14 = vld [vmem:[%s12773_s0 + $0x694] ss:$36 sps:$4 sm:$0xff]  }
 0x34c   :  { %4974 = vmatpush1.bf16.msra.mxu0 %v10171_v15  ;;  %6739 = vmatpush1.bf16.msra.mxu1 %v10174_v16  ;;  %v10239_v15 = vld [vmem:[%s12773_s0 + $0x690] ss:$36 sps:$4 sm:$0xff]   ;;  %v10240_v16 = vld [vmem:[%s12773_s0 + $0x6dc] ss:$36 sps:$4 sm:$0xff]  }
 0x34d   :  { %4975 = vmatprep.subr.bf16.mxu0 %v10191_v17  ;;  %6740 = vmatprep.subr.bf16.mxu1 %v10194_v18  ;;  %v10242_v17 = vld [vmem:[%s12773_s0 + $0x6d8] ss:$36 sps:$4 sm:$0xff]   ;;  %v10249_v18 = vld [vmem:[%s12773_s0 + $0x724] ss:$36 sps:$4 sm:$0xff]  }
 0x350   :  { %4976 = vmatpush1.bf16.msra.mxu0 %v10189_v19  ;;  %6741 = vmatpush1.bf16.msra.mxu1 %v10192_v20  ;;  %v10251_v19 = vld [vmem:[%s12773_s0 + $0x720] ss:$36 sps:$4 sm:$0xff]   ;;  %v10252_v20 = vld [vmem:[%s12773_s0 + $0x76c] ss:$36 sps:$4 sm:$0xff]  }
 0x351   :  { %4977 = vmatprep.subr.bf16.mxu0 %v10209_v21  ;;  %6742 = vmatprep.subr.bf16.mxu1 %v10212_v22  ;;  %v10254_v21 = vld [vmem:[%s12773_s0 + $0x768] ss:$36 sps:$4 sm:$0xff]   ;;  %v10255_v22 = vld [vmem:[%s12773_s0 + $0x7b4] ss:$36 sps:$4 sm:$0xff]  }
 0x352   :  { %4669 = vmatmul.mubr.bf16.gmra.mrb[8].mxu0 %v10146_v23  ;;  %6434 = vmatmul.mubr.bf16.gmra.mrb[8].mxu1 %v10146_v23  ;;  %v10257_v23 = vld [vmem:[%s12773_s0 + $0x7b0] ss:$36 sps:$4 sm:$0xff]  }
 0x353   :  { %4678 = vmatprep.mubr.bf16.mxu0 %v10147_v24  ;;  %6443 = vmatprep.mubr.bf16.mxu1 %v10147_v24  ;;  %v10258_v24 = vld [vmem:[%s12773_s0 + $0x7fc] ss:$36 sps:$4 sm:$0xff]  }
 0x354   :  { %4978 = vmatpush1.bf16.msra.mxu0 %v10207_v25  ;;  %6743 = vmatpush1.bf16.msra.mxu1 %v10210_v26  ;;  %v10260_v25 = vld [vmem:[%s12773_s0 + $0x7f8] ss:$36 sps:$4 sm:$0xff]   ;;  %v10267_v26 = vld [vmem:[%s12773_s0 + $0x844] ss:$36 sps:$4 sm:$0xff]  }
 0x355   :  { %4979 = vmatprep.subr.bf16.mxu0 %v10227_v32  ;;  %6744 = vmatprep.subr.bf16.mxu1 %v10230_v34  ;;  %v10308_v32 = vmov 0   ;;  %v10277_v34 = vld [vmem:[%s12773_s0 + $0x68] ss:$36 sps:$4 sm:$0xff]  }
 0x358   :  { %4980 = vmatpush1.bf16.msra.mxu0 %v10225_v31  ;;  %6745 = vmatpush1.bf16.msra.mxu1 %v10228_v33  ;;  %v10275_v31 = vld [vmem:[%s12773_s0 + $0x8d0] ss:$36 sps:$4 sm:$0xff]   ;;  %v10276_v33 = vld [vmem:[%s12773_s0 + $0x20] ss:$36 sps:$4 sm:$0xff]  }
 0x359   :  { %4981 = vmatprep.subr.bf16.mxu0 %v10245_v44  ;;  %6746 = vmatprep.subr.bf16.mxu1 %v10248_v46  ;;  %v10287_v44 = vld [vmem:[%s12773_s0 + $0x338] ss:$36 sps:$4 sm:$0xff]   ;;  %v10289_v46 = vld [vmem:[%s12773_s0 + $0x3c8] ss:$36 sps:$4 sm:$0xff]  }
 0x35a   :  { %4679 = vmatmul.mubr.bf16.gmra.mrb[12].mxu0 %v10149_v27  ;;  %6444 = vmatmul.mubr.bf16.gmra.mrb[12].mxu1 %v10149_v27  ;;  %v10269_v27 = vld [vmem:[%s12773_s0 + $0x840] ss:$36 sps:$4 sm:$0xff]  }
 0x35b   :  { %4688 = vmatprep.mubr.bf16.mxu0 %v10150_v28  ;;  %6453 = vmatprep.mubr.bf16.mxu1 %v10150_v28  ;;  %v10270_v28 = vld [vmem:[%s12773_s0 + $0x88c] ss:$36 sps:$4 sm:$0xff]  }
 0x35c   :  { %4982 = vmatpush1.bf16.msra.mxu0 %v10243_v43  ;;  %6747 = vmatpush1.bf16.msra.mxu1 %v10246_v45  ;;  %v10286_v43 = vld [vmem:[%s12773_s0 + $0x2f0] ss:$36 sps:$4 sm:$0xff]   ;;  %v10288_v45 = vld [vmem:[%s12773_s0 + $0x380] ss:$36 sps:$4 sm:$0xff]  }
 0x35d   :  { %4983 = vmatprep.subr.bf16.mxu0 %v10263_v56  ;;  %6748 = vmatprep.subr.bf16.mxu1 %v10266_v58  ;;  %v10299_v56 = vld [vmem:[%s12773_s0 + $0x698] ss:$36 sps:$4 sm:$0xff]   ;;  %v10301_v58 = vld [vmem:[%s12773_s0 + $0x728] ss:$36 sps:$4 sm:$0xff]  }
 0x360   :  { %4984 = vmatpush1.bf16.msra.mxu0 %v10261_v55  ;;  %6749 = vmatpush1.bf16.msra.mxu1 %v10264_v57  ;;  %v10298_v55 = vld [vmem:[%s12773_s0 + $0x650] ss:$36 sps:$4 sm:$0xff]   ;;  %v10300_v57 = vld [vmem:[%s12773_s0 + $0x6e0] ss:$36 sps:$4 sm:$0xff]  }
 0x362   :  { %4689 = vmatmul.mubr.bf16.gmra.mrb[16].mxu0 %v10152_v29  ;;  %6454 = vmatmul.mubr.bf16.gmra.mrb[16].mxu1 %v10152_v29  ;;  %v10272_v29 = vld [vmem:[%s12773_s0 + $0x888] ss:$36 sps:$4 sm:$0xff]  }
 0x363   :  { %4698 = vmatprep.mubr.bf16.mxu0 %v10159_v30  ;;  %6463 = vmatprep.mubr.bf16.mxu1 %v10159_v30  ;;  %v10273_v30 = vld [vmem:[%s12773_s0 + $0x8d4] ss:$36 sps:$4 sm:$0xff]  }
 0x36a   :  { %4699 = vmatmul.mubr.bf16.gmra.mrb[20].mxu0 %v10161_v35  ;;  %6464 = vmatmul.mubr.bf16.gmra.mrb[20].mxu1 %v10161_v35  ;;  %v10278_v35 = vld [vmem:[%s12773_s0 + $0xb0] ss:$36 sps:$4 sm:$0xff]  }
 0x36b   :  { %4708 = vmatprep.mubr.bf16.mxu0 %v10162_v36  ;;  %6473 = vmatprep.mubr.bf16.mxu1 %v10162_v36  ;;  %v10279_v36 = vld [vmem:[%s12773_s0 + $0xf8] ss:$36 sps:$4 sm:$0xff]  }
 0x372   :  { %4709 = vmatmul.mubr.bf16.gmra.mrb[24].mxu0 %v10164_v37  ;;  %6474 = vmatmul.mubr.bf16.gmra.mrb[24].mxu1 %v10164_v37  ;;  %v10280_v37 = vld [vmem:[%s12773_s0 + $0x140] ss:$36 sps:$4 sm:$0xff]  }
 0x373   :  { %4718 = vmatprep.mubr.bf16.mxu0 %v10165_v38  ;;  %6483 = vmatprep.mubr.bf16.mxu1 %v10165_v38  ;;  %v10281_v38 = vld [vmem:[%s12773_s0 + $0x188] ss:$36 sps:$4 sm:$0xff]  }
 0x37a   :  { %4719 = vmatmul.mubr.bf16.gmra.mrb[28].mxu0 %v10167_v39  ;;  %6484 = vmatmul.mubr.bf16.gmra.mrb[28].mxu1 %v10167_v39  ;;  %v10282_v39 = vld [vmem:[%s12773_s0 + $0x1d0] ss:$36 sps:$4 sm:$0xff]  }
 0x37b   :  { %4728 = vmatprep.mubr.bf16.mxu0 %v10168_v40  ;;  %6493 = vmatprep.mubr.bf16.mxu1 %v10168_v40  ;;  %v10283_v40 = vld [vmem:[%s12773_s0 + $0x218] ss:$36 sps:$4 sm:$0xff]  }
 0x382   :  { %4729 = vmatmul.mubr.bf16.gmra.mrb[32].mxu0 %v10170_v41  ;;  %6494 = vmatmul.mubr.bf16.gmra.mrb[32].mxu1 %v10170_v41  ;;  %v10284_v41 = vld [vmem:[%s12773_s0 + $0x260] ss:$36 sps:$4 sm:$0xff]  }
 0x383   :  { %4738 = vmatprep.mubr.bf16.mxu0 %v10177_v42  ;;  %6503 = vmatprep.mubr.bf16.mxu1 %v10177_v42  ;;  %v10285_v42 = vld [vmem:[%s12773_s0 + $0x2a8] ss:$36 sps:$4 sm:$0xff]  }
 0x38a   :  { %4739 = vmatmul.mubr.bf16.gmra.mrb[36].mxu0 %v10179_v47  ;;  %6504 = vmatmul.mubr.bf16.gmra.mrb[36].mxu1 %v10179_v47  ;;  %v10290_v47 = vld [vmem:[%s12773_s0 + $0x410] ss:$36 sps:$4 sm:$0xff]  }
 0x38b   :  { %4748 = vmatprep.mubr.bf16.mxu0 %v10180_v48  ;;  %6513 = vmatprep.mubr.bf16.mxu1 %v10180_v48  ;;  %v10291_v48 = vld [vmem:[%s12773_s0 + $0x458] ss:$36 sps:$4 sm:$0xff]  }
 0x392   :  { %4749 = vmatmul.mubr.bf16.gmra.mrb[40].mxu0 %v10182_v49  ;;  %6514 = vmatmul.mubr.bf16.gmra.mrb[40].mxu1 %v10182_v49  ;;  %v10292_v49 = vld [vmem:[%s12773_s0 + $0x4a0] ss:$36 sps:$4 sm:$0xff]  }
 0x393   :  { %4758 = vmatprep.mubr.bf16.mxu0 %v10183_v50  ;;  %6523 = vmatprep.mubr.bf16.mxu1 %v10183_v50  ;;  %v10293_v50 = vld [vmem:[%s12773_s0 + $0x4e8] ss:$36 sps:$4 sm:$0xff]  }
 0x39a   :  { %4759 = vmatmul.mubr.bf16.gmra.mrb[44].mxu0 %v10185_v51  ;;  %6524 = vmatmul.mubr.bf16.gmra.mrb[44].mxu1 %v10185_v51  ;;  %v10294_v51 = vld [vmem:[%s12773_s0 + $0x530] ss:$36 sps:$4 sm:$0xff]  }
 0x39b   :  { %4768 = vmatprep.mubr.bf16.mxu0 %v10186_v52  ;;  %6533 = vmatprep.mubr.bf16.mxu1 %v10186_v52  ;;  %v10295_v52 = vld [vmem:[%s12773_s0 + $0x578] ss:$36 sps:$4 sm:$0xff]  }
 0x3a2   :  { %4769 = vmatmul.mubr.bf16.gmra.mrb[48].mxu0 %v10188_v53  ;;  %6534 = vmatmul.mubr.bf16.gmra.mrb[48].mxu1 %v10188_v53  ;;  %v10296_v53 = vld [vmem:[%s12773_s0 + $0x5c0] ss:$36 sps:$4 sm:$0xff]  }
 0x3a3   :  { %4778 = vmatprep.mubr.bf16.mxu0 %v10195_v54  ;;  %6543 = vmatprep.mubr.bf16.mxu1 %v10195_v54  ;;  %v10297_v54 = vld [vmem:[%s12773_s0 + $0x608] ss:$36 sps:$4 sm:$0xff]  }
 0x3aa   :  { %4779 = vmatmul.mubr.bf16.gmra.mrb[52].mxu0 %v10197_v59  ;;  %6544 = vmatmul.mubr.bf16.gmra.mrb[52].mxu1 %v10197_v59  ;;  %v625_v59 = vlaneseq }
 0x3ab   :  { %4788 = vmatprep.mubr.bf16.mxu0 %v10198_v60  ;;  %6553 = vmatprep.mubr.bf16.mxu1 %v10198_v60 }
 0x3ac   :  { %v626_v60 = vshrl.u32 %v625_v59, 7 }
 0x3b2   :  { %4789 = vmatmul.mubr.bf16.gmra.mrb[56].mxu0 %v10200_v61  ;;  %6554 = vmatmul.mubr.bf16.gmra.mrb[56].mxu1 %v10200_v61  ;;  %v10302_v61 = vld [vmem:[%s12773_s0 + $0x770] ss:$36 sps:$4 sm:$0xff]  }
 0x3b3   :  { %4798 = vmatprep.mubr.bf16.mxu0 %v10201_v62  ;;  %6563 = vmatprep.mubr.bf16.mxu1 %v10201_v62  ;;  %v627_v62 = vsub.s32 0, %v626_v60 }
 0x3ba   :  { %4799 = vmatmul.mubr.bf16.gmra.mrb[60].mxu0 %v10203_v63  ;;  %6564 = vmatmul.mubr.bf16.gmra.mrb[60].mxu1 %v10203_v63  ;;  %v635_v63 = vsub.s32 2, %v626_v60 }
 0x3bb   :  { %4808 = vmatprep.mubr.bf16.mxu0 %v10204_v0  ;;  %6573 = vmatprep.mubr.bf16.mxu1 %v10204_v0  ;;  %v623_v0 = vld [vmem:[%s12774_s2] sm:$0xf] }
 0x3c2   :  { %4809 = vmatmul.mubr.bf16.gmra.mrb[64].mxu0 %v10206_v1  ;;  %6574 = vmatmul.mubr.bf16.gmra.mrb[64].mxu1 %v10206_v1  ;;  %v631_v1 = vsub.s32 1, %v626_v60 }
 0x3c3   :  { %4818 = vmatprep.mubr.bf16.mxu0 %v10213_v2  ;;  %6583 = vmatprep.mubr.bf16.mxu1 %v10213_v2  ;;  %v639_v2 = vsub.s32 3, %v626_v60 }
 0x3ca   :  { %4819 = vmatmul.mubr.bf16.gmra.mrb[68].mxu0 %v10215_v3  ;;  %6584 = vmatmul.mubr.bf16.gmra.mrb[68].mxu1 %v10215_v3  ;;  %v12099_v3 = vrot.slane %v623_v0, %v627_v62 }
 0x3cb   :  { %4828 = vmatprep.mubr.bf16.mxu0 %v10216_v4  ;;  %6593 = vmatprep.mubr.bf16.mxu1 %v10216_v4  ;;  %v12101_v4 = vrot.slane %v623_v0, %v635_v63 }
 0x3d2   :  { %4829 = vmatmul.mubr.bf16.gmra.mrb[72].mxu0 %v10218_v5  ;;  %6594 = vmatmul.mubr.bf16.gmra.mrb[72].mxu1 %v10218_v5  ;;  %v12103_v5 = vrot.slane %v623_v0, %v631_v1 }
 0x3d3   :  { %4838 = vmatprep.mubr.bf16.mxu0 %v10219_v6  ;;  %6603 = vmatprep.mubr.bf16.mxu1 %v10219_v6  ;;  %v12105_v6 = vrot.slane %v623_v0, %v639_v2 }
 0x3da   :  { %4839 = vmatmul.mubr.bf16.gmra.mrb[76].mxu0 %v10221_v7  ;;  %6604 = vmatmul.mubr.bf16.gmra.mrb[76].mxu1 %v10221_v7 }
 0x3db   :  { %4848 = vmatprep.mubr.bf16.mxu0 %v10222_v8  ;;  %6613 = vmatprep.mubr.bf16.mxu1 %v10222_v8 }
 0x3e2   :  { %4849 = vmatmul.mubr.bf16.gmra.mrb[80].mxu0 %v10224_v9  ;;  %6614 = vmatmul.mubr.bf16.gmra.mrb[80].mxu1 %v10224_v9 }
 0x3e3   :  { %4858 = vmatprep.mubr.bf16.mxu0 %v10231_v10  ;;  %6623 = vmatprep.mubr.bf16.mxu1 %v10231_v10 }
 0x3ea   :  { %4859 = vmatmul.mubr.bf16.gmra.mrb[84].mxu0 %v10233_v11  ;;  %6624 = vmatmul.mubr.bf16.gmra.mrb[84].mxu1 %v10233_v11 }
 0x3eb   :  { %4868 = vmatprep.mubr.bf16.mxu0 %v10234_v12  ;;  %6633 = vmatprep.mubr.bf16.mxu1 %v10234_v12 }
 0x3f2   :  { %4869 = vmatmul.mubr.bf16.gmra.mrb[88].mxu0 %v10236_v13  ;;  %6634 = vmatmul.mubr.bf16.gmra.mrb[88].mxu1 %v10236_v13  ;;  %v10303_v13 = vld [vmem:[%s12773_s0 + $0x7b8] ss:$36 sps:$4 sm:$0xff]  }
 0x3f3   :  { %4878 = vmatprep.mubr.bf16.mxu0 %v10237_v14  ;;  %6643 = vmatprep.mubr.bf16.mxu1 %v10237_v14 }
 0x3fa   :  { %4879 = vmatmul.mubr.bf16.gmra.mrb[92].mxu0 %v10239_v15  ;;  %6644 = vmatmul.mubr.bf16.gmra.mrb[92].mxu1 %v10239_v15 }
 0x3fb   :  { %4888 = vmatprep.mubr.bf16.mxu0 %v10240_v16  ;;  %6653 = vmatprep.mubr.bf16.mxu1 %v10240_v16 }
 0x402   :  { %4889 = vmatmul.mubr.bf16.gmra.mrb[96].mxu0 %v10242_v17  ;;  %6654 = vmatmul.mubr.bf16.gmra.mrb[96].mxu1 %v10242_v17 }
 0x403   :  { %4898 = vmatprep.mubr.bf16.mxu0 %v10249_v18  ;;  %6663 = vmatprep.mubr.bf16.mxu1 %v10249_v18 }
 0x40a   :  { %4899 = vmatmul.mubr.bf16.gmra.mrb[100].mxu0 %v10251_v19  ;;  %6664 = vmatmul.mubr.bf16.gmra.mrb[100].mxu1 %v10251_v19 }
 0x40b   :  { %4908 = vmatprep.mubr.bf16.mxu0 %v10252_v20  ;;  %6673 = vmatprep.mubr.bf16.mxu1 %v10252_v20 }
 0x412   :  { %4909 = vmatmul.mubr.bf16.gmra.mrb[104].mxu0 %v10254_v21  ;;  %6674 = vmatmul.mubr.bf16.gmra.mrb[104].mxu1 %v10254_v21 }
 0x413   :  { %4918 = vmatprep.mubr.bf16.mxu0 %v10255_v22  ;;  %6683 = vmatprep.mubr.bf16.mxu1 %v10255_v22 }
 0x41a   :  { %4919 = vmatmul.mubr.bf16.gmra.mrb[108].mxu0 %v10257_v23  ;;  %6684 = vmatmul.mubr.bf16.gmra.mrb[108].mxu1 %v10257_v23 }
 0x41b   :  { %4928 = vmatprep.mubr.bf16.mxu0 %v10258_v24  ;;  %6693 = vmatprep.mubr.bf16.mxu1 %v10258_v24 }
 0x422   :  { %4929 = vmatmul.mubr.bf16.gmra.mrb[112].mxu0 %v10260_v25  ;;  %6694 = vmatmul.mubr.bf16.gmra.mrb[112].mxu1 %v10260_v25 }
 0x423   :  { %4938 = vmatprep.mubr.bf16.mxu0 %v10267_v26  ;;  %6703 = vmatprep.mubr.bf16.mxu1 %v10267_v26 }
 0x42a   :  { %4939 = vmatmul.mubr.bf16.gmra.mrb[116].mxu0 %v10269_v27  ;;  %6704 = vmatmul.mubr.bf16.gmra.mrb[116].mxu1 %v10269_v27 }
 0x42b   :  { %4948 = vmatprep.mubr.bf16.mxu0 %v10270_v28  ;;  %6713 = vmatprep.mubr.bf16.mxu1 %v10270_v28 }
 0x432   :  { %4949 = vmatmul.mubr.bf16.gmra.mrb[120].mxu0 %v10272_v29  ;;  %6714 = vmatmul.mubr.bf16.gmra.mrb[120].mxu1 %v10272_v29 }
 0x433   :  { %4958 = vmatprep.mubr.bf16.mxu0 %v10273_v30  ;;  %6723 = vmatprep.mubr.bf16.mxu1 %v10273_v30 }
 0x43a   :  { %4959 = vmatmul.mubr.bf16.gmra.mrb[124].mxu0 %v10275_v31  ;;  %6724 = vmatmul.mubr.bf16.gmra.mrb[124].mxu1 %v10275_v31 }
 0x43b   :  { %5001 = vmatprep.mubr.bf16.mxu0 %v10308_v32  ;;  %6766 = vmatprep.mubr.bf16.mxu1 %v10308_v32 }
 0x442   :  { %5002 = vmatmul.mubr.bf16.vlgmr.msra.gmra.mrb[0].mxu0 %v10276_v33  ;;  %6767 = vmatmul.mubr.bf16.vlgmr.msra.gmra.mrb[0].mxu1 %v10276_v33 }
 0x443   :  { %5011 = vmatprep.mubr.bf16.mxu0 %v10308_v32  ;;  %6776 = vmatprep.mubr.bf16.mxu1 %v10308_v32 }
 0x44a   :  { %5012 = vmatmul.mubr.bf16.gmra.mrb[4].mxu0 %v10277_v34  ;;  %6777 = vmatmul.mubr.bf16.gmra.mrb[4].mxu1 %v10277_v34 }
 0x44b   :  { %5021 = vmatprep.mubr.bf16.mxu0 %v10308_v32  ;;  %6786 = vmatprep.mubr.bf16.mxu1 %v10308_v32 }
 0x452   :  { %5022 = vmatmul.mubr.bf16.gmra.mrb[8].mxu0 %v10278_v35  ;;  %6787 = vmatmul.mubr.bf16.gmra.mrb[8].mxu1 %v10278_v35 }
 0x453   :  { %5031 = vmatprep.mubr.bf16.mxu0 %v10308_v32  ;;  %6796 = vmatprep.mubr.bf16.mxu1 %v10308_v32 }
 0x45a   :  { %5032 = vmatmul.mubr.bf16.gmra.mrb[12].mxu0 %v10279_v36  ;;  %6797 = vmatmul.mubr.bf16.gmra.mrb[12].mxu1 %v10279_v36 }
 0x45b   :  { %5041 = vmatprep.mubr.bf16.mxu0 %v10308_v32  ;;  %6806 = vmatprep.mubr.bf16.mxu1 %v10308_v32 }
 0x462   :  { %5042 = vmatmul.mubr.bf16.gmra.mrb[16].mxu0 %v10280_v37  ;;  %6807 = vmatmul.mubr.bf16.gmra.mrb[16].mxu1 %v10280_v37 }
 0x463   :  { %5051 = vmatprep.mubr.bf16.mxu0 %v10308_v32  ;;  %6816 = vmatprep.mubr.bf16.mxu1 %v10308_v32 }
 0x46a   :  { %5052 = vmatmul.mubr.bf16.gmra.mrb[20].mxu0 %v10281_v38  ;;  %6817 = vmatmul.mubr.bf16.gmra.mrb[20].mxu1 %v10281_v38 }
 0x46b   :  { %5061 = vmatprep.mubr.bf16.mxu0 %v10308_v32  ;;  %6826 = vmatprep.mubr.bf16.mxu1 %v10308_v32 }
 0x472   :  { %5062 = vmatmul.mubr.bf16.gmra.mrb[24].mxu0 %v10282_v39  ;;  %6827 = vmatmul.mubr.bf16.gmra.mrb[24].mxu1 %v10282_v39 }
 0x473   :  { %5071 = vmatprep.mubr.bf16.mxu0 %v10308_v32  ;;  %6836 = vmatprep.mubr.bf16.mxu1 %v10308_v32 }
 0x47a   :  { %5072 = vmatmul.mubr.bf16.gmra.mrb[28].mxu0 %v10283_v40  ;;  %6837 = vmatmul.mubr.bf16.gmra.mrb[28].mxu1 %v10283_v40 }
 0x47b   :  { %5081 = vmatprep.mubr.bf16.mxu0 %v10308_v32  ;;  %6846 = vmatprep.mubr.bf16.mxu1 %v10308_v32 }
 0x482   :  { %5082 = vmatmul.mubr.bf16.gmra.mrb[32].mxu0 %v10284_v41  ;;  %6847 = vmatmul.mubr.bf16.gmra.mrb[32].mxu1 %v10284_v41 }
 0x483   :  { %5091 = vmatprep.mubr.bf16.mxu0 %v10308_v32  ;;  %6856 = vmatprep.mubr.bf16.mxu1 %v10308_v32 }
 0x48a   :  { %5092 = vmatmul.mubr.bf16.gmra.mrb[36].mxu0 %v10285_v42  ;;  %6857 = vmatmul.mubr.bf16.gmra.mrb[36].mxu1 %v10285_v42 }
 0x48b   :  { %5101 = vmatprep.mubr.bf16.mxu0 %v10308_v32  ;;  %6866 = vmatprep.mubr.bf16.mxu1 %v10308_v32 }
 0x492   :  { %5102 = vmatmul.mubr.bf16.gmra.mrb[40].mxu0 %v10286_v43  ;;  %6867 = vmatmul.mubr.bf16.gmra.mrb[40].mxu1 %v10286_v43  ;;  %v10304_v43 = vld [vmem:[%s12773_s0 + $0x800] ss:$36 sps:$4 sm:$0xff]  }
 0x493   :  { %5111 = vmatprep.mubr.bf16.mxu0 %v10308_v32  ;;  %6876 = vmatprep.mubr.bf16.mxu1 %v10308_v32 }
 0x49a   :  { %5112 = vmatmul.mubr.bf16.gmra.mrb[44].mxu0 %v10287_v44  ;;  %6877 = vmatmul.mubr.bf16.gmra.mrb[44].mxu1 %v10287_v44 }
 0x49b   :  { %5121 = vmatprep.mubr.bf16.mxu0 %v10308_v32  ;;  %6886 = vmatprep.mubr.bf16.mxu1 %v10308_v32 }
 0x4a2   :  { %5122 = vmatmul.mubr.bf16.gmra.mrb[48].mxu0 %v10288_v45  ;;  %6887 = vmatmul.mubr.bf16.gmra.mrb[48].mxu1 %v10288_v45 }
 0x4a3   :  { %5131 = vmatprep.mubr.bf16.mxu0 %v10308_v32  ;;  %6896 = vmatprep.mubr.bf16.mxu1 %v10308_v32 }
 0x4aa   :  { %5132 = vmatmul.mubr.bf16.gmra.mrb[52].mxu0 %v10289_v46  ;;  %6897 = vmatmul.mubr.bf16.gmra.mrb[52].mxu1 %v10289_v46 }
 0x4ab   :  { %5141 = vmatprep.mubr.bf16.mxu0 %v10308_v32  ;;  %6906 = vmatprep.mubr.bf16.mxu1 %v10308_v32 }
 0x4b2   :  { %5142 = vmatmul.mubr.bf16.gmra.mrb[56].mxu0 %v10290_v47  ;;  %6907 = vmatmul.mubr.bf16.gmra.mrb[56].mxu1 %v10290_v47 }
 0x4b3   :  { %5151 = vmatprep.mubr.bf16.mxu0 %v10308_v32  ;;  %6916 = vmatprep.mubr.bf16.mxu1 %v10308_v32 }
 0x4ba   :  { %5152 = vmatmul.mubr.bf16.gmra.mrb[60].mxu0 %v10291_v48  ;;  %6917 = vmatmul.mubr.bf16.gmra.mrb[60].mxu1 %v10291_v48 }
 0x4bb   :  { %5161 = vmatprep.mubr.bf16.mxu0 %v10308_v32  ;;  %6926 = vmatprep.mubr.bf16.mxu1 %v10308_v32 }
 0x4c2   :  { %5162 = vmatmul.mubr.bf16.gmra.mrb[64].mxu0 %v10292_v49  ;;  %6927 = vmatmul.mubr.bf16.gmra.mrb[64].mxu1 %v10292_v49 }
 0x4c3   :  { %5171 = vmatprep.mubr.bf16.mxu0 %v10308_v32  ;;  %6936 = vmatprep.mubr.bf16.mxu1 %v10308_v32 }
 0x4ca   :  { %5172 = vmatmul.mubr.bf16.gmra.mrb[68].mxu0 %v10293_v50  ;;  %6937 = vmatmul.mubr.bf16.gmra.mrb[68].mxu1 %v10293_v50 }
 0x4cb   :  { %5181 = vmatprep.mubr.bf16.mxu0 %v10308_v32  ;;  %6946 = vmatprep.mubr.bf16.mxu1 %v10308_v32 }
 0x4d2   :  { %5182 = vmatmul.mubr.bf16.gmra.mrb[72].mxu0 %v10294_v51  ;;  %6947 = vmatmul.mubr.bf16.gmra.mrb[72].mxu1 %v10294_v51 }
 0x4d3   :  { %5191 = vmatprep.mubr.bf16.mxu0 %v10308_v32  ;;  %6956 = vmatprep.mubr.bf16.mxu1 %v10308_v32 }
 0x4da   :  { %5192 = vmatmul.mubr.bf16.gmra.mrb[76].mxu0 %v10295_v52  ;;  %6957 = vmatmul.mubr.bf16.gmra.mrb[76].mxu1 %v10295_v52 }
 0x4db   :  { %5201 = vmatprep.mubr.bf16.mxu0 %v10308_v32  ;;  %6966 = vmatprep.mubr.bf16.mxu1 %v10308_v32 }
 0x4e2   :  { %5202 = vmatmul.mubr.bf16.gmra.mrb[80].mxu0 %v10296_v53  ;;  %6967 = vmatmul.mubr.bf16.gmra.mrb[80].mxu1 %v10296_v53 }
 0x4e3   :  { %5211 = vmatprep.mubr.bf16.mxu0 %v10308_v32  ;;  %6976 = vmatprep.mubr.bf16.mxu1 %v10308_v32 }
 0x4ea   :  { %5212 = vmatmul.mubr.bf16.gmra.mrb[84].mxu0 %v10297_v54  ;;  %6977 = vmatmul.mubr.bf16.gmra.mrb[84].mxu1 %v10297_v54 }
 0x4eb   :  { %5221 = vmatprep.mubr.bf16.mxu0 %v10308_v32  ;;  %6986 = vmatprep.mubr.bf16.mxu1 %v10308_v32 }
 0x4f2   :  { %5222 = vmatmul.mubr.bf16.gmra.mrb[88].mxu0 %v10298_v55  ;;  %6987 = vmatmul.mubr.bf16.gmra.mrb[88].mxu1 %v10298_v55 }
 0x4f3   :  { %5231 = vmatprep.mubr.bf16.mxu0 %v10308_v32  ;;  %6996 = vmatprep.mubr.bf16.mxu1 %v10308_v32 }
 0x4fa   :  { %5232 = vmatmul.mubr.bf16.gmra.mrb[92].mxu0 %v10299_v56  ;;  %6997 = vmatmul.mubr.bf16.gmra.mrb[92].mxu1 %v10299_v56 }
 0x4fb   :  { %5241 = vmatprep.mubr.bf16.mxu0 %v10308_v32  ;;  %7006 = vmatprep.mubr.bf16.mxu1 %v10308_v32 }
 0x502   :  { %5242 = vmatmul.mubr.bf16.gmra.mrb[96].mxu0 %v10300_v57  ;;  %7007 = vmatmul.mubr.bf16.gmra.mrb[96].mxu1 %v10300_v57 }
 0x503   :  { %5251 = vmatprep.mubr.bf16.mxu0 %v10308_v32  ;;  %7016 = vmatprep.mubr.bf16.mxu1 %v10308_v32 }
 0x50a   :  { %5252 = vmatmul.mubr.bf16.gmra.mrb[100].mxu0 %v10301_v58  ;;  %7017 = vmatmul.mubr.bf16.gmra.mrb[100].mxu1 %v10301_v58 }
 0x50b   :  { %5261 = vmatprep.mubr.bf16.mxu0 %v10308_v32  ;;  %7026 = vmatprep.mubr.bf16.mxu1 %v10308_v32 }
 0x512   :  { %5262 = vmatmul.mubr.bf16.gmra.mrb[104].mxu0 %v10302_v61  ;;  %7027 = vmatmul.mubr.bf16.gmra.mrb[104].mxu1 %v10302_v61 }
 0x513   :  { %5271 = vmatprep.mubr.bf16.mxu0 %v10308_v32  ;;  %7036 = vmatprep.mubr.bf16.mxu1 %v10308_v32 }
 0x515   :  { %v5003_v7 = vpop.f32.mrb[0].mxu0  ;;  %v6768_v8 = vpop.f32.mrb[0].mxu1 }
 0x516   :  { %v8179_v9 = vadd.f32 %v5003_v7, %v12099_v3  ;;  %v8307_v10 = vadd.f32 %v6768_v8, %v12101_v4  ;;  %v5005_v11 = vpop.f32.mrb[1].mxu0  ;;  %v6770_v12 = vpop.f32.mrb[1].mxu1 }
 0x517   :  { %v8180_v14 = vadd.f32 %v5005_v11, %v12103_v5  ;;  %v8308_v15 = vadd.f32 %v6770_v12, %v12105_v6  ;;  %v5007_v16 = vpop.f32.mrb[2].mxu0  ;;  %v6772_v17 = vpop.f32.mrb[2].mxu1  ;;  %v10305_v12 = vld [vmem:[%s12773_s0 + $0x848] ss:$36 sps:$4 sm:$0xff]  }
 0x518   :  { %v8181_v18 = vadd.f32 %v5007_v16, %v12099_v3  ;;  %v8309_v19 = vadd.f32 %v6772_v17, %v12101_v4  ;;  %v5009_v20 = vpop.f32.mrb[3].mxu0  ;;  %v6774_v21 = vpop.f32.mrb[3].mxu1  ;;  %v7087_v24 = vmax.f32 %v8179_v9, 0.0  ;;  %v7089_v25 = vmax.f32 %v8307_v10, 0.0 }
 0x519   :  { %v8182_v22 = vadd.f32 %v5009_v20, %v12103_v5  ;;  %v8310_v23 = vadd.f32 %v6774_v21, %v12105_v6  ;;  %v7088_v28 = vmax.f32 %v8180_v14, 0.0  ;;  %v7090_v29 = vmax.f32 %v8308_v15, 0.0 }
 0x51a   :  { %v7091_v26 = vmax.f32 %v8181_v18, 0.0  ;;  %v7093_v27 = vmax.f32 %v8309_v19, 0.0  ;;  %5272 = vmatmul.mubr.bf16.gmra.mrb[108].mxu0 %v10303_v13  ;;  %7037 = vmatmul.mubr.bf16.gmra.mrb[108].mxu1 %v10303_v13 }
 0x51b   :  { %v7092_v30 = vmax.f32 %v8182_v22, 0.0  ;;  %v7094_v31 = vmax.f32 %v8310_v23, 0.0  ;;  %5281 = vmatprep.mubr.bf16.mxu0 %v10308_v32  ;;  %7046 = vmatprep.mubr.bf16.mxu1 %v10308_v32 }
 0x51c   :  { %v7343_v33 = vpack.c.bf16 %v7091_v26, %v7087_v24  ;;  %v7345_v34 = vpack.c.bf16 %v7093_v27, %v7089_v25 }
 0x51d   :  { %v7344_v35 = vpack.c.bf16 %v7092_v30, %v7088_v28  ;;  %v7346_v36 = vpack.c.bf16 %v7094_v31, %v7090_v29  ;;  %v5013_v37 = vpop.f32.mrb[4].mxu0  ;;  %v6778_v38 = vpop.f32.mrb[4].mxu1 }
 0x51e   :  { %7471 = vst [vmem:[%s12775_s3] sm:$0xff] %v7343_v33  ;;  %7473 = vst [vmem:[%s12775_s3 + $0x10] sm:$0xff] %v7345_v34  ;;  %v8183_v39 = vadd.f32 %v5013_v37, %v12099_v3  ;;  %v8311_v40 = vadd.f32 %v6778_v38, %v12101_v4  ;;  %v5015_v41 = vpop.f32.mrb[5].mxu0  ;;  %v6780_v42 = vpop.f32.mrb[5].mxu1 }
 0x51f   :  { %7472 = vst [vmem:[%s12775_s3 + $0x8] sm:$0xff] %v7344_v35  ;;  %7474 = vst [vmem:[%s12775_s3 + $0x18] sm:$0xff] %v7346_v36  ;;  %v8184_v44 = vadd.f32 %v5015_v41, %v12103_v5  ;;  %v8312_v45 = vadd.f32 %v6780_v42, %v12105_v6  ;;  %v5017_v46 = vpop.f32.mrb[6].mxu0  ;;  %v6782_v47 = vpop.f32.mrb[6].mxu1  ;;  %v10306_v42 = vld [vmem:[%s12773_s0 + $0x890] ss:$36 sps:$4 sm:$0xff]  }
 0x520   :  { %v8185_v48 = vadd.f32 %v5017_v46, %v12099_v3  ;;  %v8313_v49 = vadd.f32 %v6782_v47, %v12101_v4  ;;  %v5019_v50 = vpop.f32.mrb[7].mxu0  ;;  %v6784_v51 = vpop.f32.mrb[7].mxu1  ;;  %v7095_v54 = vmax.f32 %v8183_v39, 0.0  ;;  %v7097_v55 = vmax.f32 %v8311_v40, 0.0 }
 0x521   :  { %v8186_v52 = vadd.f32 %v5019_v50, %v12103_v5  ;;  %v8314_v53 = vadd.f32 %v6784_v51, %v12105_v6  ;;  %v7096_v58 = vmax.f32 %v8184_v44, 0.0  ;;  %v7098_v59 = vmax.f32 %v8312_v45, 0.0 }
 0x522   :  { %v7099_v56 = vmax.f32 %v8185_v48, 0.0  ;;  %v7101_v57 = vmax.f32 %v8313_v49, 0.0  ;;  %5282 = vmatmul.mubr.bf16.gmra.mrb[112].mxu0 %v10304_v43  ;;  %7047 = vmatmul.mubr.bf16.gmra.mrb[112].mxu1 %v10304_v43 }
 0x523   :  { %v7100_v60 = vmax.f32 %v8186_v52, 0.0  ;;  %v7102_v61 = vmax.f32 %v8314_v53, 0.0  ;;  %5291 = vmatprep.mubr.bf16.mxu0 %v10308_v32  ;;  %7056 = vmatprep.mubr.bf16.mxu1 %v10308_v32 }
 0x524   :  { %v7347_v62 = vpack.c.bf16 %v7099_v56, %v7095_v54  ;;  %v7349_v63 = vpack.c.bf16 %v7101_v57, %v7097_v55 }
 0x525   :  { %v7348_v0 = vpack.c.bf16 %v7100_v60, %v7096_v58  ;;  %v7350_v1 = vpack.c.bf16 %v7102_v61, %v7098_v59  ;;  %v5023_v2 = vpop.f32.mrb[8].mxu0  ;;  %v6788_v7 = vpop.f32.mrb[8].mxu1 }
 0x526   :  { %7475 = vst [vmem:[%s12775_s3 + $0x20] sm:$0xff] %v7347_v62  ;;  %7477 = vst [vmem:[%s12775_s3 + $0x30] sm:$0xff] %v7349_v63  ;;  %v8187_v8 = vadd.f32 %v5023_v2, %v12099_v3  ;;  %v8315_v9 = vadd.f32 %v6788_v7, %v12101_v4  ;;  %v5025_v10 = vpop.f32.mrb[9].mxu0  ;;  %v6790_v11 = vpop.f32.mrb[9].mxu1 }
 0x527   :  { %7476 = vst [vmem:[%s12775_s3 + $0x28] sm:$0xff] %v7348_v0  ;;  %7478 = vst [vmem:[%s12775_s3 + $0x38] sm:$0xff] %v7350_v1  ;;  %v8188_v13 = vadd.f32 %v5025_v10, %v12103_v5  ;;  %v8316_v14 = vadd.f32 %v6790_v11, %v12105_v6  ;;  %v5027_v15 = vpop.f32.mrb[10].mxu0  ;;  %v6792_v16 = vpop.f32.mrb[10].mxu1  ;;  %v10307_v10 = vld [vmem:[%s12773_s0 + $0x8d8] ss:$36 sps:$4 sm:$0xff]  }
 0x528   :  { %v8189_v17 = vadd.f32 %v5027_v15, %v12099_v3  ;;  %v8317_v18 = vadd.f32 %v6792_v16, %v12101_v4  ;;  %v5029_v19 = vpop.f32.mrb[11].mxu0  ;;  %v6794_v20 = vpop.f32.mrb[11].mxu1  ;;  %v7103_v23 = vmax.f32 %v8187_v8, 0.0  ;;  %v7105_v24 = vmax.f32 %v8315_v9, 0.0 }
 0x529   :  { %v8190_v21 = vadd.f32 %v5029_v19, %v12103_v5  ;;  %v8318_v22 = vadd.f32 %v6794_v20, %v12105_v6  ;;  %v7104_v27 = vmax.f32 %v8188_v13, 0.0  ;;  %v7106_v28 = vmax.f32 %v8316_v14, 0.0 }
 0x52a   :  { %v7107_v25 = vmax.f32 %v8189_v17, 0.0  ;;  %v7109_v26 = vmax.f32 %v8317_v18, 0.0  ;;  %5292 = vmatmul.mubr.bf16.gmra.mrb[116].mxu0 %v10305_v12  ;;  %7057 = vmatmul.mubr.bf16.gmra.mrb[116].mxu1 %v10305_v12 }
 0x52b   :  { %v7108_v29 = vmax.f32 %v8190_v21, 0.0  ;;  %v7110_v30 = vmax.f32 %v8318_v22, 0.0  ;;  %5301 = vmatprep.mubr.bf16.mxu0 %v10308_v32  ;;  %7066 = vmatprep.mubr.bf16.mxu1 %v10308_v32 }
 0x52c   :  { %v7351_v31 = vpack.c.bf16 %v7107_v25, %v7103_v23  ;;  %v7353_v33 = vpack.c.bf16 %v7109_v26, %v7105_v24 }
 0x52d   :  { %v7352_v34 = vpack.c.bf16 %v7108_v29, %v7104_v27  ;;  %v7354_v35 = vpack.c.bf16 %v7110_v30, %v7106_v28  ;;  %v5033_v36 = vpop.f32.mrb[12].mxu0  ;;  %v6798_v37 = vpop.f32.mrb[12].mxu1 }
 0x52e   :  { %7479 = vst [vmem:[%s12775_s3 + $0x40] sm:$0xff] %v7351_v31  ;;  %7481 = vst [vmem:[%s12775_s3 + $0x50] sm:$0xff] %v7353_v33  ;;  %v8191_v38 = vadd.f32 %v5033_v36, %v12099_v3  ;;  %v8319_v39 = vadd.f32 %v6798_v37, %v12101_v4  ;;  %v5035_v40 = vpop.f32.mrb[13].mxu0  ;;  %v6800_v41 = vpop.f32.mrb[13].mxu1 }
 0x52f   :  { %7480 = vst [vmem:[%s12775_s3 + $0x48] sm:$0xff] %v7352_v34  ;;  %7482 = vst [vmem:[%s12775_s3 + $0x58] sm:$0xff] %v7354_v35  ;;  %v8192_v43 = vadd.f32 %v5035_v40, %v12103_v5  ;;  %v8320_v44 = vadd.f32 %v6800_v41, %v12105_v6  ;;  %v5037_v45 = vpop.f32.mrb[14].mxu0  ;;  %v6802_v46 = vpop.f32.mrb[14].mxu1 }
 0x530   :  { %v8193_v47 = vadd.f32 %v5037_v45, %v12099_v3  ;;  %v8321_v48 = vadd.f32 %v6802_v46, %v12101_v4  ;;  %v5039_v49 = vpop.f32.mrb[15].mxu0  ;;  %v6804_v50 = vpop.f32.mrb[15].mxu1  ;;  %v7111_v53 = vmax.f32 %v8191_v38, 0.0  ;;  %v7113_v54 = vmax.f32 %v8319_v39, 0.0 }
 0x531   :  { %v8194_v51 = vadd.f32 %v5039_v49, %v12103_v5  ;;  %v8322_v52 = vadd.f32 %v6804_v50, %v12105_v6  ;;  %v7112_v57 = vmax.f32 %v8192_v43, 0.0  ;;  %v7114_v58 = vmax.f32 %v8320_v44, 0.0 }
 0x532   :  { %v7115_v55 = vmax.f32 %v8193_v47, 0.0  ;;  %v7117_v56 = vmax.f32 %v8321_v48, 0.0  ;;  %5302 = vmatmul.mubr.bf16.gmra.mrb[120].mxu0 %v10306_v42  ;;  %7067 = vmatmul.mubr.bf16.gmra.mrb[120].mxu1 %v10306_v42 }
 0x533   :  { %v7116_v59 = vmax.f32 %v8194_v51, 0.0  ;;  %v7118_v60 = vmax.f32 %v8322_v52, 0.0  ;;  %5311 = vmatprep.mubr.bf16.mxu0 %v10308_v32  ;;  %7076 = vmatprep.mubr.bf16.mxu1 %v10308_v32 }
 0x534   :  { %v7355_v61 = vpack.c.bf16 %v7115_v55, %v7111_v53  ;;  %v7357_v62 = vpack.c.bf16 %v7117_v56, %v7113_v54 }
 0x535   :  { %v7356_v63 = vpack.c.bf16 %v7116_v59, %v7112_v57  ;;  %v7358_v0 = vpack.c.bf16 %v7118_v60, %v7114_v58  ;;  %v5043_v1 = vpop.f32.mrb[16].mxu0  ;;  %v6808_v2 = vpop.f32.mrb[16].mxu1 }
 0x536   :  { %7483 = vst [vmem:[%s12775_s3 + $0x60] sm:$0xff] %v7355_v61  ;;  %7485 = vst [vmem:[%s12775_s3 + $0x70] sm:$0xff] %v7357_v62  ;;  %v8195_v7 = vadd.f32 %v5043_v1, %v12099_v3  ;;  %v8323_v8 = vadd.f32 %v6808_v2, %v12101_v4  ;;  %v5045_v9 = vpop.f32.mrb[17].mxu0  ;;  %v6810_v32 = vpop.f32.mrb[17].mxu1 }
 0x537   :  { %7484 = vst [vmem:[%s12775_s3 + $0x68] sm:$0xff] %v7356_v63  ;;  %7486 = vst [vmem:[%s12775_s3 + $0x78] sm:$0xff] %v7358_v0  ;;  %v8196_v11 = vadd.f32 %v5045_v9, %v12103_v5  ;;  %v8324_v12 = vadd.f32 %v6810_v32, %v12105_v6  ;;  %v5047_v13 = vpop.f32.mrb[18].mxu0  ;;  %v6812_v14 = vpop.f32.mrb[18].mxu1 }
 0x538   :  { %v8197_v15 = vadd.f32 %v5047_v13, %v12099_v3  ;;  %v8325_v16 = vadd.f32 %v6812_v14, %v12101_v4  ;;  %v5049_v17 = vpop.f32.mrb[19].mxu0  ;;  %v6814_v18 = vpop.f32.mrb[19].mxu1  ;;  %v7119_v21 = vmax.f32 %v8195_v7, 0.0  ;;  %v7121_v22 = vmax.f32 %v8323_v8, 0.0 }
 0x539   :  { %v8198_v19 = vadd.f32 %v5049_v17, %v12103_v5  ;;  %v8326_v20 = vadd.f32 %v6814_v18, %v12105_v6  ;;  %v7120_v25 = vmax.f32 %v8196_v11, 0.0  ;;  %v7122_v26 = vmax.f32 %v8324_v12, 0.0 }
 0x53a   :  { %v7123_v23 = vmax.f32 %v8197_v15, 0.0  ;;  %v7125_v24 = vmax.f32 %v8325_v16, 0.0  ;;  %5312 = vmatmul.mubr.bf16.gmra.mrb[124].mxu0 %v10307_v10  ;;  %7077 = vmatmul.mubr.bf16.gmra.mrb[124].mxu1 %v10307_v10 }
 0x53b   :  { %v7124_v27 = vmax.f32 %v8198_v19, 0.0  ;;  %v7126_v28 = vmax.f32 %v8326_v20, 0.0 }
 0x53c   :  { %v7359_v29 = vpack.c.bf16 %v7123_v23, %v7119_v21  ;;  %v7361_v30 = vpack.c.bf16 %v7125_v24, %v7121_v22 }
 0x53d   :  { %v7360_v31 = vpack.c.bf16 %v7124_v27, %v7120_v25  ;;  %v7362_v33 = vpack.c.bf16 %v7126_v28, %v7122_v26  ;;  %v5053_v34 = vpop.f32.mrb[20].mxu0  ;;  %v6818_v35 = vpop.f32.mrb[20].mxu1 }
 0x53e   :  { %7487 = vst [vmem:[%s12775_s3 + $0x80] sm:$0xff] %v7359_v29  ;;  %7489 = vst [vmem:[%s12775_s3 + $0x90] sm:$0xff] %v7361_v30  ;;  %v8199_v36 = vadd.f32 %v5053_v34, %v12099_v3  ;;  %v8327_v37 = vadd.f32 %v6818_v35, %v12101_v4  ;;  %v5055_v38 = vpop.f32.mrb[21].mxu0  ;;  %v6820_v39 = vpop.f32.mrb[21].mxu1 }
 0x53f   :  { %7488 = vst [vmem:[%s12775_s3 + $0x88] sm:$0xff] %v7360_v31  ;;  %7490 = vst [vmem:[%s12775_s3 + $0x98] sm:$0xff] %v7362_v33  ;;  %v8200_v40 = vadd.f32 %v5055_v38, %v12103_v5  ;;  %v8328_v41 = vadd.f32 %v6820_v39, %v12105_v6  ;;  %v5057_v42 = vpop.f32.mrb[22].mxu0  ;;  %v6822_v43 = vpop.f32.mrb[22].mxu1 }
 0x540   :  { %v8201_v44 = vadd.f32 %v5057_v42, %v12099_v3  ;;  %v8329_v45 = vadd.f32 %v6822_v43, %v12101_v4  ;;  %v5059_v46 = vpop.f32.mrb[23].mxu0  ;;  %v6824_v47 = vpop.f32.mrb[23].mxu1  ;;  %v7127_v50 = vmax.f32 %v8199_v36, 0.0  ;;  %v7129_v51 = vmax.f32 %v8327_v37, 0.0 }
 0x541   :  { %v8202_v48 = vadd.f32 %v5059_v46, %v12103_v5  ;;  %v8330_v49 = vadd.f32 %v6824_v47, %v12105_v6  ;;  %v7128_v54 = vmax.f32 %v8200_v40, 0.0  ;;  %v7130_v55 = vmax.f32 %v8328_v41, 0.0 }
 0x542   :  { %v7131_v52 = vmax.f32 %v8201_v44, 0.0  ;;  %v7133_v53 = vmax.f32 %v8329_v45, 0.0 }
 0x543   :  { %v7132_v56 = vmax.f32 %v8202_v48, 0.0  ;;  %v7134_v57 = vmax.f32 %v8330_v49, 0.0 }
 0x544   :  { %v7363_v58 = vpack.c.bf16 %v7131_v52, %v7127_v50  ;;  %v7365_v59 = vpack.c.bf16 %v7133_v53, %v7129_v51 }
 0x545   :  { %v7364_v60 = vpack.c.bf16 %v7132_v56, %v7128_v54  ;;  %v7366_v61 = vpack.c.bf16 %v7134_v57, %v7130_v55  ;;  %v5063_v62 = vpop.f32.mrb[24].mxu0  ;;  %v6828_v63 = vpop.f32.mrb[24].mxu1 }
 0x546   :  { %7491 = vst [vmem:[%s12775_s3 + $0xa0] sm:$0xff] %v7363_v58  ;;  %7493 = vst [vmem:[%s12775_s3 + $0xb0] sm:$0xff] %v7365_v59  ;;  %v8203_v0 = vadd.f32 %v5063_v62, %v12099_v3  ;;  %v8331_v1 = vadd.f32 %v6828_v63, %v12101_v4  ;;  %v5065_v2 = vpop.f32.mrb[25].mxu0  ;;  %v6830_v7 = vpop.f32.mrb[25].mxu1 }
 0x547   :  { %7492 = vst [vmem:[%s12775_s3 + $0xa8] sm:$0xff] %v7364_v60  ;;  %7494 = vst [vmem:[%s12775_s3 + $0xb8] sm:$0xff] %v7366_v61  ;;  %v8204_v8 = vadd.f32 %v5065_v2, %v12103_v5  ;;  %v8332_v9 = vadd.f32 %v6830_v7, %v12105_v6  ;;  %v5067_v32 = vpop.f32.mrb[26].mxu0  ;;  %v6832_v10 = vpop.f32.mrb[26].mxu1 }
 0x548   :  { %v8205_v11 = vadd.f32 %v5067_v32, %v12099_v3  ;;  %v8333_v12 = vadd.f32 %v6832_v10, %v12101_v4  ;;  %v5069_v13 = vpop.f32.mrb[27].mxu0  ;;  %v6834_v14 = vpop.f32.mrb[27].mxu1  ;;  %v7135_v17 = vmax.f32 %v8203_v0, 0.0  ;;  %v7137_v18 = vmax.f32 %v8331_v1, 0.0 }
 0x549   :  { %v8206_v15 = vadd.f32 %v5069_v13, %v12103_v5  ;;  %v8334_v16 = vadd.f32 %v6834_v14, %v12105_v6  ;;  %v7136_v21 = vmax.f32 %v8204_v8, 0.0  ;;  %v7138_v22 = vmax.f32 %v8332_v9, 0.0 }
 0x54a   :  { %v7139_v19 = vmax.f32 %v8205_v11, 0.0  ;;  %v7141_v20 = vmax.f32 %v8333_v12, 0.0 }
 0x54b   :  { %v7140_v23 = vmax.f32 %v8206_v15, 0.0  ;;  %v7142_v24 = vmax.f32 %v8334_v16, 0.0 }
 0x54c   :  { %v7367_v25 = vpack.c.bf16 %v7139_v19, %v7135_v17  ;;  %v7369_v26 = vpack.c.bf16 %v7141_v20, %v7137_v18 }
 0x54d   :  { %v7368_v27 = vpack.c.bf16 %v7140_v23, %v7136_v21  ;;  %v7370_v28 = vpack.c.bf16 %v7142_v24, %v7138_v22  ;;  %v5073_v29 = vpop.f32.mrb[28].mxu0  ;;  %v6838_v30 = vpop.f32.mrb[28].mxu1 }
 0x54e   :  { %7495 = vst [vmem:[%s12775_s3 + $0xc0] sm:$0xff] %v7367_v25  ;;  %7497 = vst [vmem:[%s12775_s3 + $0xd0] sm:$0xff] %v7369_v26  ;;  %v8207_v31 = vadd.f32 %v5073_v29, %v12099_v3  ;;  %v8335_v33 = vadd.f32 %v6838_v30, %v12101_v4  ;;  %v5075_v34 = vpop.f32.mrb[29].mxu0  ;;  %v6840_v35 = vpop.f32.mrb[29].mxu1 }
 0x54f   :  { %7496 = vst [vmem:[%s12775_s3 + $0xc8] sm:$0xff] %v7368_v27  ;;  %7498 = vst [vmem:[%s12775_s3 + $0xd8] sm:$0xff] %v7370_v28  ;;  %v8208_v36 = vadd.f32 %v5075_v34, %v12103_v5  ;;  %v8336_v37 = vadd.f32 %v6840_v35, %v12105_v6  ;;  %v5077_v38 = vpop.f32.mrb[30].mxu0  ;;  %v6842_v39 = vpop.f32.mrb[30].mxu1 }
 0x550   :  { %v8209_v40 = vadd.f32 %v5077_v38, %v12099_v3  ;;  %v8337_v41 = vadd.f32 %v6842_v39, %v12101_v4  ;;  %v5079_v42 = vpop.f32.mrb[31].mxu0  ;;  %v6844_v43 = vpop.f32.mrb[31].mxu1  ;;  %v7143_v46 = vmax.f32 %v8207_v31, 0.0  ;;  %v7145_v47 = vmax.f32 %v8335_v33, 0.0 }
 0x551   :  { %v8210_v44 = vadd.f32 %v5079_v42, %v12103_v5  ;;  %v8338_v45 = vadd.f32 %v6844_v43, %v12105_v6  ;;  %v7144_v50 = vmax.f32 %v8208_v36, 0.0  ;;  %v7146_v51 = vmax.f32 %v8336_v37, 0.0 }
 0x552   :  { %v7147_v48 = vmax.f32 %v8209_v40, 0.0  ;;  %v7149_v49 = vmax.f32 %v8337_v41, 0.0 }
 0x553   :  { %v7148_v52 = vmax.f32 %v8210_v44, 0.0  ;;  %v7150_v53 = vmax.f32 %v8338_v45, 0.0 }
 0x554   :  { %v7371_v54 = vpack.c.bf16 %v7147_v48, %v7143_v46  ;;  %v7373_v55 = vpack.c.bf16 %v7149_v49, %v7145_v47 }
 0x555   :  { %v7372_v56 = vpack.c.bf16 %v7148_v52, %v7144_v50  ;;  %v7374_v57 = vpack.c.bf16 %v7150_v53, %v7146_v51  ;;  %v5083_v58 = vpop.f32.mrb[32].mxu0  ;;  %v6848_v59 = vpop.f32.mrb[32].mxu1 }
 0x556   :  { %7499 = vst [vmem:[%s12775_s3 + $0xe0] sm:$0xff] %v7371_v54  ;;  %7501 = vst [vmem:[%s12775_s3 + $0xf0] sm:$0xff] %v7373_v55  ;;  %v8211_v60 = vadd.f32 %v5083_v58, %v12099_v3  ;;  %v8339_v61 = vadd.f32 %v6848_v59, %v12101_v4  ;;  %v5085_v62 = vpop.f32.mrb[33].mxu0  ;;  %v6850_v63 = vpop.f32.mrb[33].mxu1 }
 0x557   :  { %7500 = vst [vmem:[%s12775_s3 + $0xe8] sm:$0xff] %v7372_v56  ;;  %7502 = vst [vmem:[%s12775_s3 + $0xf8] sm:$0xff] %v7374_v57  ;;  %v8212_v0 = vadd.f32 %v5085_v62, %v12103_v5  ;;  %v8340_v1 = vadd.f32 %v6850_v63, %v12105_v6  ;;  %v5087_v2 = vpop.f32.mrb[34].mxu0  ;;  %v6852_v7 = vpop.f32.mrb[34].mxu1 }
 0x558   :  { %v8213_v8 = vadd.f32 %v5087_v2, %v12099_v3  ;;  %v8341_v9 = vadd.f32 %v6852_v7, %v12101_v4  ;;  %v5089_v32 = vpop.f32.mrb[35].mxu0  ;;  %v6854_v10 = vpop.f32.mrb[35].mxu1  ;;  %v7151_v13 = vmax.f32 %v8211_v60, 0.0  ;;  %v7153_v14 = vmax.f32 %v8339_v61, 0.0 }
 0x559   :  { %v8214_v11 = vadd.f32 %v5089_v32, %v12103_v5  ;;  %v8342_v12 = vadd.f32 %v6854_v10, %v12105_v6  ;;  %v7152_v17 = vmax.f32 %v8212_v0, 0.0  ;;  %v7154_v18 = vmax.f32 %v8340_v1, 0.0 }
 0x55a   :  { %v7155_v15 = vmax.f32 %v8213_v8, 0.0  ;;  %v7157_v16 = vmax.f32 %v8341_v9, 0.0 }
 0x55b   :  { %v7156_v19 = vmax.f32 %v8214_v11, 0.0  ;;  %v7158_v20 = vmax.f32 %v8342_v12, 0.0 }
 0x55c   :  { %v7375_v21 = vpack.c.bf16 %v7155_v15, %v7151_v13  ;;  %v7377_v22 = vpack.c.bf16 %v7157_v16, %v7153_v14 }
 0x55d   :  { %v7376_v23 = vpack.c.bf16 %v7156_v19, %v7152_v17  ;;  %v7378_v24 = vpack.c.bf16 %v7158_v20, %v7154_v18  ;;  %v5093_v25 = vpop.f32.mrb[36].mxu0  ;;  %v6858_v26 = vpop.f32.mrb[36].mxu1 }
 0x55e   :  { %7503 = vst [vmem:[%s12775_s3 + $0x100] sm:$0xff] %v7375_v21  ;;  %7505 = vst [vmem:[%s12775_s3 + $0x110] sm:$0xff] %v7377_v22  ;;  %v8215_v27 = vadd.f32 %v5093_v25, %v12099_v3  ;;  %v8343_v28 = vadd.f32 %v6858_v26, %v12101_v4  ;;  %v5095_v29 = vpop.f32.mrb[37].mxu0  ;;  %v6860_v30 = vpop.f32.mrb[37].mxu1 }
 0x55f   :  { %7504 = vst [vmem:[%s12775_s3 + $0x108] sm:$0xff] %v7376_v23  ;;  %7506 = vst [vmem:[%s12775_s3 + $0x118] sm:$0xff] %v7378_v24  ;;  %v8216_v31 = vadd.f32 %v5095_v29, %v12103_v5  ;;  %v8344_v33 = vadd.f32 %v6860_v30, %v12105_v6  ;;  %v5097_v34 = vpop.f32.mrb[38].mxu0  ;;  %v6862_v35 = vpop.f32.mrb[38].mxu1 }
 0x560   :  { %v8217_v36 = vadd.f32 %v5097_v34, %v12099_v3  ;;  %v8345_v37 = vadd.f32 %v6862_v35, %v12101_v4  ;;  %v5099_v38 = vpop.f32.mrb[39].mxu0  ;;  %v6864_v39 = vpop.f32.mrb[39].mxu1  ;;  %v7159_v42 = vmax.f32 %v8215_v27, 0.0  ;;  %v7161_v43 = vmax.f32 %v8343_v28, 0.0 }
 0x561   :  { %v8218_v40 = vadd.f32 %v5099_v38, %v12103_v5  ;;  %v8346_v41 = vadd.f32 %v6864_v39, %v12105_v6  ;;  %v7160_v46 = vmax.f32 %v8216_v31, 0.0  ;;  %v7162_v47 = vmax.f32 %v8344_v33, 0.0 }
 0x562   :  { %v7163_v44 = vmax.f32 %v8217_v36, 0.0  ;;  %v7165_v45 = vmax.f32 %v8345_v37, 0.0 }
 0x563   :  { %v7164_v48 = vmax.f32 %v8218_v40, 0.0  ;;  %v7166_v49 = vmax.f32 %v8346_v41, 0.0 }
 0x564   :  { %v7379_v50 = vpack.c.bf16 %v7163_v44, %v7159_v42  ;;  %v7381_v51 = vpack.c.bf16 %v7165_v45, %v7161_v43 }
 0x565   :  { %v7380_v52 = vpack.c.bf16 %v7164_v48, %v7160_v46  ;;  %v7382_v53 = vpack.c.bf16 %v7166_v49, %v7162_v47  ;;  %v5103_v54 = vpop.f32.mrb[40].mxu0  ;;  %v6868_v55 = vpop.f32.mrb[40].mxu1 }
 0x566   :  { %7507 = vst [vmem:[%s12775_s3 + $0x120] sm:$0xff] %v7379_v50  ;;  %7509 = vst [vmem:[%s12775_s3 + $0x130] sm:$0xff] %v7381_v51  ;;  %v8219_v56 = vadd.f32 %v5103_v54, %v12099_v3  ;;  %v8347_v57 = vadd.f32 %v6868_v55, %v12101_v4  ;;  %v5105_v58 = vpop.f32.mrb[41].mxu0  ;;  %v6870_v59 = vpop.f32.mrb[41].mxu1 }
 0x567   :  { %7508 = vst [vmem:[%s12775_s3 + $0x128] sm:$0xff] %v7380_v52  ;;  %7510 = vst [vmem:[%s12775_s3 + $0x138] sm:$0xff] %v7382_v53  ;;  %v8220_v60 = vadd.f32 %v5105_v58, %v12103_v5  ;;  %v8348_v61 = vadd.f32 %v6870_v59, %v12105_v6  ;;  %v5107_v62 = vpop.f32.mrb[42].mxu0  ;;  %v6872_v63 = vpop.f32.mrb[42].mxu1 }
 0x568   :  { %v8221_v0 = vadd.f32 %v5107_v62, %v12099_v3  ;;  %v8349_v1 = vadd.f32 %v6872_v63, %v12101_v4  ;;  %v5109_v2 = vpop.f32.mrb[43].mxu0  ;;  %v6874_v7 = vpop.f32.mrb[43].mxu1  ;;  %v7167_v32 = vmax.f32 %v8219_v56, 0.0  ;;  %v7169_v10 = vmax.f32 %v8347_v57, 0.0 }
 0x569   :  { %v8222_v8 = vadd.f32 %v5109_v2, %v12103_v5  ;;  %v8350_v9 = vadd.f32 %v6874_v7, %v12105_v6  ;;  %v7168_v13 = vmax.f32 %v8220_v60, 0.0  ;;  %v7170_v14 = vmax.f32 %v8348_v61, 0.0 }
 0x56a   :  { %v7171_v11 = vmax.f32 %v8221_v0, 0.0  ;;  %v7173_v12 = vmax.f32 %v8349_v1, 0.0 }
 0x56b   :  { %v7172_v15 = vmax.f32 %v8222_v8, 0.0  ;;  %v7174_v16 = vmax.f32 %v8350_v9, 0.0 }
 0x56c   :  { %v7383_v17 = vpack.c.bf16 %v7171_v11, %v7167_v32  ;;  %v7385_v18 = vpack.c.bf16 %v7173_v12, %v7169_v10 }
 0x56d   :  { %v7384_v19 = vpack.c.bf16 %v7172_v15, %v7168_v13  ;;  %v7386_v20 = vpack.c.bf16 %v7174_v16, %v7170_v14  ;;  %v5113_v21 = vpop.f32.mrb[44].mxu0  ;;  %v6878_v22 = vpop.f32.mrb[44].mxu1 }
 0x56e   :  { %7511 = vst [vmem:[%s12775_s3 + $0x140] sm:$0xff] %v7383_v17  ;;  %7513 = vst [vmem:[%s12775_s3 + $0x150] sm:$0xff] %v7385_v18  ;;  %v8223_v23 = vadd.f32 %v5113_v21, %v12099_v3  ;;  %v8351_v24 = vadd.f32 %v6878_v22, %v12101_v4  ;;  %v5115_v25 = vpop.f32.mrb[45].mxu0  ;;  %v6880_v26 = vpop.f32.mrb[45].mxu1 }
 0x56f   :  { %7512 = vst [vmem:[%s12775_s3 + $0x148] sm:$0xff] %v7384_v19  ;;  %7514 = vst [vmem:[%s12775_s3 + $0x158] sm:$0xff] %v7386_v20  ;;  %v8224_v27 = vadd.f32 %v5115_v25, %v12103_v5  ;;  %v8352_v28 = vadd.f32 %v6880_v26, %v12105_v6  ;;  %v5117_v29 = vpop.f32.mrb[46].mxu0  ;;  %v6882_v30 = vpop.f32.mrb[46].mxu1 }
 0x570   :  { %v8225_v31 = vadd.f32 %v5117_v29, %v12099_v3  ;;  %v8353_v33 = vadd.f32 %v6882_v30, %v12101_v4  ;;  %v5119_v34 = vpop.f32.mrb[47].mxu0  ;;  %v6884_v35 = vpop.f32.mrb[47].mxu1  ;;  %v7175_v38 = vmax.f32 %v8223_v23, 0.0  ;;  %v7177_v39 = vmax.f32 %v8351_v24, 0.0 }
 0x571   :  { %v8226_v36 = vadd.f32 %v5119_v34, %v12103_v5  ;;  %v8354_v37 = vadd.f32 %v6884_v35, %v12105_v6  ;;  %v7176_v42 = vmax.f32 %v8224_v27, 0.0  ;;  %v7178_v43 = vmax.f32 %v8352_v28, 0.0 }
 0x572   :  { %v7179_v40 = vmax.f32 %v8225_v31, 0.0  ;;  %v7181_v41 = vmax.f32 %v8353_v33, 0.0 }
 0x573   :  { %v7180_v44 = vmax.f32 %v8226_v36, 0.0  ;;  %v7182_v45 = vmax.f32 %v8354_v37, 0.0 }
 0x574   :  { %v7387_v46 = vpack.c.bf16 %v7179_v40, %v7175_v38  ;;  %v7389_v47 = vpack.c.bf16 %v7181_v41, %v7177_v39 }
 0x575   :  { %v7388_v48 = vpack.c.bf16 %v7180_v44, %v7176_v42  ;;  %v7390_v49 = vpack.c.bf16 %v7182_v45, %v7178_v43  ;;  %v5123_v50 = vpop.f32.mrb[48].mxu0  ;;  %v6888_v51 = vpop.f32.mrb[48].mxu1 }
 0x576   :  { %7515 = vst [vmem:[%s12775_s3 + $0x160] sm:$0xff] %v7387_v46  ;;  %7517 = vst [vmem:[%s12775_s3 + $0x170] sm:$0xff] %v7389_v47  ;;  %v8227_v52 = vadd.f32 %v5123_v50, %v12099_v3  ;;  %v8355_v53 = vadd.f32 %v6888_v51, %v12101_v4  ;;  %v5125_v54 = vpop.f32.mrb[49].mxu0  ;;  %v6890_v55 = vpop.f32.mrb[49].mxu1 }
 0x577   :  { %7516 = vst [vmem:[%s12775_s3 + $0x168] sm:$0xff] %v7388_v48  ;;  %7518 = vst [vmem:[%s12775_s3 + $0x178] sm:$0xff] %v7390_v49  ;;  %v8228_v56 = vadd.f32 %v5125_v54, %v12103_v5  ;;  %v8356_v57 = vadd.f32 %v6890_v55, %v12105_v6  ;;  %v5127_v58 = vpop.f32.mrb[50].mxu0  ;;  %v6892_v59 = vpop.f32.mrb[50].mxu1 }
 0x578   :  { %v8229_v60 = vadd.f32 %v5127_v58, %v12099_v3  ;;  %v8357_v61 = vadd.f32 %v6892_v59, %v12101_v4  ;;  %v5129_v62 = vpop.f32.mrb[51].mxu0  ;;  %v6894_v63 = vpop.f32.mrb[51].mxu1  ;;  %v7183_v2 = vmax.f32 %v8227_v52, 0.0  ;;  %v7185_v7 = vmax.f32 %v8355_v53, 0.0 }
 0x579   :  { %v8230_v0 = vadd.f32 %v5129_v62, %v12103_v5  ;;  %v8358_v1 = vadd.f32 %v6894_v63, %v12105_v6  ;;  %v7184_v32 = vmax.f32 %v8228_v56, 0.0  ;;  %v7186_v10 = vmax.f32 %v8356_v57, 0.0 }
 0x57a   :  { %v7187_v8 = vmax.f32 %v8229_v60, 0.0  ;;  %v7189_v9 = vmax.f32 %v8357_v61, 0.0 }
 0x57b   :  { %v7188_v11 = vmax.f32 %v8230_v0, 0.0  ;;  %v7190_v12 = vmax.f32 %v8358_v1, 0.0 }
 0x57c   :  { %v7391_v13 = vpack.c.bf16 %v7187_v8, %v7183_v2  ;;  %v7393_v14 = vpack.c.bf16 %v7189_v9, %v7185_v7 }
 0x57d   :  { %v7392_v15 = vpack.c.bf16 %v7188_v11, %v7184_v32  ;;  %v7394_v16 = vpack.c.bf16 %v7190_v12, %v7186_v10  ;;  %v5133_v17 = vpop.f32.mrb[52].mxu0  ;;  %v6898_v18 = vpop.f32.mrb[52].mxu1 }
 0x57e   :  { %7519 = vst [vmem:[%s12775_s3 + $0x180] sm:$0xff] %v7391_v13  ;;  %7521 = vst [vmem:[%s12775_s3 + $0x190] sm:$0xff] %v7393_v14  ;;  %v8231_v19 = vadd.f32 %v5133_v17, %v12099_v3  ;;  %v8359_v20 = vadd.f32 %v6898_v18, %v12101_v4  ;;  %v5135_v21 = vpop.f32.mrb[53].mxu0  ;;  %v6900_v22 = vpop.f32.mrb[53].mxu1 }
 0x57f   :  { %7520 = vst [vmem:[%s12775_s3 + $0x188] sm:$0xff] %v7392_v15  ;;  %7522 = vst [vmem:[%s12775_s3 + $0x198] sm:$0xff] %v7394_v16  ;;  %v8232_v23 = vadd.f32 %v5135_v21, %v12103_v5  ;;  %v8360_v24 = vadd.f32 %v6900_v22, %v12105_v6  ;;  %v5137_v25 = vpop.f32.mrb[54].mxu0  ;;  %v6902_v26 = vpop.f32.mrb[54].mxu1 }
 0x580   :  { %v8233_v27 = vadd.f32 %v5137_v25, %v12099_v3  ;;  %v8361_v28 = vadd.f32 %v6902_v26, %v12101_v4  ;;  %v5139_v29 = vpop.f32.mrb[55].mxu0  ;;  %v6904_v30 = vpop.f32.mrb[55].mxu1  ;;  %v7191_v34 = vmax.f32 %v8231_v19, 0.0  ;;  %v7193_v35 = vmax.f32 %v8359_v20, 0.0 }
 0x581   :  { %v8234_v31 = vadd.f32 %v5139_v29, %v12103_v5  ;;  %v8362_v33 = vadd.f32 %v6904_v30, %v12105_v6  ;;  %v7192_v38 = vmax.f32 %v8232_v23, 0.0  ;;  %v7194_v39 = vmax.f32 %v8360_v24, 0.0 }
 0x582   :  { %v7195_v36 = vmax.f32 %v8233_v27, 0.0  ;;  %v7197_v37 = vmax.f32 %v8361_v28, 0.0 }
 0x583   :  { %v7196_v40 = vmax.f32 %v8234_v31, 0.0  ;;  %v7198_v41 = vmax.f32 %v8362_v33, 0.0 }
 0x584   :  { %v7395_v42 = vpack.c.bf16 %v7195_v36, %v7191_v34  ;;  %v7397_v43 = vpack.c.bf16 %v7197_v37, %v7193_v35 }
 0x585   :  { %v7396_v44 = vpack.c.bf16 %v7196_v40, %v7192_v38  ;;  %v7398_v45 = vpack.c.bf16 %v7198_v41, %v7194_v39  ;;  %v5143_v46 = vpop.f32.mrb[56].mxu0  ;;  %v6908_v47 = vpop.f32.mrb[56].mxu1 }
 0x586   :  { %7523 = vst [vmem:[%s12775_s3 + $0x1a0] sm:$0xff] %v7395_v42  ;;  %7525 = vst [vmem:[%s12775_s3 + $0x1b0] sm:$0xff] %v7397_v43  ;;  %v8235_v48 = vadd.f32 %v5143_v46, %v12099_v3  ;;  %v8363_v49 = vadd.f32 %v6908_v47, %v12101_v4  ;;  %v5145_v50 = vpop.f32.mrb[57].mxu0  ;;  %v6910_v51 = vpop.f32.mrb[57].mxu1 }
 0x587   :  { %7524 = vst [vmem:[%s12775_s3 + $0x1a8] sm:$0xff] %v7396_v44  ;;  %7526 = vst [vmem:[%s12775_s3 + $0x1b8] sm:$0xff] %v7398_v45  ;;  %v8236_v52 = vadd.f32 %v5145_v50, %v12103_v5  ;;  %v8364_v53 = vadd.f32 %v6910_v51, %v12105_v6  ;;  %v5147_v54 = vpop.f32.mrb[58].mxu0  ;;  %v6912_v55 = vpop.f32.mrb[58].mxu1 }
 0x588   :  { %v8237_v56 = vadd.f32 %v5147_v54, %v12099_v3  ;;  %v8365_v57 = vadd.f32 %v6912_v55, %v12101_v4  ;;  %v5149_v58 = vpop.f32.mrb[59].mxu0  ;;  %v6914_v59 = vpop.f32.mrb[59].mxu1  ;;  %v7199_v62 = vmax.f32 %v8235_v48, 0.0  ;;  %v7201_v63 = vmax.f32 %v8363_v49, 0.0 }
 0x589   :  { %v8238_v60 = vadd.f32 %v5149_v58, %v12103_v5  ;;  %v8366_v61 = vadd.f32 %v6914_v59, %v12105_v6  ;;  %v7200_v2 = vmax.f32 %v8236_v52, 0.0  ;;  %v7202_v7 = vmax.f32 %v8364_v53, 0.0 }
 0x58a   :  { %v7203_v0 = vmax.f32 %v8237_v56, 0.0  ;;  %v7205_v1 = vmax.f32 %v8365_v57, 0.0 }
 0x58b   :  { %v7204_v8 = vmax.f32 %v8238_v60, 0.0  ;;  %v7206_v9 = vmax.f32 %v8366_v61, 0.0 }
 0x58c   :  { %v7399_v32 = vpack.c.bf16 %v7203_v0, %v7199_v62  ;;  %v7401_v10 = vpack.c.bf16 %v7205_v1, %v7201_v63 }
 0x58d   :  { %v7400_v11 = vpack.c.bf16 %v7204_v8, %v7200_v2  ;;  %v7402_v12 = vpack.c.bf16 %v7206_v9, %v7202_v7  ;;  %v5153_v13 = vpop.f32.mrb[60].mxu0  ;;  %v6918_v14 = vpop.f32.mrb[60].mxu1 }
 0x58e   :  { %7527 = vst [vmem:[%s12775_s3 + $0x1c0] sm:$0xff] %v7399_v32  ;;  %7529 = vst [vmem:[%s12775_s3 + $0x1d0] sm:$0xff] %v7401_v10  ;;  %v8239_v15 = vadd.f32 %v5153_v13, %v12099_v3  ;;  %v8367_v16 = vadd.f32 %v6918_v14, %v12101_v4  ;;  %v5155_v17 = vpop.f32.mrb[61].mxu0  ;;  %v6920_v18 = vpop.f32.mrb[61].mxu1 }
 0x58f   :  { %7528 = vst [vmem:[%s12775_s3 + $0x1c8] sm:$0xff] %v7400_v11  ;;  %7530 = vst [vmem:[%s12775_s3 + $0x1d8] sm:$0xff] %v7402_v12  ;;  %v8240_v19 = vadd.f32 %v5155_v17, %v12103_v5  ;;  %v8368_v20 = vadd.f32 %v6920_v18, %v12105_v6  ;;  %v5157_v21 = vpop.f32.mrb[62].mxu0  ;;  %v6922_v22 = vpop.f32.mrb[62].mxu1 }
 0x590   :  { %v8241_v23 = vadd.f32 %v5157_v21, %v12099_v3  ;;  %v8369_v24 = vadd.f32 %v6922_v22, %v12101_v4  ;;  %v5159_v25 = vpop.f32.mrb[63].mxu0  ;;  %v6924_v26 = vpop.f32.mrb[63].mxu1  ;;  %v7207_v29 = vmax.f32 %v8239_v15, 0.0  ;;  %v7209_v30 = vmax.f32 %v8367_v16, 0.0 }
 0x591   :  { %v8242_v27 = vadd.f32 %v5159_v25, %v12103_v5  ;;  %v8370_v28 = vadd.f32 %v6924_v26, %v12105_v6  ;;  %v7208_v34 = vmax.f32 %v8240_v19, 0.0  ;;  %v7210_v35 = vmax.f32 %v8368_v20, 0.0 }
 0x592   :  { %v7211_v31 = vmax.f32 %v8241_v23, 0.0  ;;  %v7213_v33 = vmax.f32 %v8369_v24, 0.0 }
 0x593   :  { %v7212_v36 = vmax.f32 %v8242_v27, 0.0  ;;  %v7214_v37 = vmax.f32 %v8370_v28, 0.0 }
 0x594   :  { %v7403_v38 = vpack.c.bf16 %v7211_v31, %v7207_v29  ;;  %v7405_v39 = vpack.c.bf16 %v7213_v33, %v7209_v30 }
 0x595   :  { %v7404_v40 = vpack.c.bf16 %v7212_v36, %v7208_v34  ;;  %v7406_v41 = vpack.c.bf16 %v7214_v37, %v7210_v35  ;;  %v5163_v42 = vpop.f32.mrb[64].mxu0  ;;  %v6928_v43 = vpop.f32.mrb[64].mxu1 }
 0x596   :  { %7531 = vst [vmem:[%s12775_s3 + $0x1e0] sm:$0xff] %v7403_v38  ;;  %7533 = vst [vmem:[%s12775_s3 + $0x1f0] sm:$0xff] %v7405_v39  ;;  %v8243_v44 = vadd.f32 %v5163_v42, %v12099_v3  ;;  %v8371_v45 = vadd.f32 %v6928_v43, %v12101_v4  ;;  %v5165_v46 = vpop.f32.mrb[65].mxu0  ;;  %v6930_v47 = vpop.f32.mrb[65].mxu1 }
 0x597   :  { %7532 = vst [vmem:[%s12775_s3 + $0x1e8] sm:$0xff] %v7404_v40  ;;  %7534 = vst [vmem:[%s12775_s3 + $0x1f8] sm:$0xff] %v7406_v41  ;;  %v8244_v48 = vadd.f32 %v5165_v46, %v12103_v5  ;;  %v8372_v49 = vadd.f32 %v6930_v47, %v12105_v6  ;;  %v5167_v50 = vpop.f32.mrb[66].mxu0  ;;  %v6932_v51 = vpop.f32.mrb[66].mxu1 }
 0x598   :  { %v8245_v52 = vadd.f32 %v5167_v50, %v12099_v3  ;;  %v8373_v53 = vadd.f32 %v6932_v51, %v12101_v4  ;;  %v5169_v54 = vpop.f32.mrb[67].mxu0  ;;  %v6934_v55 = vpop.f32.mrb[67].mxu1  ;;  %v7215_v58 = vmax.f32 %v8243_v44, 0.0  ;;  %v7217_v59 = vmax.f32 %v8371_v45, 0.0 }
 0x599   :  { %v8246_v56 = vadd.f32 %v5169_v54, %v12103_v5  ;;  %v8374_v57 = vadd.f32 %v6934_v55, %v12105_v6  ;;  %v7216_v62 = vmax.f32 %v8244_v48, 0.0  ;;  %v7218_v63 = vmax.f32 %v8372_v49, 0.0 }
 0x59a   :  { %v7219_v60 = vmax.f32 %v8245_v52, 0.0  ;;  %v7221_v61 = vmax.f32 %v8373_v53, 0.0 }
 0x59b   :  { %v7220_v0 = vmax.f32 %v8246_v56, 0.0  ;;  %v7222_v1 = vmax.f32 %v8374_v57, 0.0 }
 0x59c   :  { %v7407_v2 = vpack.c.bf16 %v7219_v60, %v7215_v58  ;;  %v7409_v7 = vpack.c.bf16 %v7221_v61, %v7217_v59 }
 0x59d   :  { %v7408_v8 = vpack.c.bf16 %v7220_v0, %v7216_v62  ;;  %v7410_v9 = vpack.c.bf16 %v7222_v1, %v7218_v63  ;;  %v5173_v32 = vpop.f32.mrb[68].mxu0  ;;  %v6938_v10 = vpop.f32.mrb[68].mxu1 }
 0x59e   :  { %7535 = vst [vmem:[%s12775_s3 + $0x200] sm:$0xff] %v7407_v2  ;;  %7537 = vst [vmem:[%s12775_s3 + $0x210] sm:$0xff] %v7409_v7  ;;  %v8247_v11 = vadd.f32 %v5173_v32, %v12099_v3  ;;  %v8375_v12 = vadd.f32 %v6938_v10, %v12101_v4  ;;  %v5175_v13 = vpop.f32.mrb[69].mxu0  ;;  %v6940_v14 = vpop.f32.mrb[69].mxu1 }
 0x59f   :  { %7536 = vst [vmem:[%s12775_s3 + $0x208] sm:$0xff] %v7408_v8  ;;  %7538 = vst [vmem:[%s12775_s3 + $0x218] sm:$0xff] %v7410_v9  ;;  %v8248_v15 = vadd.f32 %v5175_v13, %v12103_v5  ;;  %v8376_v16 = vadd.f32 %v6940_v14, %v12105_v6  ;;  %v5177_v17 = vpop.f32.mrb[70].mxu0  ;;  %v6942_v18 = vpop.f32.mrb[70].mxu1 }
 0x5a0   :  { %v8249_v19 = vadd.f32 %v5177_v17, %v12099_v3  ;;  %v8377_v20 = vadd.f32 %v6942_v18, %v12101_v4  ;;  %v5179_v21 = vpop.f32.mrb[71].mxu0  ;;  %v6944_v22 = vpop.f32.mrb[71].mxu1  ;;  %v7223_v25 = vmax.f32 %v8247_v11, 0.0  ;;  %v7225_v26 = vmax.f32 %v8375_v12, 0.0 }
 0x5a1   :  { %v8250_v23 = vadd.f32 %v5179_v21, %v12103_v5  ;;  %v8378_v24 = vadd.f32 %v6944_v22, %v12105_v6  ;;  %v7224_v29 = vmax.f32 %v8248_v15, 0.0  ;;  %v7226_v30 = vmax.f32 %v8376_v16, 0.0 }
 0x5a2   :  { %v7227_v27 = vmax.f32 %v8249_v19, 0.0  ;;  %v7229_v28 = vmax.f32 %v8377_v20, 0.0 }
 0x5a3   :  { %v7228_v31 = vmax.f32 %v8250_v23, 0.0  ;;  %v7230_v33 = vmax.f32 %v8378_v24, 0.0 }
 0x5a4   :  { %v7411_v34 = vpack.c.bf16 %v7227_v27, %v7223_v25  ;;  %v7413_v35 = vpack.c.bf16 %v7229_v28, %v7225_v26 }
 0x5a5   :  { %v7412_v36 = vpack.c.bf16 %v7228_v31, %v7224_v29  ;;  %v7414_v37 = vpack.c.bf16 %v7230_v33, %v7226_v30  ;;  %v5183_v38 = vpop.f32.mrb[72].mxu0  ;;  %v6948_v39 = vpop.f32.mrb[72].mxu1 }
 0x5a6   :  { %7539 = vst [vmem:[%s12775_s3 + $0x220] sm:$0xff] %v7411_v34  ;;  %7541 = vst [vmem:[%s12775_s3 + $0x230] sm:$0xff] %v7413_v35  ;;  %v8251_v40 = vadd.f32 %v5183_v38, %v12099_v3  ;;  %v8379_v41 = vadd.f32 %v6948_v39, %v12101_v4  ;;  %v5185_v42 = vpop.f32.mrb[73].mxu0  ;;  %v6950_v43 = vpop.f32.mrb[73].mxu1 }
 0x5a7   :  { %7540 = vst [vmem:[%s12775_s3 + $0x228] sm:$0xff] %v7412_v36  ;;  %7542 = vst [vmem:[%s12775_s3 + $0x238] sm:$0xff] %v7414_v37  ;;  %v8252_v44 = vadd.f32 %v5185_v42, %v12103_v5  ;;  %v8380_v45 = vadd.f32 %v6950_v43, %v12105_v6  ;;  %v5187_v46 = vpop.f32.mrb[74].mxu0  ;;  %v6952_v47 = vpop.f32.mrb[74].mxu1 }
 0x5a8   :  { %v8253_v48 = vadd.f32 %v5187_v46, %v12099_v3  ;;  %v8381_v49 = vadd.f32 %v6952_v47, %v12101_v4  ;;  %v5189_v50 = vpop.f32.mrb[75].mxu0  ;;  %v6954_v51 = vpop.f32.mrb[75].mxu1  ;;  %v7231_v54 = vmax.f32 %v8251_v40, 0.0  ;;  %v7233_v55 = vmax.f32 %v8379_v41, 0.0 }
 0x5a9   :  { %v8254_v52 = vadd.f32 %v5189_v50, %v12103_v5  ;;  %v8382_v53 = vadd.f32 %v6954_v51, %v12105_v6  ;;  %v7232_v58 = vmax.f32 %v8252_v44, 0.0  ;;  %v7234_v59 = vmax.f32 %v8380_v45, 0.0 }
 0x5aa   :  { %v7235_v56 = vmax.f32 %v8253_v48, 0.0  ;;  %v7237_v57 = vmax.f32 %v8381_v49, 0.0 }
 0x5ab   :  { %v7236_v60 = vmax.f32 %v8254_v52, 0.0  ;;  %v7238_v61 = vmax.f32 %v8382_v53, 0.0 }
 0x5ac   :  { %v7415_v62 = vpack.c.bf16 %v7235_v56, %v7231_v54  ;;  %v7417_v63 = vpack.c.bf16 %v7237_v57, %v7233_v55 }
 0x5ad   :  { %v7416_v0 = vpack.c.bf16 %v7236_v60, %v7232_v58  ;;  %v7418_v1 = vpack.c.bf16 %v7238_v61, %v7234_v59  ;;  %v5193_v2 = vpop.f32.mrb[76].mxu0  ;;  %v6958_v7 = vpop.f32.mrb[76].mxu1 }
 0x5ae   :  { %7543 = vst [vmem:[%s12775_s3 + $0x240] sm:$0xff] %v7415_v62  ;;  %7545 = vst [vmem:[%s12775_s3 + $0x250] sm:$0xff] %v7417_v63  ;;  %v8255_v8 = vadd.f32 %v5193_v2, %v12099_v3  ;;  %v8383_v9 = vadd.f32 %v6958_v7, %v12101_v4  ;;  %v5195_v32 = vpop.f32.mrb[77].mxu0  ;;  %v6960_v10 = vpop.f32.mrb[77].mxu1 }
 0x5af   :  { %7544 = vst [vmem:[%s12775_s3 + $0x248] sm:$0xff] %v7416_v0  ;;  %7546 = vst [vmem:[%s12775_s3 + $0x258] sm:$0xff] %v7418_v1  ;;  %v8256_v11 = vadd.f32 %v5195_v32, %v12103_v5  ;;  %v8384_v12 = vadd.f32 %v6960_v10, %v12105_v6  ;;  %v5197_v13 = vpop.f32.mrb[78].mxu0  ;;  %v6962_v14 = vpop.f32.mrb[78].mxu1 }
 0x5b0   :  { %v8257_v15 = vadd.f32 %v5197_v13, %v12099_v3  ;;  %v8385_v16 = vadd.f32 %v6962_v14, %v12101_v4  ;;  %v5199_v17 = vpop.f32.mrb[79].mxu0  ;;  %v6964_v18 = vpop.f32.mrb[79].mxu1  ;;  %v7239_v21 = vmax.f32 %v8255_v8, 0.0  ;;  %v7241_v22 = vmax.f32 %v8383_v9, 0.0 }
 0x5b1   :  { %v8258_v19 = vadd.f32 %v5199_v17, %v12103_v5  ;;  %v8386_v20 = vadd.f32 %v6964_v18, %v12105_v6  ;;  %v7240_v25 = vmax.f32 %v8256_v11, 0.0  ;;  %v7242_v26 = vmax.f32 %v8384_v12, 0.0 }
 0x5b2   :  { %v7243_v23 = vmax.f32 %v8257_v15, 0.0  ;;  %v7245_v24 = vmax.f32 %v8385_v16, 0.0 }
 0x5b3   :  { %v7244_v27 = vmax.f32 %v8258_v19, 0.0  ;;  %v7246_v28 = vmax.f32 %v8386_v20, 0.0 }
 0x5b4   :  { %v7419_v29 = vpack.c.bf16 %v7243_v23, %v7239_v21  ;;  %v7421_v30 = vpack.c.bf16 %v7245_v24, %v7241_v22 }
 0x5b5   :  { %v7420_v31 = vpack.c.bf16 %v7244_v27, %v7240_v25  ;;  %v7422_v33 = vpack.c.bf16 %v7246_v28, %v7242_v26  ;;  %v5203_v34 = vpop.f32.mrb[80].mxu0  ;;  %v6968_v35 = vpop.f32.mrb[80].mxu1 }
 0x5b6   :  { %7547 = vst [vmem:[%s12775_s3 + $0x260] sm:$0xff] %v7419_v29  ;;  %7549 = vst [vmem:[%s12775_s3 + $0x270] sm:$0xff] %v7421_v30  ;;  %v8259_v36 = vadd.f32 %v5203_v34, %v12099_v3  ;;  %v8387_v37 = vadd.f32 %v6968_v35, %v12101_v4  ;;  %v5205_v38 = vpop.f32.mrb[81].mxu0  ;;  %v6970_v39 = vpop.f32.mrb[81].mxu1 }
 0x5b7   :  { %7548 = vst [vmem:[%s12775_s3 + $0x268] sm:$0xff] %v7420_v31  ;;  %7550 = vst [vmem:[%s12775_s3 + $0x278] sm:$0xff] %v7422_v33  ;;  %v8260_v40 = vadd.f32 %v5205_v38, %v12103_v5  ;;  %v8388_v41 = vadd.f32 %v6970_v39, %v12105_v6  ;;  %v5207_v42 = vpop.f32.mrb[82].mxu0  ;;  %v6972_v43 = vpop.f32.mrb[82].mxu1 }
 0x5b8   :  { %v8261_v44 = vadd.f32 %v5207_v42, %v12099_v3  ;;  %v8389_v45 = vadd.f32 %v6972_v43, %v12101_v4  ;;  %v5209_v46 = vpop.f32.mrb[83].mxu0  ;;  %v6974_v47 = vpop.f32.mrb[83].mxu1  ;;  %v7247_v50 = vmax.f32 %v8259_v36, 0.0  ;;  %v7249_v51 = vmax.f32 %v8387_v37, 0.0 }
 0x5b9   :  { %v8262_v48 = vadd.f32 %v5209_v46, %v12103_v5  ;;  %v8390_v49 = vadd.f32 %v6974_v47, %v12105_v6  ;;  %v7248_v54 = vmax.f32 %v8260_v40, 0.0  ;;  %v7250_v55 = vmax.f32 %v8388_v41, 0.0 }
 0x5ba   :  { %v7251_v52 = vmax.f32 %v8261_v44, 0.0  ;;  %v7253_v53 = vmax.f32 %v8389_v45, 0.0 }
 0x5bb   :  { %v7252_v56 = vmax.f32 %v8262_v48, 0.0  ;;  %v7254_v57 = vmax.f32 %v8390_v49, 0.0 }
 0x5bc   :  { %v7423_v58 = vpack.c.bf16 %v7251_v52, %v7247_v50  ;;  %v7425_v59 = vpack.c.bf16 %v7253_v53, %v7249_v51 }
 0x5bd   :  { %v7424_v60 = vpack.c.bf16 %v7252_v56, %v7248_v54  ;;  %v7426_v61 = vpack.c.bf16 %v7254_v57, %v7250_v55  ;;  %v5213_v62 = vpop.f32.mrb[84].mxu0  ;;  %v6978_v63 = vpop.f32.mrb[84].mxu1 }
 0x5be   :  { %7551 = vst [vmem:[%s12775_s3 + $0x280] sm:$0xff] %v7423_v58  ;;  %7553 = vst [vmem:[%s12775_s3 + $0x290] sm:$0xff] %v7425_v59  ;;  %v8263_v0 = vadd.f32 %v5213_v62, %v12099_v3  ;;  %v8391_v1 = vadd.f32 %v6978_v63, %v12101_v4  ;;  %v5215_v2 = vpop.f32.mrb[85].mxu0  ;;  %v6980_v7 = vpop.f32.mrb[85].mxu1 }
 0x5bf   :  { %7552 = vst [vmem:[%s12775_s3 + $0x288] sm:$0xff] %v7424_v60  ;;  %7554 = vst [vmem:[%s12775_s3 + $0x298] sm:$0xff] %v7426_v61  ;;  %v8264_v8 = vadd.f32 %v5215_v2, %v12103_v5  ;;  %v8392_v9 = vadd.f32 %v6980_v7, %v12105_v6  ;;  %v5217_v32 = vpop.f32.mrb[86].mxu0  ;;  %v6982_v10 = vpop.f32.mrb[86].mxu1 }
 0x5c0   :  { %v8265_v11 = vadd.f32 %v5217_v32, %v12099_v3  ;;  %v8393_v12 = vadd.f32 %v6982_v10, %v12101_v4  ;;  %v5219_v13 = vpop.f32.mrb[87].mxu0  ;;  %v6984_v14 = vpop.f32.mrb[87].mxu1  ;;  %v7255_v17 = vmax.f32 %v8263_v0, 0.0  ;;  %v7257_v18 = vmax.f32 %v8391_v1, 0.0 }
 0x5c1   :  { %v8266_v15 = vadd.f32 %v5219_v13, %v12103_v5  ;;  %v8394_v16 = vadd.f32 %v6984_v14, %v12105_v6  ;;  %v7256_v21 = vmax.f32 %v8264_v8, 0.0  ;;  %v7258_v22 = vmax.f32 %v8392_v9, 0.0 }
 0x5c2   :  { %v7259_v19 = vmax.f32 %v8265_v11, 0.0  ;;  %v7261_v20 = vmax.f32 %v8393_v12, 0.0 }
 0x5c3   :  { %v7260_v23 = vmax.f32 %v8266_v15, 0.0  ;;  %v7262_v24 = vmax.f32 %v8394_v16, 0.0 }
 0x5c4   :  { %v7427_v25 = vpack.c.bf16 %v7259_v19, %v7255_v17  ;;  %v7429_v26 = vpack.c.bf16 %v7261_v20, %v7257_v18 }
 0x5c5   :  { %v7428_v27 = vpack.c.bf16 %v7260_v23, %v7256_v21  ;;  %v7430_v28 = vpack.c.bf16 %v7262_v24, %v7258_v22  ;;  %v5223_v29 = vpop.f32.mrb[88].mxu0  ;;  %v6988_v30 = vpop.f32.mrb[88].mxu1 }
 0x5c6   :  { %7555 = vst [vmem:[%s12775_s3 + $0x2a0] sm:$0xff] %v7427_v25  ;;  %7557 = vst [vmem:[%s12775_s3 + $0x2b0] sm:$0xff] %v7429_v26  ;;  %v8267_v31 = vadd.f32 %v5223_v29, %v12099_v3  ;;  %v8395_v33 = vadd.f32 %v6988_v30, %v12101_v4  ;;  %v5225_v34 = vpop.f32.mrb[89].mxu0  ;;  %v6990_v35 = vpop.f32.mrb[89].mxu1 }
 0x5c7   :  { %7556 = vst [vmem:[%s12775_s3 + $0x2a8] sm:$0xff] %v7428_v27  ;;  %7558 = vst [vmem:[%s12775_s3 + $0x2b8] sm:$0xff] %v7430_v28  ;;  %v8268_v36 = vadd.f32 %v5225_v34, %v12103_v5  ;;  %v8396_v37 = vadd.f32 %v6990_v35, %v12105_v6  ;;  %v5227_v38 = vpop.f32.mrb[90].mxu0  ;;  %v6992_v39 = vpop.f32.mrb[90].mxu1 }
 0x5c8   :  { %v8269_v40 = vadd.f32 %v5227_v38, %v12099_v3  ;;  %v8397_v41 = vadd.f32 %v6992_v39, %v12101_v4  ;;  %v5229_v42 = vpop.f32.mrb[91].mxu0  ;;  %v6994_v43 = vpop.f32.mrb[91].mxu1  ;;  %v7263_v46 = vmax.f32 %v8267_v31, 0.0  ;;  %v7265_v47 = vmax.f32 %v8395_v33, 0.0 }
 0x5c9   :  { %v8270_v44 = vadd.f32 %v5229_v42, %v12103_v5  ;;  %v8398_v45 = vadd.f32 %v6994_v43, %v12105_v6  ;;  %v7264_v50 = vmax.f32 %v8268_v36, 0.0  ;;  %v7266_v51 = vmax.f32 %v8396_v37, 0.0 }
 0x5ca   :  { %v7267_v48 = vmax.f32 %v8269_v40, 0.0  ;;  %v7269_v49 = vmax.f32 %v8397_v41, 0.0 }
 0x5cb   :  { %v7268_v52 = vmax.f32 %v8270_v44, 0.0  ;;  %v7270_v53 = vmax.f32 %v8398_v45, 0.0 }
 0x5cc   :  { %v7431_v54 = vpack.c.bf16 %v7267_v48, %v7263_v46  ;;  %v7433_v55 = vpack.c.bf16 %v7269_v49, %v7265_v47 }
 0x5cd   :  { %v7432_v56 = vpack.c.bf16 %v7268_v52, %v7264_v50  ;;  %v7434_v57 = vpack.c.bf16 %v7270_v53, %v7266_v51  ;;  %v5233_v58 = vpop.f32.mrb[92].mxu0  ;;  %v6998_v59 = vpop.f32.mrb[92].mxu1 }
 0x5ce   :  { %7559 = vst [vmem:[%s12775_s3 + $0x2c0] sm:$0xff] %v7431_v54  ;;  %7561 = vst [vmem:[%s12775_s3 + $0x2d0] sm:$0xff] %v7433_v55  ;;  %v8271_v60 = vadd.f32 %v5233_v58, %v12099_v3  ;;  %v8399_v61 = vadd.f32 %v6998_v59, %v12101_v4  ;;  %v5235_v62 = vpop.f32.mrb[93].mxu0  ;;  %v7000_v63 = vpop.f32.mrb[93].mxu1 }
 0x5cf   :  { %7560 = vst [vmem:[%s12775_s3 + $0x2c8] sm:$0xff] %v7432_v56  ;;  %7562 = vst [vmem:[%s12775_s3 + $0x2d8] sm:$0xff] %v7434_v57  ;;  %v8272_v0 = vadd.f32 %v5235_v62, %v12103_v5  ;;  %v8400_v1 = vadd.f32 %v7000_v63, %v12105_v6  ;;  %v5237_v2 = vpop.f32.mrb[94].mxu0  ;;  %v7002_v7 = vpop.f32.mrb[94].mxu1 }
 0x5d0   :  { %v8273_v8 = vadd.f32 %v5237_v2, %v12099_v3  ;;  %v8401_v9 = vadd.f32 %v7002_v7, %v12101_v4  ;;  %v5239_v32 = vpop.f32.mrb[95].mxu0  ;;  %v7004_v10 = vpop.f32.mrb[95].mxu1  ;;  %v7271_v13 = vmax.f32 %v8271_v60, 0.0  ;;  %v7273_v14 = vmax.f32 %v8399_v61, 0.0 }
 0x5d1   :  { %v8274_v11 = vadd.f32 %v5239_v32, %v12103_v5  ;;  %v8402_v12 = vadd.f32 %v7004_v10, %v12105_v6  ;;  %v7272_v17 = vmax.f32 %v8272_v0, 0.0  ;;  %v7274_v18 = vmax.f32 %v8400_v1, 0.0 }
 0x5d2   :  { %v7275_v15 = vmax.f32 %v8273_v8, 0.0  ;;  %v7277_v16 = vmax.f32 %v8401_v9, 0.0 }
 0x5d3   :  { %v7276_v19 = vmax.f32 %v8274_v11, 0.0  ;;  %v7278_v20 = vmax.f32 %v8402_v12, 0.0 }
 0x5d4   :  { %v7435_v21 = vpack.c.bf16 %v7275_v15, %v7271_v13  ;;  %v7437_v22 = vpack.c.bf16 %v7277_v16, %v7273_v14 }
 0x5d5   :  { %v7436_v23 = vpack.c.bf16 %v7276_v19, %v7272_v17  ;;  %v7438_v24 = vpack.c.bf16 %v7278_v20, %v7274_v18  ;;  %v5243_v25 = vpop.f32.mrb[96].mxu0  ;;  %v7008_v26 = vpop.f32.mrb[96].mxu1 }
 0x5d6   :  { %7563 = vst [vmem:[%s12775_s3 + $0x2e0] sm:$0xff] %v7435_v21  ;;  %7565 = vst [vmem:[%s12775_s3 + $0x2f0] sm:$0xff] %v7437_v22  ;;  %v8275_v27 = vadd.f32 %v5243_v25, %v12099_v3  ;;  %v8403_v28 = vadd.f32 %v7008_v26, %v12101_v4  ;;  %v5245_v29 = vpop.f32.mrb[97].mxu0  ;;  %v7010_v30 = vpop.f32.mrb[97].mxu1 }
 0x5d7   :  { %7564 = vst [vmem:[%s12775_s3 + $0x2e8] sm:$0xff] %v7436_v23  ;;  %7566 = vst [vmem:[%s12775_s3 + $0x2f8] sm:$0xff] %v7438_v24  ;;  %v8276_v31 = vadd.f32 %v5245_v29, %v12103_v5  ;;  %v8404_v33 = vadd.f32 %v7010_v30, %v12105_v6  ;;  %v5247_v34 = vpop.f32.mrb[98].mxu0  ;;  %v7012_v35 = vpop.f32.mrb[98].mxu1 }
 0x5d8   :  { %v8277_v36 = vadd.f32 %v5247_v34, %v12099_v3  ;;  %v8405_v37 = vadd.f32 %v7012_v35, %v12101_v4  ;;  %v5249_v38 = vpop.f32.mrb[99].mxu0  ;;  %v7014_v39 = vpop.f32.mrb[99].mxu1  ;;  %v7279_v42 = vmax.f32 %v8275_v27, 0.0  ;;  %v7281_v43 = vmax.f32 %v8403_v28, 0.0 }
 0x5d9   :  { %v8278_v40 = vadd.f32 %v5249_v38, %v12103_v5  ;;  %v8406_v41 = vadd.f32 %v7014_v39, %v12105_v6  ;;  %v7280_v46 = vmax.f32 %v8276_v31, 0.0  ;;  %v7282_v47 = vmax.f32 %v8404_v33, 0.0 }
 0x5da   :  { %v7283_v44 = vmax.f32 %v8277_v36, 0.0  ;;  %v7285_v45 = vmax.f32 %v8405_v37, 0.0 }
 0x5db   :  { %v7284_v48 = vmax.f32 %v8278_v40, 0.0  ;;  %v7286_v49 = vmax.f32 %v8406_v41, 0.0 }
 0x5dc   :  { %v7439_v50 = vpack.c.bf16 %v7283_v44, %v7279_v42  ;;  %v7441_v51 = vpack.c.bf16 %v7285_v45, %v7281_v43 }
 0x5dd   :  { %v7440_v52 = vpack.c.bf16 %v7284_v48, %v7280_v46  ;;  %v7442_v53 = vpack.c.bf16 %v7286_v49, %v7282_v47  ;;  %v5253_v54 = vpop.f32.mrb[100].mxu0  ;;  %v7018_v55 = vpop.f32.mrb[100].mxu1 }
 0x5de   :  { %7567 = vst [vmem:[%s12775_s3 + $0x300] sm:$0xff] %v7439_v50  ;;  %7569 = vst [vmem:[%s12775_s3 + $0x310] sm:$0xff] %v7441_v51  ;;  %v8279_v56 = vadd.f32 %v5253_v54, %v12099_v3  ;;  %v8407_v57 = vadd.f32 %v7018_v55, %v12101_v4  ;;  %v5255_v58 = vpop.f32.mrb[101].mxu0  ;;  %v7020_v59 = vpop.f32.mrb[101].mxu1 }
 0x5df   :  { %7568 = vst [vmem:[%s12775_s3 + $0x308] sm:$0xff] %v7440_v52  ;;  %7570 = vst [vmem:[%s12775_s3 + $0x318] sm:$0xff] %v7442_v53  ;;  %v8280_v60 = vadd.f32 %v5255_v58, %v12103_v5  ;;  %v8408_v61 = vadd.f32 %v7020_v59, %v12105_v6  ;;  %v5257_v62 = vpop.f32.mrb[102].mxu0  ;;  %v7022_v63 = vpop.f32.mrb[102].mxu1 }
 0x5e0   :  { %v8281_v0 = vadd.f32 %v5257_v62, %v12099_v3  ;;  %v8409_v1 = vadd.f32 %v7022_v63, %v12101_v4  ;;  %v5259_v2 = vpop.f32.mrb[103].mxu0  ;;  %v7024_v7 = vpop.f32.mrb[103].mxu1  ;;  %v7287_v32 = vmax.f32 %v8279_v56, 0.0  ;;  %v7289_v10 = vmax.f32 %v8407_v57, 0.0 }
 0x5e1   :  { %v8282_v8 = vadd.f32 %v5259_v2, %v12103_v5  ;;  %v8410_v9 = vadd.f32 %v7024_v7, %v12105_v6  ;;  %v7288_v13 = vmax.f32 %v8280_v60, 0.0  ;;  %v7290_v14 = vmax.f32 %v8408_v61, 0.0 }
 0x5e2   :  { %v7291_v11 = vmax.f32 %v8281_v0, 0.0  ;;  %v7293_v12 = vmax.f32 %v8409_v1, 0.0 }
 0x5e3   :  { %v7292_v15 = vmax.f32 %v8282_v8, 0.0  ;;  %v7294_v16 = vmax.f32 %v8410_v9, 0.0 }
 0x5e4   :  { %v7443_v17 = vpack.c.bf16 %v7291_v11, %v7287_v32  ;;  %v7445_v18 = vpack.c.bf16 %v7293_v12, %v7289_v10 }
 0x5e5   :  { %v7444_v19 = vpack.c.bf16 %v7292_v15, %v7288_v13  ;;  %v7446_v20 = vpack.c.bf16 %v7294_v16, %v7290_v14  ;;  %v5263_v21 = vpop.f32.mrb[104].mxu0  ;;  %v7028_v22 = vpop.f32.mrb[104].mxu1 }
 0x5e6   :  { %7571 = vst [vmem:[%s12775_s3 + $0x320] sm:$0xff] %v7443_v17  ;;  %7573 = vst [vmem:[%s12775_s3 + $0x330] sm:$0xff] %v7445_v18  ;;  %v8283_v23 = vadd.f32 %v5263_v21, %v12099_v3  ;;  %v8411_v24 = vadd.f32 %v7028_v22, %v12101_v4  ;;  %v5265_v25 = vpop.f32.mrb[105].mxu0  ;;  %v7030_v26 = vpop.f32.mrb[105].mxu1 }
 0x5e7   :  { %7572 = vst [vmem:[%s12775_s3 + $0x328] sm:$0xff] %v7444_v19  ;;  %7574 = vst [vmem:[%s12775_s3 + $0x338] sm:$0xff] %v7446_v20  ;;  %v8284_v27 = vadd.f32 %v5265_v25, %v12103_v5  ;;  %v8412_v28 = vadd.f32 %v7030_v26, %v12105_v6  ;;  %v5267_v29 = vpop.f32.mrb[106].mxu0  ;;  %v7032_v30 = vpop.f32.mrb[106].mxu1 }
 0x5e8   :  { %v8285_v31 = vadd.f32 %v5267_v29, %v12099_v3  ;;  %v8413_v33 = vadd.f32 %v7032_v30, %v12101_v4  ;;  %v5269_v34 = vpop.f32.mrb[107].mxu0  ;;  %v7034_v35 = vpop.f32.mrb[107].mxu1  ;;  %v7295_v38 = vmax.f32 %v8283_v23, 0.0  ;;  %v7297_v39 = vmax.f32 %v8411_v24, 0.0 }
 0x5e9   :  { %v8286_v36 = vadd.f32 %v5269_v34, %v12103_v5  ;;  %v8414_v37 = vadd.f32 %v7034_v35, %v12105_v6  ;;  %v7296_v42 = vmax.f32 %v8284_v27, 0.0  ;;  %v7298_v43 = vmax.f32 %v8412_v28, 0.0 }
 0x5ea   :  { %v7299_v40 = vmax.f32 %v8285_v31, 0.0  ;;  %v7301_v41 = vmax.f32 %v8413_v33, 0.0 }
 0x5eb   :  { %v7300_v44 = vmax.f32 %v8286_v36, 0.0  ;;  %v7302_v45 = vmax.f32 %v8414_v37, 0.0 }
 0x5ec   :  { %v7447_v46 = vpack.c.bf16 %v7299_v40, %v7295_v38  ;;  %v7449_v47 = vpack.c.bf16 %v7301_v41, %v7297_v39 }
 0x5ed   :  { %v7448_v48 = vpack.c.bf16 %v7300_v44, %v7296_v42  ;;  %v7450_v49 = vpack.c.bf16 %v7302_v45, %v7298_v43  ;;  %v5273_v50 = vpop.f32.mrb[108].mxu0  ;;  %v7038_v51 = vpop.f32.mrb[108].mxu1 }
 0x5ee   :  { %7575 = vst [vmem:[%s12775_s3 + $0x340] sm:$0xff] %v7447_v46  ;;  %7577 = vst [vmem:[%s12775_s3 + $0x350] sm:$0xff] %v7449_v47  ;;  %v8287_v52 = vadd.f32 %v5273_v50, %v12099_v3  ;;  %v8415_v53 = vadd.f32 %v7038_v51, %v12101_v4  ;;  %v5275_v54 = vpop.f32.mrb[109].mxu0  ;;  %v7040_v55 = vpop.f32.mrb[109].mxu1 }
 0x5ef   :  { %7576 = vst [vmem:[%s12775_s3 + $0x348] sm:$0xff] %v7448_v48  ;;  %7578 = vst [vmem:[%s12775_s3 + $0x358] sm:$0xff] %v7450_v49  ;;  %v8288_v56 = vadd.f32 %v5275_v54, %v12103_v5  ;;  %v8416_v57 = vadd.f32 %v7040_v55, %v12105_v6  ;;  %v5277_v58 = vpop.f32.mrb[110].mxu0  ;;  %v7042_v59 = vpop.f32.mrb[110].mxu1 }
 0x5f0   :  { %v8289_v60 = vadd.f32 %v5277_v58, %v12099_v3  ;;  %v8417_v61 = vadd.f32 %v7042_v59, %v12101_v4  ;;  %v5279_v62 = vpop.f32.mrb[111].mxu0  ;;  %v7044_v63 = vpop.f32.mrb[111].mxu1  ;;  %v7303_v2 = vmax.f32 %v8287_v52, 0.0  ;;  %v7305_v7 = vmax.f32 %v8415_v53, 0.0 }
 0x5f1   :  { %v8290_v0 = vadd.f32 %v5279_v62, %v12103_v5  ;;  %v8418_v1 = vadd.f32 %v7044_v63, %v12105_v6  ;;  %v7304_v32 = vmax.f32 %v8288_v56, 0.0  ;;  %v7306_v10 = vmax.f32 %v8416_v57, 0.0 }
 0x5f2   :  { %v7307_v8 = vmax.f32 %v8289_v60, 0.0  ;;  %v7309_v9 = vmax.f32 %v8417_v61, 0.0 }
 0x5f3   :  { %v7308_v11 = vmax.f32 %v8290_v0, 0.0  ;;  %v7310_v12 = vmax.f32 %v8418_v1, 0.0 }
 0x5f4   :  { %v7451_v13 = vpack.c.bf16 %v7307_v8, %v7303_v2  ;;  %v7453_v14 = vpack.c.bf16 %v7309_v9, %v7305_v7 }
 0x5f5   :  { %v7452_v15 = vpack.c.bf16 %v7308_v11, %v7304_v32  ;;  %v7454_v16 = vpack.c.bf16 %v7310_v12, %v7306_v10  ;;  %v5283_v17 = vpop.f32.mrb[112].mxu0  ;;  %v7048_v18 = vpop.f32.mrb[112].mxu1 }
 0x5f6   :  { %7579 = vst [vmem:[%s12775_s3 + $0x360] sm:$0xff] %v7451_v13  ;;  %7581 = vst [vmem:[%s12775_s3 + $0x370] sm:$0xff] %v7453_v14  ;;  %v8291_v19 = vadd.f32 %v5283_v17, %v12099_v3  ;;  %v8419_v20 = vadd.f32 %v7048_v18, %v12101_v4  ;;  %v5285_v21 = vpop.f32.mrb[113].mxu0  ;;  %v7050_v22 = vpop.f32.mrb[113].mxu1 }
 0x5f7   :  { %7580 = vst [vmem:[%s12775_s3 + $0x368] sm:$0xff] %v7452_v15  ;;  %7582 = vst [vmem:[%s12775_s3 + $0x378] sm:$0xff] %v7454_v16  ;;  %v8292_v23 = vadd.f32 %v5285_v21, %v12103_v5  ;;  %v8420_v24 = vadd.f32 %v7050_v22, %v12105_v6  ;;  %v5287_v25 = vpop.f32.mrb[114].mxu0  ;;  %v7052_v26 = vpop.f32.mrb[114].mxu1 }
 0x5f8   :  { %v8293_v27 = vadd.f32 %v5287_v25, %v12099_v3  ;;  %v8421_v28 = vadd.f32 %v7052_v26, %v12101_v4  ;;  %v5289_v29 = vpop.f32.mrb[115].mxu0  ;;  %v7054_v30 = vpop.f32.mrb[115].mxu1  ;;  %v7311_v34 = vmax.f32 %v8291_v19, 0.0  ;;  %v7313_v35 = vmax.f32 %v8419_v20, 0.0 }
 0x5f9   :  { %v8294_v31 = vadd.f32 %v5289_v29, %v12103_v5  ;;  %v8422_v33 = vadd.f32 %v7054_v30, %v12105_v6  ;;  %v7312_v38 = vmax.f32 %v8292_v23, 0.0  ;;  %v7314_v39 = vmax.f32 %v8420_v24, 0.0 }
 0x5fa   :  { %v7315_v36 = vmax.f32 %v8293_v27, 0.0  ;;  %v7317_v37 = vmax.f32 %v8421_v28, 0.0 }
 0x5fb   :  { %v7316_v40 = vmax.f32 %v8294_v31, 0.0  ;;  %v7318_v41 = vmax.f32 %v8422_v33, 0.0 }
 0x5fc   :  { %v7455_v42 = vpack.c.bf16 %v7315_v36, %v7311_v34  ;;  %v7457_v43 = vpack.c.bf16 %v7317_v37, %v7313_v35 }
 0x5fd   :  { %v7456_v44 = vpack.c.bf16 %v7316_v40, %v7312_v38  ;;  %v7458_v45 = vpack.c.bf16 %v7318_v41, %v7314_v39  ;;  %v5293_v46 = vpop.f32.mrb[116].mxu0  ;;  %v7058_v47 = vpop.f32.mrb[116].mxu1 }
 0x5fe   :  { %7583 = vst [vmem:[%s12775_s3 + $0x380] sm:$0xff] %v7455_v42  ;;  %7585 = vst [vmem:[%s12775_s3 + $0x390] sm:$0xff] %v7457_v43  ;;  %v8295_v48 = vadd.f32 %v5293_v46, %v12099_v3  ;;  %v8423_v49 = vadd.f32 %v7058_v47, %v12101_v4  ;;  %v5295_v50 = vpop.f32.mrb[117].mxu0  ;;  %v7060_v51 = vpop.f32.mrb[117].mxu1 }
 0x5ff   :  { %7584 = vst [vmem:[%s12775_s3 + $0x388] sm:$0xff] %v7456_v44  ;;  %7586 = vst [vmem:[%s12775_s3 + $0x398] sm:$0xff] %v7458_v45  ;;  %v8296_v52 = vadd.f32 %v5295_v50, %v12103_v5  ;;  %v8424_v53 = vadd.f32 %v7060_v51, %v12105_v6  ;;  %v5297_v54 = vpop.f32.mrb[118].mxu0  ;;  %v7062_v55 = vpop.f32.mrb[118].mxu1 }
 0x600   :  { %v8297_v56 = vadd.f32 %v5297_v54, %v12099_v3  ;;  %v8425_v57 = vadd.f32 %v7062_v55, %v12101_v4  ;;  %v5299_v58 = vpop.f32.mrb[119].mxu0  ;;  %v7064_v59 = vpop.f32.mrb[119].mxu1  ;;  %v7319_v62 = vmax.f32 %v8295_v48, 0.0  ;;  %v7321_v63 = vmax.f32 %v8423_v49, 0.0 }
 0x601   :  { %v8298_v60 = vadd.f32 %v5299_v58, %v12103_v5  ;;  %v8426_v61 = vadd.f32 %v7064_v59, %v12105_v6  ;;  %v7320_v2 = vmax.f32 %v8296_v52, 0.0  ;;  %v7322_v7 = vmax.f32 %v8424_v53, 0.0 }
 0x602   :  { %v7323_v0 = vmax.f32 %v8297_v56, 0.0  ;;  %v7325_v1 = vmax.f32 %v8425_v57, 0.0 }
 0x603   :  { %v7324_v8 = vmax.f32 %v8298_v60, 0.0  ;;  %v7326_v9 = vmax.f32 %v8426_v61, 0.0 }
 0x604   :  { %v7459_v32 = vpack.c.bf16 %v7323_v0, %v7319_v62  ;;  %v7461_v10 = vpack.c.bf16 %v7325_v1, %v7321_v63 }
 0x605   :  { %v7460_v11 = vpack.c.bf16 %v7324_v8, %v7320_v2  ;;  %v7462_v12 = vpack.c.bf16 %v7326_v9, %v7322_v7  ;;  %v5303_v13 = vpop.f32.mrb[120].mxu0  ;;  %v7068_v14 = vpop.f32.mrb[120].mxu1 }
 0x606   :  { %7587 = vst [vmem:[%s12775_s3 + $0x3a0] sm:$0xff] %v7459_v32  ;;  %7589 = vst [vmem:[%s12775_s3 + $0x3b0] sm:$0xff] %v7461_v10  ;;  %v8299_v15 = vadd.f32 %v5303_v13, %v12099_v3  ;;  %v8427_v16 = vadd.f32 %v7068_v14, %v12101_v4  ;;  %v5305_v17 = vpop.f32.mrb[121].mxu0  ;;  %v7070_v18 = vpop.f32.mrb[121].mxu1 }
 0x607   :  { %7588 = vst [vmem:[%s12775_s3 + $0x3a8] sm:$0xff] %v7460_v11  ;;  %7590 = vst [vmem:[%s12775_s3 + $0x3b8] sm:$0xff] %v7462_v12  ;;  %v8300_v19 = vadd.f32 %v5305_v17, %v12103_v5  ;;  %v8428_v20 = vadd.f32 %v7070_v18, %v12105_v6  ;;  %v5307_v21 = vpop.f32.mrb[122].mxu0  ;;  %v7072_v22 = vpop.f32.mrb[122].mxu1 }
 0x608   :  { %v8301_v23 = vadd.f32 %v5307_v21, %v12099_v3  ;;  %v8429_v24 = vadd.f32 %v7072_v22, %v12101_v4  ;;  %v5309_v25 = vpop.f32.mrb[123].mxu0  ;;  %v7074_v26 = vpop.f32.mrb[123].mxu1  ;;  %v7327_v29 = vmax.f32 %v8299_v15, 0.0  ;;  %v7329_v30 = vmax.f32 %v8427_v16, 0.0 }
 0x609   :  { %v8302_v27 = vadd.f32 %v5309_v25, %v12103_v5  ;;  %v8430_v28 = vadd.f32 %v7074_v26, %v12105_v6  ;;  %v7328_v34 = vmax.f32 %v8300_v19, 0.0  ;;  %v7330_v35 = vmax.f32 %v8428_v20, 0.0 }
 0x60a   :  { %v7331_v31 = vmax.f32 %v8301_v23, 0.0  ;;  %v7333_v33 = vmax.f32 %v8429_v24, 0.0 }
 0x60b   :  { %v7332_v36 = vmax.f32 %v8302_v27, 0.0  ;;  %v7334_v37 = vmax.f32 %v8430_v28, 0.0 }
 0x60c   :  { %v7463_v38 = vpack.c.bf16 %v7331_v31, %v7327_v29  ;;  %v7465_v39 = vpack.c.bf16 %v7333_v33, %v7329_v30 }
 0x60d   :  { %v7464_v40 = vpack.c.bf16 %v7332_v36, %v7328_v34  ;;  %v7466_v41 = vpack.c.bf16 %v7334_v37, %v7330_v35  ;;  %v5313_v42 = vpop.f32.mrb[124].mxu0  ;;  %v7078_v43 = vpop.f32.mrb[124].mxu1 }
 0x60e   :  { %7591 = vst [vmem:[%s12775_s3 + $0x3c0] sm:$0xff] %v7463_v38  ;;  %7593 = vst [vmem:[%s12775_s3 + $0x3d0] sm:$0xff] %v7465_v39  ;;  %v8303_v44 = vadd.f32 %v5313_v42, %v12099_v3  ;;  %v8431_v45 = vadd.f32 %v7078_v43, %v12101_v4  ;;  %v5315_v46 = vpop.f32.mrb[125].mxu0  ;;  %v7080_v47 = vpop.f32.mrb[125].mxu1 }
 0x60f   :  { %7592 = vst [vmem:[%s12775_s3 + $0x3c8] sm:$0xff] %v7464_v40  ;;  %7594 = vst [vmem:[%s12775_s3 + $0x3d8] sm:$0xff] %v7466_v41  ;;  %v8304_v48 = vadd.f32 %v5315_v46, %v12103_v5  ;;  %v8432_v49 = vadd.f32 %v7080_v47, %v12105_v6  ;;  %v5317_v50 = vpop.f32.mrb[126].mxu0  ;;  %v7082_v51 = vpop.f32.mrb[126].mxu1 }
 0x610   :  { %v8305_v52 = vadd.f32 %v5317_v50, %v12099_v3  ;;  %v8433_v53 = vadd.f32 %v7082_v51, %v12101_v4  ;;  %v5319_v54 = vpop.f32.mrb[127].mxu0  ;;  %v7084_v55 = vpop.f32.mrb[127].mxu1  ;;  %v7335_v58 = vmax.f32 %v8303_v44, 0.0  ;;  %v7337_v59 = vmax.f32 %v8431_v45, 0.0 }
 0x611   :  { %v8306_v56 = vadd.f32 %v5319_v54, %v12103_v5  ;;  %v8434_v57 = vadd.f32 %v7084_v55, %v12105_v6  ;;  %v7336_v62 = vmax.f32 %v8304_v48, 0.0  ;;  %v7338_v63 = vmax.f32 %v8432_v49, 0.0 }
 0x612   :  { %v7339_v60 = vmax.f32 %v8305_v52, 0.0  ;;  %v7341_v61 = vmax.f32 %v8433_v53, 0.0 }
 0x613   :  { %v7340_v0 = vmax.f32 %v8306_v56, 0.0  ;;  %v7342_v1 = vmax.f32 %v8434_v57, 0.0 }
 0x614   :  { %v7467_v2 = vpack.c.bf16 %v7339_v60, %v7335_v58  ;;  %v7469_v7 = vpack.c.bf16 %v7341_v61, %v7337_v59 }
 0x615   :  { %v7468_v8 = vpack.c.bf16 %v7340_v0, %v7336_v62  ;;  %v7470_v3 = vpack.c.bf16 %v7342_v1, %v7338_v63 }
 0x616   :  { %7595 = vst [vmem:[%s12775_s3 + $0x3e0] sm:$0xff] %v7467_v2  ;;  %7597 = vst [vmem:[%s12775_s3 + $0x3f0] sm:$0xff] %v7469_v7 }
 0x617   :  { %7596 = vst [vmem:[%s12775_s3 + $0x3e8] sm:$0xff] %v7468_v8  ;;  %7598 = vst [vmem:[%s12775_s3 + $0x3f8] sm:$0xff] %v7470_v3 }

</bundles_post_ra>
